<compile_context>
chip_gen: v5e
topology: v5e:2x2
jax: 0.10.0
libtpu: 0.0.40
codegen_flags: <defaults>
</compile_context>

<pallas_src>
import math
import functools

import jax
import jax.numpy as jnp
from jax.experimental import pallas as pl
from jax.experimental.pallas import tpu as pltpu


# ----------------------------------------------------------------------------
# Small helpers
# ----------------------------------------------------------------------------

def _const_spec(shape):
    """Whole-array BlockSpec whose block index is constant across the grid."""
    zeros = (0,) * len(shape)
    return pl.BlockSpec(shape, lambda b: zeros)


def _ln(x, g, b, eps):
    """Row-wise LayerNorm over the last dim (all stats in f32)."""
    mu = jnp.mean(x, axis=-1, keepdims=True)
    xc = x - mu
    var = jnp.mean(xc * xc, axis=-1, keepdims=True)
    return xc * jax.lax.rsqrt(var + eps) * g + b


# ----------------------------------------------------------------------------
# Fused transformer layer kernel (attention + LN1 + FFN + LN2), one batch / step
# ----------------------------------------------------------------------------

def _layer_kernel(n_heads, eps, act,
                  x_ref, mask_ref,
                  wqkv_ref, bqkv_ref, wo_ref, bo_ref,
                  ln1_g_ref, ln1_b_ref,
                  w1_ref, b1_ref, w2_ref, b2_ref,
                  ln2_g_ref, ln2_b_ref,
                  o_ref):
    S, D = x_ref.shape[1], x_ref.shape[2]
    Dh = D // n_heads
    scale = 1.0 / math.sqrt(Dh)

    x = x_ref[0]                                            # (S, D) f32
    # key-padding additive bias, built in-kernel (f32, broadcast over rows)
    bias = jnp.where(mask_ref[0] > 0.0, 0.0, -1e9)          # (1, S)

    # --- fused QKV projection (bf16 MXU operands, f32 accumulate) ---
    xb = x.astype(jnp.bfloat16)
    qkv = jnp.dot(xb, wqkv_ref[...],
                  preferred_element_type=jnp.float32) + bqkv_ref[...]  # (S, 3D)
    q = qkv[:, 0:D]
    k = qkv[:, D:2 * D]
    v = qkv[:, 2 * D:3 * D]

    # --- per-head attention; heads concatenated back lane-dense as (S, D) ---
    ctx_parts = []
    for h in range(n_heads):
        sl = slice(h * Dh, (h + 1) * Dh)
        qh = q[:, sl].astype(jnp.bfloat16)
        kh = k[:, sl].astype(jnp.bfloat16)
        vh = v[:, sl].astype(jnp.bfloat16)
        # contract on Dh directly (no explicit k.T / XLU transpose feed)
        s = jax.lax.dot_general(qh, kh, (((1,), (1,)), ((), ())),
                                preferred_element_type=jnp.float32)
        s = s * scale + bias                                # (S, S) f32
        s = s - jnp.max(s, axis=-1, keepdims=True)
        p = jnp.exp(s)
        p = p * pl.reciprocal(jnp.sum(p, axis=-1, keepdims=True), approx=True)
        ctx_parts.append(jnp.dot(p.astype(jnp.bfloat16), vh,
                                 preferred_element_type=jnp.float32))
    ctx = jnp.concatenate(ctx_parts, axis=-1)               # (S, D)

    attn = jnp.dot(ctx.astype(jnp.bfloat16), wo_ref[...],
                   preferred_element_type=jnp.float32) + bo_ref[...]

    # --- residual + LN1 (f32) ---
    h1 = _ln(x + attn, ln1_g_ref[...], ln1_b_ref[...], eps)

    # --- FFN; (S, d_ff) intermediate stays in VMEM/vregs ---
    ff = jnp.dot(h1.astype(jnp.bfloat16), w1_ref[...],
                 preferred_element_type=jnp.float32) + b1_ref[...]
    if act == "relu":
        ff = jnp.maximum(ff, 0.0)
    else:  # erf-based GELU (RoBERTa / HF exact)
        ff = 0.5 * ff * (1.0 + jax.lax.erf(ff * (1.0 / math.sqrt(2.0))))
    y = jnp.dot(ff.astype(jnp.bfloat16), w2_ref[...],
                preferred_element_type=jnp.float32) + b2_ref[...]

    # --- residual + LN2 ---
    o_ref[0] = _ln(h1 + y, ln2_g_ref[...], ln2_b_ref[...], eps)


def fused_transformer_layer(x, mask, p, n_heads, eps, act):
    """x: (B, S, D) f32, mask: (B, S) {0,1} float. One pallas_call per layer."""
    B, S, D = x.shape
    d_ff = p["w1"].shape[1]
    kernel = functools.partial(_layer_kernel, n_heads, eps, act)
    # TODO(synk): at production sizes (large B*S) tile the row dimension and set
    # vmem_limit_bytes; at these shapes the whole layer fits VMEM trivially.
    return pl.pallas_call(
        kernel,
        grid=(B,),
        in_specs=[
            pl.BlockSpec((1, S, D), lambda b: (b, 0, 0)),
            pl.BlockSpec((1, 1, S), lambda b: (b, 0, 0)),
            _const_spec((D, 3 * D)), _const_spec((1, 3 * D)),
            _const_spec((D, D)), _const_spec((1, D)),
            _const_spec((1, D)), _const_spec((1, D)),
            _const_spec((D, d_ff)), _const_spec((1, d_ff)),
            _const_spec((d_ff, D)), _const_spec((1, D)),
            _const_spec((1, D)), _const_spec((1, D)),
        ],
        out_specs=pl.BlockSpec((1, S, D), lambda b: (b, 0, 0)),
        out_shape=jax.ShapeDtypeStruct((B, S, D), jnp.float32),
        compiler_params=pltpu.CompilerParams(
            dimension_semantics=("parallel",)),
    )(x, mask.reshape(B, 1, S).astype(jnp.float32),
      p["wqkv"], p["bqkv"], p["wo"], p["bo"],
      p["ln1_g"], p["ln1_b"],
      p["w1"], p["b1"], p["w2"], p["b2"],
      p["ln2_g"], p["ln2_b"])


# ----------------------------------------------------------------------------
# Embedding LayerNorm kernel
# ----------------------------------------------------------------------------

def _embed_ln_kernel(eps, x_ref, g_ref, b_ref, o_ref):
    o_ref[...] = _ln(x_ref[...], g_ref[...], b_ref[...], eps)


def embed_layernorm_pallas(x, g, b, eps):
    B, S, D = x.shape
    return pl.pallas_call(
        functools.partial(_embed_ln_kernel, eps),
        out_shape=jax.ShapeDtypeStruct((B, S, D), jnp.float32),
    )(x, g.reshape(1, 1, D), b.reshape(1, 1, D))


# ----------------------------------------------------------------------------
# comp_ln + prot_ln + concat fused kernel: writes mix sequence directly
# ----------------------------------------------------------------------------

def _mix_proj_kernel(Sp, h_ref, prot_ref, cw_ref, cb_ref, pw_ref, pb_ref, o_ref):
    comp = jnp.dot(h_ref[0], cw_ref[...],
                   preferred_element_type=jnp.float32) + cb_ref[...]    # (Sc, Dm)
    prot = jnp.dot(prot_ref[0], pw_ref[...],
                   preferred_element_type=jnp.float32) + pb_ref[...]    # (Sp, Dm)
    o_ref[0, :Sp, :] = prot
    o_ref[0, Sp:, :] = comp


def mix_projection_pallas(h, protein, cw, cb, pw, pb, hidden_dim):
    B, Sc, Dc = h.shape
    _, Sp, Dp = protein.shape
    S = Sp + Sc
    return pl.pallas_call(
        functools.partial(_mix_proj_kernel, Sp),
        grid=(B,),
        in_specs=[
            pl.BlockSpec((1, Sc, Dc), lambda b: (b, 0, 0)),
            pl.BlockSpec((1, Sp, Dp), lambda b: (b, 0, 0)),
            _const_spec((Dc, hidden_dim)), _const_spec((1, hidden_dim)),
            _const_spec((Dp, hidden_dim)), _const_spec((1, hidden_dim)),
        ],
        out_specs=pl.BlockSpec((1, S, hidden_dim), lambda b: (b, 0, 0)),
        out_shape=jax.ShapeDtypeStruct((B, S, hidden_dim), jnp.float32),
        compiler_params=pltpu.CompilerParams(
            dimension_semantics=("parallel",)),
    )(h, protein, cw, cb, pw, pb)


# ----------------------------------------------------------------------------
# Masked mean-pool + Linear(D,1) + sigmoid fused kernel
# ----------------------------------------------------------------------------

def _pool_fc_kernel(x_ref, m_ref, w_ref, b_ref, o_ref):
    """x:(B,S,D), m:(B,1,S), w:(D,1), b:(1,1) -> o:(B,1).

    Equivalent to torch: mean_s(out * mask / mean_s(mask)) = sum(out*m)/sum(m).
    """
    x = x_ref[...]
    m = m_ref[...][:, 0, :]                       # (B, S)
    num = jnp.sum(x * m[:, :, None], axis=1)      # (B, D)
    den = jnp.sum(m, axis=-1, keepdims=True)      # (B, 1)
    pooled = num / den
    y = jnp.dot(pooled, w_ref[...], preferred_element_type=jnp.float32) + b_ref[...]
    o_ref[...] = 1.0 / (1.0 + jnp.exp(-y))


def pool_fc_pallas(x, mask, w, b):
    B, S, D = x.shape
    return pl.pallas_call(
        _pool_fc_kernel,
        out_shape=jax.ShapeDtypeStruct((B, 1), jnp.float32),
    )(x, mask.reshape(B, 1, S).astype(jnp.float32), w, b)


# ----------------------------------------------------------------------------
# RoBERTa embeddings (gather in plain JAX, LN in Pallas)
# ----------------------------------------------------------------------------

def roberta_embeddings(input_ids, p, pad_id, eps):
    # TODO(synk): embedding table gather + cumsum position ids kept in plain JAX
    # (no clean small-vocab Pallas gather); LN is a Pallas kernel.
    not_pad = (input_ids != pad_id).astype(jnp.int32)
    pos_ids = jnp.cumsum(not_pad, axis=1) * not_pad + pad_id   # RoBERTa position ids
    emb = p["word_emb"][input_ids] + p["pos_emb"][pos_ids] + p["type_emb"][0]
    return embed_layernorm_pallas(emb, p["ln_g"], p["ln_b"], eps)


# ----------------------------------------------------------------------------
# Config + deterministic parameter init
# ----------------------------------------------------------------------------

CFG = dict(
    vocab_size=50,
    pad_id=1,
    max_pos=32,
    chem_bert_hidden=32,      # config.chem_bert_hidden_siz
    bert_layers=2,
    bert_heads=4,
    bert_intermediate=64,
    bert_ln_eps=1e-5,
    protein_dim=16,           # config.protein_dim
    hidden_dim=32,            # config.hidden_dim
    n_heads=4,                # config.n_heads
    n_layers=2,               # config.n_layers
    dim_feedforward=2048,     # nn.TransformerEncoderLayer default
    enc_ln_eps=1e-5,
)


def _dense(key, shape, scale=0.02):
    return (scale * jax.random.normal(key, shape)).astype(jnp.float32)


def _init_tlayer(kit, d, d_ff):
    # Matmul weights stored bf16 (MXU-native), biases / LN params stay f32.
    return {
        "wqkv": _dense(next(kit), (d, 3 * d)).astype(jnp.bfloat16),
        "bqkv": jnp.zeros((1, 3 * d), jnp.float32),
        "wo": _dense(next(kit), (d, d)).astype(jnp.bfloat16),
        "bo": jnp.zeros((1, d), jnp.float32),
        "ln1_g": jnp.ones((1, d), jnp.float32),
        "ln1_b": jnp.zeros((1, d), jnp.float32),
        "w1": _dense(next(kit), (d, d_ff)).astype(jnp.bfloat16),
        "b1": jnp.zeros((1, d_ff), jnp.float32),
        "w2": _dense(next(kit), (d_ff, d)).astype(jnp.bfloat16),
        "b2": jnp.zeros((1, d), jnp.float32),
        "ln2_g": jnp.ones((1, d), jnp.float32),
        "ln2_b": jnp.zeros((1, d), jnp.float32),
    }


def init_params(key, cfg):
    kit = iter(jax.random.split(key, 64))
    dc = cfg["chem_bert_hidden"]
    dh = cfg["hidden_dim"]
    return {
        "bert": {
            "emb": {
                "word_emb": _dense(next(kit), (cfg["vocab_size"], dc)),
                "pos_emb": _dense(next(kit), (cfg["max_pos"], dc)),
                "type_emb": _dense(next(kit), (1, dc)),
                "ln_g": jnp.ones((dc,), jnp.float32),
                "ln_b": jnp.zeros((dc,), jnp.float32),
            },
            "layers": [_init_tlayer(kit, dc, cfg["bert_intermediate"])
                       for _ in range(cfg["bert_layers"])],
        },
        "comp_w": _dense(next(kit), (dc, dh)),
        "comp_b": jnp.zeros((1, dh), jnp.float32),
        "prot_w": _dense(next(kit), (cfg["protein_dim"], dh)),
        "prot_b": jnp.zeros((1, dh), jnp.float32),
        "enc_layers": [_init_tlayer(kit, dh, cfg["dim_feedforward"])
                       for _ in range(cfg["n_layers"])],
        "fc_w": _dense(next(kit), (dh, 1)),
        "fc_b": jnp.zeros((1, 1), jnp.float32),
    }


# ----------------------------------------------------------------------------
# Full forward pass (mirrors ChemBertMixTransformer.forward, masks provided)
# ----------------------------------------------------------------------------

def chembert_mixtransformer_forward(params, compound_ids, protein,
                                    compound_mask, protein_mask):
    cfg = CFG

    # --- chem_bert(input_ids=compound, attention_mask=compound_mask) ---
    h = roberta_embeddings(compound_ids, params["bert"]["emb"],
                           cfg["pad_id"], cfg["bert_ln_eps"])
    for lyr in params["bert"]["layers"]:
        h = fused_transformer_layer(h, compound_mask, lyr, cfg["bert_heads"],
                                    cfg["bert_ln_eps"], act="gelu")

    # --- comp_ln / prot_ln / cat fused ---
    mix = mix_projection_pallas(h, protein,
                                params["comp_w"], params["comp_b"],
                                params["prot_w"], params["prot_b"],
                                cfg["hidden_dim"])              # (B, Sp+Sc, D)
    mix_mask = jnp.concatenate([protein_mask, compound_mask], axis=1)

    # --- nn.TransformerEncoder with src_key_padding_mask (mix_mask == 0) ---
    out = mix
    for lyr in params["enc_layers"]:
        out = fused_transformer_layer(out, mix_mask, lyr, cfg["n_heads"],
                                      cfg["enc_ln_eps"], act="relu")

    # --- out * mask / mean(mask) -> mean over seq -> Linear(D,1) -> sigmoid ---
    prob = pool_fc_pallas(out, mix_mask, params["fc_w"], params["fc_b"])
    return jnp.squeeze(prob)                                    # (B,)


# ----------------------------------------------------------------------------
# Main
# ----------------------------------------------------------------------------

if __name__ == "__main__":
    key = jax.random.PRNGKey(0)
    k_param, k_ids, k_prot = jax.random.split(key, 3)

    params = init_params(k_param, CFG)

    B, Sc, Sp = 2, 8, 8

    comp_lens = jnp.array([8, 5])
    compound_mask = (jnp.arange(Sc)[None, :] < comp_lens[:, None]).astype(jnp.float32)
    prot_lens = jnp.array([8, 6])
    protein_mask = (jnp.arange(Sp)[None, :] < prot_lens[:, None]).astype(jnp.float32)

    raw_ids = jax.random.randint(k_ids, (B, Sc), 2, CFG["vocab_size"])
    compound_ids = jnp.where(compound_mask > 0, raw_ids, CFG["pad_id"]).astype(jnp.int32)

    protein = jax.random.normal(k_prot, (B, Sp, CFG["protein_dim"]), jnp.float32)

    @jax.jit
    def run(params, compound_ids, protein, compound_mask, protein_mask):
        return chembert_mixtransformer_forward(
            params, compound_ids, protein, compound_mask, protein_mask)

    out = run(params, compound_ids, protein, compound_mask, protein_mask)
    out = jax.block_until_ready(out)
    assert out.shape == (B,)
    print("KERNEL_OK")
</pallas_src>

<mosaic_0001>
module attributes {stable_mosaic.version = 11 : i64} {
  func.func @_layer_kernel(%arg0: i32, %arg1: memref<1x8x32xf32, #tpu.memory_space<vmem>>, %arg2: memref<1x1x8xf32, #tpu.memory_space<vmem>>, %arg3: memref<32x96xbf16, #tpu.memory_space<vmem>>, %arg4: memref<1x96xf32, #tpu.memory_space<vmem>>, %arg5: memref<32x32xbf16, #tpu.memory_space<vmem>>, %arg6: memref<1x32xf32, #tpu.memory_space<vmem>>, %arg7: memref<1x32xf32, #tpu.memory_space<vmem>>, %arg8: memref<1x32xf32, #tpu.memory_space<vmem>>, %arg9: memref<32x64xbf16, #tpu.memory_space<vmem>>, %arg10: memref<1x64xf32, #tpu.memory_space<vmem>>, %arg11: memref<64x32xbf16, #tpu.memory_space<vmem>>, %arg12: memref<1x32xf32, #tpu.memory_space<vmem>>, %arg13: memref<1x32xf32, #tpu.memory_space<vmem>>, %arg14: memref<1x32xf32, #tpu.memory_space<vmem>>, %arg15: memref<1x8x32xf32, #tpu.memory_space<vmem>>) attributes {dimension_semantics = [#tpu.dimension_semantics<parallel>], iteration_bounds = array<i64: 2>, scalar_prefetch = 0 : i64, scratch_operands = 0 : i64, tpu.core_type = #tpu.core_type<tc>, window_params = [{transform_indices = @transform_0, window_bounds = array<i64: 1, 8, 32>}, {transform_indices = @transform_1, window_bounds = array<i64: 1, 1, 8>}, {pipeline_mode = #tpu.pipeline_mode<synchronous>, transform_indices = @transform_2, window_bounds = array<i64: 32, 96>}, {pipeline_mode = #tpu.pipeline_mode<synchronous>, transform_indices = @transform_3, window_bounds = array<i64: 1, 96>}, {pipeline_mode = #tpu.pipeline_mode<synchronous>, transform_indices = @transform_4, window_bounds = array<i64: 32, 32>}, {pipeline_mode = #tpu.pipeline_mode<synchronous>, transform_indices = @transform_5, window_bounds = array<i64: 1, 32>}, {pipeline_mode = #tpu.pipeline_mode<synchronous>, transform_indices = @transform_6, window_bounds = array<i64: 1, 32>}, {pipeline_mode = #tpu.pipeline_mode<synchronous>, transform_indices = @transform_7, window_bounds = array<i64: 1, 32>}, {pipeline_mode = #tpu.pipeline_mode<synchronous>, transform_indices = @transform_8, window_bounds = array<i64: 32, 64>}, {pipeline_mode = #tpu.pipeline_mode<synchronous>, transform_indices = @transform_9, window_bounds = array<i64: 1, 64>}, {pipeline_mode = #tpu.pipeline_mode<synchronous>, transform_indices = @transform_10, window_bounds = array<i64: 64, 32>}, {pipeline_mode = #tpu.pipeline_mode<synchronous>, transform_indices = @transform_11, window_bounds = array<i64: 1, 32>}, {pipeline_mode = #tpu.pipeline_mode<synchronous>, transform_indices = @transform_12, window_bounds = array<i64: 1, 32>}, {pipeline_mode = #tpu.pipeline_mode<synchronous>, transform_indices = @transform_13, window_bounds = array<i64: 1, 32>}, {transform_indices = @transform_14, window_bounds = array<i64: 1, 8, 32>}]} {
    %c0 = arith.constant 0 : index
    %c0_0 = arith.constant 0 : index
    %c0_1 = arith.constant 0 : index
    %0 = vector.load %arg1[%c0, %c0_0, %c0_1] : memref<1x8x32xf32, #tpu.memory_space<vmem>>, vector<1x8x32xf32>
    %1 = vector.shape_cast %0 : vector<1x8x32xf32> to vector<8x32xf32>
    %c0_2 = arith.constant 0 : index
    %c0_3 = arith.constant 0 : index
    %c0_4 = arith.constant 0 : index
    %2 = vector.load %arg2[%c0_2, %c0_3, %c0_4] : memref<1x1x8xf32, #tpu.memory_space<vmem>>, vector<1x1x8xf32>
    %3 = vector.shape_cast %2 : vector<1x1x8xf32> to vector<1x8xf32>
    %cst = arith.constant 0.000000e+00 : f32
    %4 = vector.broadcast %cst : f32 to vector<1x8xf32>
    %5 = arith.cmpf ogt, %3, %4 : vector<1x8xf32>
    %cst_5 = arith.constant 0.000000e+00 : f32
    %cst_6 = arith.constant -1.000000e+09 : f32
    %6 = vector.broadcast %cst_5 : f32 to vector<1x8xf32>
    %7 = vector.broadcast %cst_6 : f32 to vector<1x8xf32>
    %8 = arith.select %5, %6, %7 : vector<1x8xi1>, vector<1x8xf32>
    %9 = arith.truncf %1 : vector<8x32xf32> to vector<8x32xbf16>
    %c0_7 = arith.constant 0 : index
    %c0_8 = arith.constant 0 : index
    %10 = vector.load %arg3[%c0_7, %c0_8] : memref<32x96xbf16, #tpu.memory_space<vmem>>, vector<32x96xbf16>
    %cst_9 = arith.constant dense<0.000000e+00> : vector<8x96xf32>
    %11 = tpu.matmul %9, %10, %cst_9 {dimension_numbers = #tpu.dot_dimension_numbers<[1], [0], [0], [1], [0, 0, 1, 1], [], []>} : vector<8x32xbf16>, vector<32x96xbf16>, vector<8x96xf32> -> vector<8x96xf32>
    %c0_10 = arith.constant 0 : index
    %c0_11 = arith.constant 0 : index
    %12 = vector.load %arg4[%c0_10, %c0_11] : memref<1x96xf32, #tpu.memory_space<vmem>>, vector<1x96xf32>
    %13 = vector.broadcast %12 : vector<1x96xf32> to vector<8x96xf32>
    %14 = arith.addf %11, %13 : vector<8x96xf32>
    %15 = vector.extract_strided_slice %14 {offsets = [0, 0], sizes = [8, 32], strides = [1, 1]} : vector<8x96xf32> to vector<8x32xf32>
    %16 = vector.extract_strided_slice %14 {offsets = [0, 32], sizes = [8, 32], strides = [1, 1]} : vector<8x96xf32> to vector<8x32xf32>
    %17 = vector.extract_strided_slice %14 {offsets = [0, 64], sizes = [8, 32], strides = [1, 1]} : vector<8x96xf32> to vector<8x32xf32>
    %18 = vector.extract_strided_slice %15 {offsets = [0, 0], sizes = [8, 8], strides = [1, 1]} : vector<8x32xf32> to vector<8x8xf32>
    %19 = arith.truncf %18 : vector<8x8xf32> to vector<8x8xbf16>
    %20 = vector.extract_strided_slice %16 {offsets = [0, 0], sizes = [8, 8], strides = [1, 1]} : vector<8x32xf32> to vector<8x8xf32>
    %21 = arith.truncf %20 : vector<8x8xf32> to vector<8x8xbf16>
    %22 = vector.extract_strided_slice %17 {offsets = [0, 0], sizes = [8, 8], strides = [1, 1]} : vector<8x32xf32> to vector<8x8xf32>
    %23 = arith.truncf %22 : vector<8x8xf32> to vector<8x8xbf16>
    %cst_12 = arith.constant dense<0.000000e+00> : vector<8x8xf32>
    %24 = tpu.matmul %19, %21, %cst_12 {dimension_numbers = #tpu.dot_dimension_numbers<[1], [1], [0], [0], [0, 0, 1, 0], [], []>} : vector<8x8xbf16>, vector<8x8xbf16>, vector<8x8xf32> -> vector<8x8xf32>
    %cst_13 = arith.constant 0.353553385 : f32
    %25 = vector.broadcast %cst_13 : f32 to vector<8x8xf32>
    %26 = arith.mulf %24, %25 : vector<8x8xf32>
    %27 = vector.broadcast %8 : vector<1x8xf32> to vector<8x8xf32>
    %28 = arith.addf %26, %27 : vector<8x8xf32>
    %cst_14 = arith.constant dense<0xFF800000> : vector<8xf32>
    %29 = vector.multi_reduction <maximumf>, %28, %cst_14 [1] : vector<8x8xf32> to vector<8xf32>
    %30 = vector.shape_cast %29 : vector<8xf32> to vector<8x1xf32>
    %31 = vector.broadcast %30 : vector<8x1xf32> to vector<8x8xf32>
    %32 = arith.subf %28, %31 : vector<8x8xf32>
    %33 = math.exp %32 : vector<8x8xf32>
    %cst_15 = arith.constant dense<0.000000e+00> : vector<8xf32>
    %34 = vector.multi_reduction <add>, %33, %cst_15 [1] : vector<8x8xf32> to vector<8xf32>
    %35 = vector.shape_cast %34 : vector<8xf32> to vector<8x1xf32>
    %36 = tpu.reciprocal %35 {approx = true} : vector<8x1xf32> -> vector<8x1xf32>
    %37 = vector.broadcast %36 : vector<8x1xf32> to vector<8x8xf32>
    %38 = arith.mulf %33, %37 : vector<8x8xf32>
    %39 = arith.truncf %38 : vector<8x8xf32> to vector<8x8xbf16>
    %cst_16 = arith.constant dense<0.000000e+00> : vector<8x8xf32>
    %40 = tpu.matmul %39, %23, %cst_16 {dimension_numbers = #tpu.dot_dimension_numbers<[1], [0], [0], [1], [0, 0, 1, 1], [], []>} : vector<8x8xbf16>, vector<8x8xbf16>, vector<8x8xf32> -> vector<8x8xf32>
    %41 = vector.extract_strided_slice %15 {offsets = [0, 8], sizes = [8, 8], strides = [1, 1]} : vector<8x32xf32> to vector<8x8xf32>
    %42 = arith.truncf %41 : vector<8x8xf32> to vector<8x8xbf16>
    %43 = vector.extract_strided_slice %16 {offsets = [0, 8], sizes = [8, 8], strides = [1, 1]} : vector<8x32xf32> to vector<8x8xf32>
    %44 = arith.truncf %43 : vector<8x8xf32> to vector<8x8xbf16>
    %45 = vector.extract_strided_slice %17 {offsets = [0, 8], sizes = [8, 8], strides = [1, 1]} : vector<8x32xf32> to vector<8x8xf32>
    %46 = arith.truncf %45 : vector<8x8xf32> to vector<8x8xbf16>
    %cst_17 = arith.constant dense<0.000000e+00> : vector<8x8xf32>
    %47 = tpu.matmul %42, %44, %cst_17 {dimension_numbers = #tpu.dot_dimension_numbers<[1], [1], [0], [0], [0, 0, 1, 0], [], []>} : vector<8x8xbf16>, vector<8x8xbf16>, vector<8x8xf32> -> vector<8x8xf32>
    %cst_18 = arith.constant 0.353553385 : f32
    %48 = vector.broadcast %cst_18 : f32 to vector<8x8xf32>
    %49 = arith.mulf %47, %48 : vector<8x8xf32>
    %50 = vector.broadcast %8 : vector<1x8xf32> to vector<8x8xf32>
    %51 = arith.addf %49, %50 : vector<8x8xf32>
    %cst_19 = arith.constant dense<0xFF800000> : vector<8xf32>
    %52 = vector.multi_reduction <maximumf>, %51, %cst_19 [1] : vector<8x8xf32> to vector<8xf32>
    %53 = vector.shape_cast %52 : vector<8xf32> to vector<8x1xf32>
    %54 = vector.broadcast %53 : vector<8x1xf32> to vector<8x8xf32>
    %55 = arith.subf %51, %54 : vector<8x8xf32>
    %56 = math.exp %55 : vector<8x8xf32>
    %cst_20 = arith.constant dense<0.000000e+00> : vector<8xf32>
    %57 = vector.multi_reduction <add>, %56, %cst_20 [1] : vector<8x8xf32> to vector<8xf32>
    %58 = vector.shape_cast %57 : vector<8xf32> to vector<8x1xf32>
    %59 = tpu.reciprocal %58 {approx = true} : vector<8x1xf32> -> vector<8x1xf32>
    %60 = vector.broadcast %59 : vector<8x1xf32> to vector<8x8xf32>
    %61 = arith.mulf %56, %60 : vector<8x8xf32>
    %62 = arith.truncf %61 : vector<8x8xf32> to vector<8x8xbf16>
    %cst_21 = arith.constant dense<0.000000e+00> : vector<8x8xf32>
    %63 = tpu.matmul %62, %46, %cst_21 {dimension_numbers = #tpu.dot_dimension_numbers<[1], [0], [0], [1], [0, 0, 1, 1], [], []>} : vector<8x8xbf16>, vector<8x8xbf16>, vector<8x8xf32> -> vector<8x8xf32>
    %64 = vector.extract_strided_slice %15 {offsets = [0, 16], sizes = [8, 8], strides = [1, 1]} : vector<8x32xf32> to vector<8x8xf32>
    %65 = arith.truncf %64 : vector<8x8xf32> to vector<8x8xbf16>
    %66 = vector.extract_strided_slice %16 {offsets = [0, 16], sizes = [8, 8], strides = [1, 1]} : vector<8x32xf32> to vector<8x8xf32>
    %67 = arith.truncf %66 : vector<8x8xf32> to vector<8x8xbf16>
    %68 = vector.extract_strided_slice %17 {offsets = [0, 16], sizes = [8, 8], strides = [1, 1]} : vector<8x32xf32> to vector<8x8xf32>
    %69 = arith.truncf %68 : vector<8x8xf32> to vector<8x8xbf16>
    %cst_22 = arith.constant dense<0.000000e+00> : vector<8x8xf32>
    %70 = tpu.matmul %65, %67, %cst_22 {dimension_numbers = #tpu.dot_dimension_numbers<[1], [1], [0], [0], [0, 0, 1, 0], [], []>} : vector<8x8xbf16>, vector<8x8xbf16>, vector<8x8xf32> -> vector<8x8xf32>
    %cst_23 = arith.constant 0.353553385 : f32
    %71 = vector.broadcast %cst_23 : f32 to vector<8x8xf32>
    %72 = arith.mulf %70, %71 : vector<8x8xf32>
    %73 = vector.broadcast %8 : vector<1x8xf32> to vector<8x8xf32>
    %74 = arith.addf %72, %73 : vector<8x8xf32>
    %cst_24 = arith.constant dense<0xFF800000> : vector<8xf32>
    %75 = vector.multi_reduction <maximumf>, %74, %cst_24 [1] : vector<8x8xf32> to vector<8xf32>
    %76 = vector.shape_cast %75 : vector<8xf32> to vector<8x1xf32>
    %77 = vector.broadcast %76 : vector<8x1xf32> to vector<8x8xf32>
    %78 = arith.subf %74, %77 : vector<8x8xf32>
    %79 = math.exp %78 : vector<8x8xf32>
    %cst_25 = arith.constant dense<0.000000e+00> : vector<8xf32>
    %80 = vector.multi_reduction <add>, %79, %cst_25 [1] : vector<8x8xf32> to vector<8xf32>
    %81 = vector.shape_cast %80 : vector<8xf32> to vector<8x1xf32>
    %82 = tpu.reciprocal %81 {approx = true} : vector<8x1xf32> -> vector<8x1xf32>
    %83 = vector.broadcast %82 : vector<8x1xf32> to vector<8x8xf32>
    %84 = arith.mulf %79, %83 : vector<8x8xf32>
    %85 = arith.truncf %84 : vector<8x8xf32> to vector<8x8xbf16>
    %cst_26 = arith.constant dense<0.000000e+00> : vector<8x8xf32>
    %86 = tpu.matmul %85, %69, %cst_26 {dimension_numbers = #tpu.dot_dimension_numbers<[1], [0], [0], [1], [0, 0, 1, 1], [], []>} : vector<8x8xbf16>, vector<8x8xbf16>, vector<8x8xf32> -> vector<8x8xf32>
    %87 = vector.extract_strided_slice %15 {offsets = [0, 24], sizes = [8, 8], strides = [1, 1]} : vector<8x32xf32> to vector<8x8xf32>
    %88 = arith.truncf %87 : vector<8x8xf32> to vector<8x8xbf16>
    %89 = vector.extract_strided_slice %16 {offsets = [0, 24], sizes = [8, 8], strides = [1, 1]} : vector<8x32xf32> to vector<8x8xf32>
    %90 = arith.truncf %89 : vector<8x8xf32> to vector<8x8xbf16>
    %91 = vector.extract_strided_slice %17 {offsets = [0, 24], sizes = [8, 8], strides = [1, 1]} : vector<8x32xf32> to vector<8x8xf32>
    %92 = arith.truncf %91 : vector<8x8xf32> to vector<8x8xbf16>
    %cst_27 = arith.constant dense<0.000000e+00> : vector<8x8xf32>
    %93 = tpu.matmul %88, %90, %cst_27 {dimension_numbers = #tpu.dot_dimension_numbers<[1], [1], [0], [0], [0, 0, 1, 0], [], []>} : vector<8x8xbf16>, vector<8x8xbf16>, vector<8x8xf32> -> vector<8x8xf32>
    %cst_28 = arith.constant 0.353553385 : f32
    %94 = vector.broadcast %cst_28 : f32 to vector<8x8xf32>
    %95 = arith.mulf %93, %94 : vector<8x8xf32>
    %96 = vector.broadcast %8 : vector<1x8xf32> to vector<8x8xf32>
    %97 = arith.addf %95, %96 : vector<8x8xf32>
    %cst_29 = arith.constant dense<0xFF800000> : vector<8xf32>
    %98 = vector.multi_reduction <maximumf>, %97, %cst_29 [1] : vector<8x8xf32> to vector<8xf32>
    %99 = vector.shape_cast %98 : vector<8xf32> to vector<8x1xf32>
    %100 = vector.broadcast %99 : vector<8x1xf32> to vector<8x8xf32>
    %101 = arith.subf %97, %100 : vector<8x8xf32>
    %102 = math.exp %101 : vector<8x8xf32>
    %cst_30 = arith.constant dense<0.000000e+00> : vector<8xf32>
    %103 = vector.multi_reduction <add>, %102, %cst_30 [1] : vector<8x8xf32> to vector<8xf32>
    %104 = vector.shape_cast %103 : vector<8xf32> to vector<8x1xf32>
    %105 = tpu.reciprocal %104 {approx = true} : vector<8x1xf32> -> vector<8x1xf32>
    %106 = vector.broadcast %105 : vector<8x1xf32> to vector<8x8xf32>
    %107 = arith.mulf %102, %106 : vector<8x8xf32>
    %108 = arith.truncf %107 : vector<8x8xf32> to vector<8x8xbf16>
    %cst_31 = arith.constant dense<0.000000e+00> : vector<8x8xf32>
    %109 = tpu.matmul %108, %92, %cst_31 {dimension_numbers = #tpu.dot_dimension_numbers<[1], [0], [0], [1], [0, 0, 1, 1], [], []>} : vector<8x8xbf16>, vector<8x8xbf16>, vector<8x8xf32> -> vector<8x8xf32>
    %110 = tpu.concatenate %40, %63, %86, %109 in 1 : vector<8x8xf32>, vector<8x8xf32>, vector<8x8xf32>, vector<8x8xf32> -> vector<8x32xf32>
    %111 = arith.truncf %110 : vector<8x32xf32> to vector<8x32xbf16>
    %c0_32 = arith.constant 0 : index
    %c0_33 = arith.constant 0 : index
    %112 = vector.load %arg5[%c0_32, %c0_33] : memref<32x32xbf16, #tpu.memory_space<vmem>>, vector<32x32xbf16>
    %cst_34 = arith.constant dense<0.000000e+00> : vector<8x32xf32>
    %113 = tpu.matmul %111, %112, %cst_34 {dimension_numbers = #tpu.dot_dimension_numbers<[1], [0], [0], [1], [0, 0, 1, 1], [], []>} : vector<8x32xbf16>, vector<32x32xbf16>, vector<8x32xf32> -> vector<8x32xf32>
    %c0_35 = arith.constant 0 : index
    %c0_36 = arith.constant 0 : index
    %114 = vector.load %arg6[%c0_35, %c0_36] : memref<1x32xf32, #tpu.memory_space<vmem>>, vector<1x32xf32>
    %115 = vector.broadcast %114 : vector<1x32xf32> to vector<8x32xf32>
    %116 = arith.addf %113, %115 : vector<8x32xf32>
    %117 = arith.addf %1, %116 : vector<8x32xf32>
    %c0_37 = arith.constant 0 : index
    %c0_38 = arith.constant 0 : index
    %118 = vector.load %arg7[%c0_37, %c0_38] : memref<1x32xf32, #tpu.memory_space<vmem>>, vector<1x32xf32>
    %c0_39 = arith.constant 0 : index
    %c0_40 = arith.constant 0 : index
    %119 = vector.load %arg8[%c0_39, %c0_40] : memref<1x32xf32, #tpu.memory_space<vmem>>, vector<1x32xf32>
    %cst_41 = arith.constant dense<0.000000e+00> : vector<8xf32>
    %120 = vector.multi_reduction <add>, %117, %cst_41 [1] : vector<8x32xf32> to vector<8xf32>
    %121 = vector.shape_cast %120 : vector<8xf32> to vector<8x1xf32>
    %cst_42 = arith.constant 3.200000e+01 : f32
    %122 = vector.broadcast %cst_42 : f32 to vector<8x1xf32>
    %123 = arith.divf %121, %122 : vector<8x1xf32>
    %124 = vector.broadcast %123 : vector<8x1xf32> to vector<8x32xf32>
    %125 = arith.subf %117, %124 : vector<8x32xf32>
    %126 = arith.mulf %125, %125 : vector<8x32xf32>
    %cst_43 = arith.constant dense<0.000000e+00> : vector<8xf32>
    %127 = vector.multi_reduction <add>, %126, %cst_43 [1] : vector<8x32xf32> to vector<8xf32>
    %128 = vector.shape_cast %127 : vector<8xf32> to vector<8x1xf32>
    %cst_44 = arith.constant 3.200000e+01 : f32
    %129 = vector.broadcast %cst_44 : f32 to vector<8x1xf32>
    %130 = arith.divf %128, %129 : vector<8x1xf32>
    %cst_45 = arith.constant 9.99999974E-6 : f32
    %131 = vector.broadcast %cst_45 : f32 to vector<8x1xf32>
    %132 = arith.addf %130, %131 : vector<8x1xf32>
    %133 = math.rsqrt %132 : vector<8x1xf32>
    %134 = vector.broadcast %133 : vector<8x1xf32> to vector<8x32xf32>
    %135 = arith.mulf %125, %134 : vector<8x32xf32>
    %136 = vector.broadcast %118 : vector<1x32xf32> to vector<8x32xf32>
    %137 = arith.mulf %135, %136 : vector<8x32xf32>
    %138 = vector.broadcast %119 : vector<1x32xf32> to vector<8x32xf32>
    %139 = arith.addf %137, %138 : vector<8x32xf32>
    %140 = arith.truncf %139 : vector<8x32xf32> to vector<8x32xbf16>
    %c0_46 = arith.constant 0 : index
    %c0_47 = arith.constant 0 : index
    %141 = vector.load %arg9[%c0_46, %c0_47] : memref<32x64xbf16, #tpu.memory_space<vmem>>, vector<32x64xbf16>
    %cst_48 = arith.constant dense<0.000000e+00> : vector<8x64xf32>
    %142 = tpu.matmul %140, %141, %cst_48 {dimension_numbers = #tpu.dot_dimension_numbers<[1], [0], [0], [1], [0, 0, 1, 1], [], []>} : vector<8x32xbf16>, vector<32x64xbf16>, vector<8x64xf32> -> vector<8x64xf32>
    %c0_49 = arith.constant 0 : index
    %c0_50 = arith.constant 0 : index
    %143 = vector.load %arg10[%c0_49, %c0_50] : memref<1x64xf32, #tpu.memory_space<vmem>>, vector<1x64xf32>
    %144 = vector.broadcast %143 : vector<1x64xf32> to vector<8x64xf32>
    %145 = arith.addf %142, %144 : vector<8x64xf32>
    %cst_51 = arith.constant 5.000000e-01 : f32
    %146 = vector.broadcast %cst_51 : f32 to vector<8x64xf32>
    %147 = arith.mulf %146, %145 : vector<8x64xf32>
    %cst_52 = arith.constant 0.707106769 : f32
    %148 = vector.broadcast %cst_52 : f32 to vector<8x64xf32>
    %149 = arith.mulf %145, %148 : vector<8x64xf32>
    %150 = math.erf %149 : vector<8x64xf32>
    %cst_53 = arith.constant 1.000000e+00 : f32
    %151 = vector.broadcast %cst_53 : f32 to vector<8x64xf32>
    %152 = arith.addf %151, %150 : vector<8x64xf32>
    %153 = arith.mulf %147, %152 : vector<8x64xf32>
    %154 = arith.truncf %153 : vector<8x64xf32> to vector<8x64xbf16>
    %c0_54 = arith.constant 0 : index
    %c0_55 = arith.constant 0 : index
    %155 = vector.load %arg11[%c0_54, %c0_55] : memref<64x32xbf16, #tpu.memory_space<vmem>>, vector<64x32xbf16>
    %cst_56 = arith.constant dense<0.000000e+00> : vector<8x32xf32>
    %156 = tpu.matmul %154, %155, %cst_56 {dimension_numbers = #tpu.dot_dimension_numbers<[1], [0], [0], [1], [0, 0, 1, 1], [], []>} : vector<8x64xbf16>, vector<64x32xbf16>, vector<8x32xf32> -> vector<8x32xf32>
    %c0_57 = arith.constant 0 : index
    %c0_58 = arith.constant 0 : index
    %157 = vector.load %arg12[%c0_57, %c0_58] : memref<1x32xf32, #tpu.memory_space<vmem>>, vector<1x32xf32>
    %158 = vector.broadcast %157 : vector<1x32xf32> to vector<8x32xf32>
    %159 = arith.addf %156, %158 : vector<8x32xf32>
    %160 = arith.addf %139, %159 : vector<8x32xf32>
    %c0_59 = arith.constant 0 : index
    %c0_60 = arith.constant 0 : index
    %161 = vector.load %arg13[%c0_59, %c0_60] : memref<1x32xf32, #tpu.memory_space<vmem>>, vector<1x32xf32>
    %c0_61 = arith.constant 0 : index
    %c0_62 = arith.constant 0 : index
    %162 = vector.load %arg14[%c0_61, %c0_62] : memref<1x32xf32, #tpu.memory_space<vmem>>, vector<1x32xf32>
    %cst_63 = arith.constant dense<0.000000e+00> : vector<8xf32>
    %163 = vector.multi_reduction <add>, %160, %cst_63 [1] : vector<8x32xf32> to vector<8xf32>
    %164 = vector.shape_cast %163 : vector<8xf32> to vector<8x1xf32>
    %cst_64 = arith.constant 3.200000e+01 : f32
    %165 = vector.broadcast %cst_64 : f32 to vector<8x1xf32>
    %166 = arith.divf %164, %165 : vector<8x1xf32>
    %167 = vector.broadcast %166 : vector<8x1xf32> to vector<8x32xf32>
    %168 = arith.subf %160, %167 : vector<8x32xf32>
    %169 = arith.mulf %168, %168 : vector<8x32xf32>
    %cst_65 = arith.constant dense<0.000000e+00> : vector<8xf32>
    %170 = vector.multi_reduction <add>, %169, %cst_65 [1] : vector<8x32xf32> to vector<8xf32>
    %171 = vector.shape_cast %170 : vector<8xf32> to vector<8x1xf32>
    %cst_66 = arith.constant 3.200000e+01 : f32
    %172 = vector.broadcast %cst_66 : f32 to vector<8x1xf32>
    %173 = arith.divf %171, %172 : vector<8x1xf32>
    %cst_67 = arith.constant 9.99999974E-6 : f32
    %174 = vector.broadcast %cst_67 : f32 to vector<8x1xf32>
    %175 = arith.addf %173, %174 : vector<8x1xf32>
    %176 = math.rsqrt %175 : vector<8x1xf32>
    %177 = vector.broadcast %176 : vector<8x1xf32> to vector<8x32xf32>
    %178 = arith.mulf %168, %177 : vector<8x32xf32>
    %179 = vector.broadcast %161 : vector<1x32xf32> to vector<8x32xf32>
    %180 = arith.mulf %178, %179 : vector<8x32xf32>
    %181 = vector.broadcast %162 : vector<1x32xf32> to vector<8x32xf32>
    %182 = arith.addf %180, %181 : vector<8x32xf32>
    %c0_68 = arith.constant 0 : index
    %c0_69 = arith.constant 0 : index
    %c0_70 = arith.constant 0 : index
    %183 = vector.load %arg15[%c0_68, %c0_69, %c0_70] : memref<1x8x32xf32, #tpu.memory_space<vmem>>, vector<1x8x32xf32>
    %184 = vector.shape_cast %183 : vector<1x8x32xf32> to vector<8x32xf32>
    %185 = vector.shape_cast %182 : vector<8x32xf32> to vector<1x8x32xf32>
    tpu.vector_store %arg15[%c0_68, %c0_69, %c0_70], %185 {strides = array<i32>} : memref<1x8x32xf32, #tpu.memory_space<vmem>>, vector<1x8x32xf32>,
    return
  }
  func.func @transform_0(%arg0: i32) -> (i32, i32, i32) {
    %c0_i32 = arith.constant 0 : i32
    %c0_i32_0 = arith.constant 0 : i32
    %c0_i32_1 = arith.constant 0 : i32
    return %arg0, %c0_i32, %c0_i32_0 : i32, i32, i32
  }
  func.func @transform_1(%arg0: i32) -> (i32, i32, i32) {
    %c0_i32 = arith.constant 0 : i32
    %c0_i32_0 = arith.constant 0 : i32
    %c0_i32_1 = arith.constant 0 : i32
    return %arg0, %c0_i32, %c0_i32_0 : i32, i32, i32
  }
  func.func @transform_2(%arg0: i32) -> (i32, i32) {
    %c0_i32 = arith.constant 0 : i32
    %c0_i32_0 = arith.constant 0 : i32
    %c0_i32_1 = arith.constant 0 : i32
    return %c0_i32, %c0_i32_0 : i32, i32
  }
  func.func @transform_3(%arg0: i32) -> (i32, i32) {
    %c0_i32 = arith.constant 0 : i32
    %c0_i32_0 = arith.constant 0 : i32
    %c0_i32_1 = arith.constant 0 : i32
    return %c0_i32, %c0_i32_0 : i32, i32
  }
  func.func @transform_4(%arg0: i32) -> (i32, i32) {
    %c0_i32 = arith.constant 0 : i32
    %c0_i32_0 = arith.constant 0 : i32
    %c0_i32_1 = arith.constant 0 : i32
    return %c0_i32, %c0_i32_0 : i32, i32
  }
  func.func @transform_5(%arg0: i32) -> (i32, i32) {
    %c0_i32 = arith.constant 0 : i32
    %c0_i32_0 = arith.constant 0 : i32
    %c0_i32_1 = arith.constant 0 : i32
    return %c0_i32, %c0_i32_0 : i32, i32
  }
  func.func @transform_6(%arg0: i32) -> (i32, i32) {
    %c0_i32 = arith.constant 0 : i32
    %c0_i32_0 = arith.constant 0 : i32
    %c0_i32_1 = arith.constant 0 : i32
    return %c0_i32, %c0_i32_0 : i32, i32
  }
  func.func @transform_7(%arg0: i32) -> (i32, i32) {
    %c0_i32 = arith.constant 0 : i32
    %c0_i32_0 = arith.constant 0 : i32
    %c0_i32_1 = arith.constant 0 : i32
    return %c0_i32, %c0_i32_0 : i32, i32
  }
  func.func @transform_8(%arg0: i32) -> (i32, i32) {
    %c0_i32 = arith.constant 0 : i32
    %c0_i32_0 = arith.constant 0 : i32
    %c0_i32_1 = arith.constant 0 : i32
    return %c0_i32, %c0_i32_0 : i32, i32
  }
  func.func @transform_9(%arg0: i32) -> (i32, i32) {
    %c0_i32 = arith.constant 0 : i32
    %c0_i32_0 = arith.constant 0 : i32
    %c0_i32_1 = arith.constant 0 : i32
    return %c0_i32, %c0_i32_0 : i32, i32
  }
  func.func @transform_10(%arg0: i32) -> (i32, i32) {
    %c0_i32 = arith.constant 0 : i32
    %c0_i32_0 = arith.constant 0 : i32
    %c0_i32_1 = arith.constant 0 : i32
    return %c0_i32, %c0_i32_0 : i32, i32
  }
  func.func @transform_11(%arg0: i32) -> (i32, i32) {
    %c0_i32 = arith.constant 0 : i32
    %c0_i32_0 = arith.constant 0 : i32
    %c0_i32_1 = arith.constant 0 : i32
    return %c0_i32, %c0_i32_0 : i32, i32
  }
  func.func @transform_12(%arg0: i32) -> (i32, i32) {
    %c0_i32 = arith.constant 0 : i32
    %c0_i32_0 = arith.constant 0 : i32
    %c0_i32_1 = arith.constant 0 : i32
    return %c0_i32, %c0_i32_0 : i32, i32
  }
  func.func @transform_13(%arg0: i32) -> (i32, i32) {
    %c0_i32 = arith.constant 0 : i32
    %c0_i32_0 = arith.constant 0 : i32
    %c0_i32_1 = arith.constant 0 : i32
    return %c0_i32, %c0_i32_0 : i32, i32
  }
  func.func @transform_14(%arg0: i32) -> (i32, i32, i32) {
    %c0_i32 = arith.constant 0 : i32
    %c0_i32_0 = arith.constant 0 : i32
    %c0_i32_1 = arith.constant 0 : i32
    return %arg0, %c0_i32, %c0_i32_0 : i32, i32, i32
  }
}

module attributes {stable_mosaic.version = 11 : i64} {
  func.func @_mix_proj_kernel(%arg0: i32, %arg1: memref<1x8x32xf32, #tpu.memory_space<vmem>>, %arg2: memref<1x8x16xf32, #tpu.memory_space<vmem>>, %arg3: memref<32x32xf32, #tpu.memory_space<vmem>>, %arg4: memref<1x32xf32, #tpu.memory_space<vmem>>, %arg5: memref<16x32xf32, #tpu.memory_space<vmem>>, %arg6: memref<1x32xf32, #tpu.memory_space<vmem>>, %arg7: memref<1x16x32xf32, #tpu.memory_space<vmem>>) attributes {dimension_semantics = [#tpu.dimension_semantics<parallel>], iteration_bounds = array<i64: 2>, scalar_prefetch = 0 : i64, scratch_operands = 0 : i64, tpu.core_type = #tpu.core_type<tc>, window_params = [{transform_indices = @transform_0, window_bounds = array<i64: 1, 8, 32>}, {transform_indices = @transform_1, window_bounds = array<i64: 1, 8, 16>}, {pipeline_mode = #tpu.pipeline_mode<synchronous>, transform_indices = @transform_2, window_bounds = array<i64: 32, 32>}, {pipeline_mode = #tpu.pipeline_mode<synchronous>, transform_indices = @transform_3, window_bounds = array<i64: 1, 32>}, {pipeline_mode = #tpu.pipeline_mode<synchronous>, transform_indices = @transform_4, window_bounds = array<i64: 16, 32>}, {pipeline_mode = #tpu.pipeline_mode<synchronous>, transform_indices = @transform_5, window_bounds = array<i64: 1, 32>}, {transform_indices = @transform_6, window_bounds = array<i64: 1, 16, 32>}]} {
    %c0 = arith.constant 0 : index
    %c0_0 = arith.constant 0 : index
    %c0_1 = arith.constant 0 : index
    %0 = vector.load %arg1[%c0, %c0_0, %c0_1] : memref<1x8x32xf32, #tpu.memory_space<vmem>>, vector<1x8x32xf32>
    %1 = vector.shape_cast %0 : vector<1x8x32xf32> to vector<8x32xf32>
    %c0_2 = arith.constant 0 : index
    %c0_3 = arith.constant 0 : index
    %2 = vector.load %arg3[%c0_2, %c0_3] : memref<32x32xf32, #tpu.memory_space<vmem>>, vector<32x32xf32>
    %cst = arith.constant dense<0.000000e+00> : vector<8x32xf32>
    %3 = tpu.matmul %1, %2, %cst {dimension_numbers = #tpu.dot_dimension_numbers<[1], [0], [0], [1], [0, 0, 1, 1], [], []>} : vector<8x32xf32>, vector<32x32xf32>, vector<8x32xf32> -> vector<8x32xf32>
    %c0_4 = arith.constant 0 : index
    %c0_5 = arith.constant 0 : index
    %4 = vector.load %arg4[%c0_4, %c0_5] : memref<1x32xf32, #tpu.memory_space<vmem>>, vector<1x32xf32>
    %5 = vector.broadcast %4 : vector<1x32xf32> to vector<8x32xf32>
    %6 = arith.addf %3, %5 : vector<8x32xf32>
    %c0_6 = arith.constant 0 : index
    %c0_7 = arith.constant 0 : index
    %c0_8 = arith.constant 0 : index
    %7 = vector.load %arg2[%c0_6, %c0_7, %c0_8] : memref<1x8x16xf32, #tpu.memory_space<vmem>>, vector<1x8x16xf32>
    %8 = vector.shape_cast %7 : vector<1x8x16xf32> to vector<8x16xf32>
    %c0_9 = arith.constant 0 : index
    %c0_10 = arith.constant 0 : index
    %9 = vector.load %arg5[%c0_9, %c0_10] : memref<16x32xf32, #tpu.memory_space<vmem>>, vector<16x32xf32>
    %cst_11 = arith.constant dense<0.000000e+00> : vector<8x32xf32>
    %10 = tpu.matmul %8, %9, %cst_11 {dimension_numbers = #tpu.dot_dimension_numbers<[1], [0], [0], [1], [0, 0, 1, 1], [], []>} : vector<8x16xf32>, vector<16x32xf32>, vector<8x32xf32> -> vector<8x32xf32>
    %c0_12 = arith.constant 0 : index
    %c0_13 = arith.constant 0 : index
    %11 = vector.load %arg6[%c0_12, %c0_13] : memref<1x32xf32, #tpu.memory_space<vmem>>, vector<1x32xf32>
    %12 = vector.broadcast %11 : vector<1x32xf32> to vector<8x32xf32>
    %13 = arith.addf %10, %12 : vector<8x32xf32>
    %c0_14 = arith.constant 0 : index
    %c0_15 = arith.constant 0 : index
    %c0_16 = arith.constant 0 : index
    %14 = vector.load %arg7[%c0_14, %c0_15, %c0_16] : memref<1x16x32xf32, #tpu.memory_space<vmem>>, vector<1x8x32xf32>
    %15 = vector.shape_cast %14 : vector<1x8x32xf32> to vector<8x32xf32>
    %16 = vector.shape_cast %13 : vector<8x32xf32> to vector<1x8x32xf32>
    tpu.vector_store %arg7[%c0_14, %c0_15, %c0_16], %16 {strides = array<i32>} : memref<1x16x32xf32, #tpu.memory_space<vmem>>, vector<1x8x32xf32>,
    %c0_17 = arith.constant 0 : index
    %c8 = arith.constant 8 : index
    %c0_18 = arith.constant 0 : index
    %17 = vector.load %arg7[%c0_17, %c8, %c0_18] : memref<1x16x32xf32, #tpu.memory_space<vmem>>, vector<1x8x32xf32>
    %18 = vector.shape_cast %17 : vector<1x8x32xf32> to vector<8x32xf32>
    %19 = vector.shape_cast %6 : vector<8x32xf32> to vector<1x8x32xf32>
    tpu.vector_store %arg7[%c0_17, %c8, %c0_18], %19 {strides = array<i32>} : memref<1x16x32xf32, #tpu.memory_space<vmem>>, vector<1x8x32xf32>,
    return
  }
  func.func @transform_0(%arg0: i32) -> (i32, i32, i32) {
    %c0_i32 = arith.constant 0 : i32
    %c0_i32_0 = arith.constant 0 : i32
    %c0_i32_1 = arith.constant 0 : i32
    return %arg0, %c0_i32, %c0_i32_0 : i32, i32, i32
  }
  func.func @transform_1(%arg0: i32) -> (i32, i32, i32) {
    %c0_i32 = arith.constant 0 : i32
    %c0_i32_0 = arith.constant 0 : i32
    %c0_i32_1 = arith.constant 0 : i32
    return %arg0, %c0_i32, %c0_i32_0 : i32, i32, i32
  }
  func.func @transform_2(%arg0: i32) -> (i32, i32) {
    %c0_i32 = arith.constant 0 : i32
    %c0_i32_0 = arith.constant 0 : i32
    %c0_i32_1 = arith.constant 0 : i32
    return %c0_i32, %c0_i32_0 : i32, i32
  }
  func.func @transform_3(%arg0: i32) -> (i32, i32) {
    %c0_i32 = arith.constant 0 : i32
    %c0_i32_0 = arith.constant 0 : i32
    %c0_i32_1 = arith.constant 0 : i32
    return %c0_i32, %c0_i32_0 : i32, i32
  }
  func.func @transform_4(%arg0: i32) -> (i32, i32) {
    %c0_i32 = arith.constant 0 : i32
    %c0_i32_0 = arith.constant 0 : i32
    %c0_i32_1 = arith.constant 0 : i32
    return %c0_i32, %c0_i32_0 : i32, i32
  }
  func.func @transform_5(%arg0: i32) -> (i32, i32) {
    %c0_i32 = arith.constant 0 : i32
    %c0_i32_0 = arith.constant 0 : i32
    %c0_i32_1 = arith.constant 0 : i32
    return %c0_i32, %c0_i32_0 : i32, i32
  }
  func.func @transform_6(%arg0: i32) -> (i32, i32, i32) {
    %c0_i32 = arith.constant 0 : i32
    %c0_i32_0 = arith.constant 0 : i32
    %c0_i32_1 = arith.constant 0 : i32
    return %arg0, %c0_i32, %c0_i32_0 : i32, i32, i32
  }
}

module attributes {stable_mosaic.version = 11 : i64} {
  func.func @_embed_ln_kernel(%arg0: memref<2x8x32xf32, #tpu.memory_space<vmem>>, %arg1: memref<1x1x32xf32, #tpu.memory_space<vmem>>, %arg2: memref<1x1x32xf32, #tpu.memory_space<vmem>>, %arg3: memref<2x8x32xf32, #tpu.memory_space<vmem>>) attributes {dimension_semantics = [], scalar_prefetch = 0 : i64, scratch_operands = 0 : i64, tpu.core_type = #tpu.core_type<tc>} {
    %c0 = arith.constant 0 : index
    %c0_0 = arith.constant 0 : index
    %c0_1 = arith.constant 0 : index
    %0 = vector.load %arg0[%c0, %c0_0, %c0_1] : memref<2x8x32xf32, #tpu.memory_space<vmem>>, vector<2x8x32xf32>
    %c0_2 = arith.constant 0 : index
    %c0_3 = arith.constant 0 : index
    %c0_4 = arith.constant 0 : index
    %1 = vector.load %arg1[%c0_2, %c0_3, %c0_4] : memref<1x1x32xf32, #tpu.memory_space<vmem>>, vector<1x1x32xf32>
    %c0_5 = arith.constant 0 : index
    %c0_6 = arith.constant 0 : index
    %c0_7 = arith.constant 0 : index
    %2 = vector.load %arg2[%c0_5, %c0_6, %c0_7] : memref<1x1x32xf32, #tpu.memory_space<vmem>>, vector<1x1x32xf32>
    %cst = arith.constant dense<0.000000e+00> : vector<2x8xf32>
    %3 = vector.multi_reduction <add>, %0, %cst [2] : vector<2x8x32xf32> to vector<2x8xf32>
    %4 = vector.shape_cast %3 : vector<2x8xf32> to vector<2x8x1xf32>
    %cst_8 = arith.constant 3.200000e+01 : f32
    %5 = vector.broadcast %cst_8 : f32 to vector<2x8x1xf32>
    %6 = arith.divf %4, %5 : vector<2x8x1xf32>
    %7 = vector.broadcast %6 : vector<2x8x1xf32> to vector<2x8x32xf32>
    %8 = arith.subf %0, %7 : vector<2x8x32xf32>
    %9 = arith.mulf %8, %8 : vector<2x8x32xf32>
    %cst_9 = arith.constant dense<0.000000e+00> : vector<2x8xf32>
    %10 = vector.multi_reduction <add>, %9, %cst_9 [2] : vector<2x8x32xf32> to vector<2x8xf32>
    %11 = vector.shape_cast %10 : vector<2x8xf32> to vector<2x8x1xf32>
    %cst_10 = arith.constant 3.200000e+01 : f32
    %12 = vector.broadcast %cst_10 : f32 to vector<2x8x1xf32>
    %13 = arith.divf %11, %12 : vector<2x8x1xf32>
    %cst_11 = arith.constant 9.99999974E-6 : f32
    %14 = vector.broadcast %cst_11 : f32 to vector<2x8x1xf32>
    %15 = arith.addf %13, %14 : vector<2x8x1xf32>
    %16 = math.rsqrt %15 : vector<2x8x1xf32>
    %17 = vector.broadcast %16 : vector<2x8x1xf32> to vector<2x8x32xf32>
    %18 = arith.mulf %8, %17 : vector<2x8x32xf32>
    %19 = vector.broadcast %1 : vector<1x1x32xf32> to vector<2x8x32xf32>
    %20 = arith.mulf %18, %19 : vector<2x8x32xf32>
    %21 = vector.broadcast %2 : vector<1x1x32xf32> to vector<2x8x32xf32>
    %22 = arith.addf %20, %21 : vector<2x8x32xf32>
    %c0_12 = arith.constant 0 : index
    %c0_13 = arith.constant 0 : index
    %c0_14 = arith.constant 0 : index
    %23 = vector.load %arg3[%c0_12, %c0_13, %c0_14] : memref<2x8x32xf32, #tpu.memory_space<vmem>>, vector<2x8x32xf32>
    tpu.vector_store %arg3[%c0_12, %c0_13, %c0_14], %22 {strides = array<i32>} : memref<2x8x32xf32, #tpu.memory_space<vmem>>, vector<2x8x32xf32>,
    return
  }
}

module attributes {stable_mosaic.version = 11 : i64} {
  func.func @_pool_fc_kernel(%arg0: memref<2x16x32xf32, #tpu.memory_space<vmem>>, %arg1: memref<2x1x16xf32, #tpu.memory_space<vmem>>, %arg2: memref<32x1xf32, #tpu.memory_space<vmem>>, %arg3: memref<1x1xf32, #tpu.memory_space<vmem>>, %arg4: memref<2x1xf32, #tpu.memory_space<vmem>>) attributes {dimension_semantics = [], scalar_prefetch = 0 : i64, scratch_operands = 0 : i64, tpu.core_type = #tpu.core_type<tc>} {
    %c0 = arith.constant 0 : index
    %c0_0 = arith.constant 0 : index
    %c0_1 = arith.constant 0 : index
    %0 = vector.load %arg0[%c0, %c0_0, %c0_1] : memref<2x16x32xf32, #tpu.memory_space<vmem>>, vector<2x16x32xf32>
    %c0_2 = arith.constant 0 : index
    %c0_3 = arith.constant 0 : index
    %c0_4 = arith.constant 0 : index
    %1 = vector.load %arg1[%c0_2, %c0_3, %c0_4] : memref<2x1x16xf32, #tpu.memory_space<vmem>>, vector<2x1x16xf32>
    %2 = vector.shape_cast %1 : vector<2x1x16xf32> to vector<2x16xf32>
    %3 = vector.shape_cast %2 : vector<2x16xf32> to vector<2x16x1xf32>
    %4 = vector.broadcast %3 : vector<2x16x1xf32> to vector<2x16x32xf32>
    %5 = arith.mulf %0, %4 : vector<2x16x32xf32>
    %cst = arith.constant dense<0.000000e+00> : vector<2x32xf32>
    %6 = vector.multi_reduction <add>, %5, %cst [1] : vector<2x16x32xf32> to vector<2x32xf32>
    %cst_5 = arith.constant dense<0.000000e+00> : vector<2xf32>
    %7 = vector.multi_reduction <add>, %2, %cst_5 [1] : vector<2x16xf32> to vector<2xf32>
    %8 = vector.shape_cast %7 : vector<2xf32> to vector<2x1xf32>
    %9 = vector.broadcast %8 : vector<2x1xf32> to vector<2x32xf32>
    %10 = arith.divf %6, %9 : vector<2x32xf32>
    %c0_6 = arith.constant 0 : index
    %c0_7 = arith.constant 0 : index
    %11 = vector.load %arg2[%c0_6, %c0_7] : memref<32x1xf32, #tpu.memory_space<vmem>>, vector<32x1xf32>
    %cst_8 = arith.constant dense<0.000000e+00> : vector<2x1xf32>
    %12 = tpu.matmul %10, %11, %cst_8 {dimension_numbers = #tpu.dot_dimension_numbers<[1], [0], [0], [1], [0, 0, 1, 1], [], []>} : vector<2x32xf32>, vector<32x1xf32>, vector<2x1xf32> -> vector<2x1xf32>
    %c0_9 = arith.constant 0 : index
    %c0_10 = arith.constant 0 : index
    %13 = vector.load %arg3[%c0_9, %c0_10] : memref<1x1xf32, #tpu.memory_space<vmem>>, vector<1x1xf32>
    %14 = vector.broadcast %13 : vector<1x1xf32> to vector<2x1xf32>
    %15 = arith.addf %12, %14 : vector<2x1xf32>
    %cst_11 = arith.constant 0.000000e+00 : f32
    %16 = vector.broadcast %cst_11 : f32 to vector<2x1xf32>
    %17 = arith.subf %16, %15 : vector<2x1xf32>
    %18 = math.exp %17 : vector<2x1xf32>
    %cst_12 = arith.constant 1.000000e+00 : f32
    %19 = vector.broadcast %cst_12 : f32 to vector<2x1xf32>
    %20 = arith.addf %19, %18 : vector<2x1xf32>
    %cst_13 = arith.constant 1.000000e+00 : f32
    %21 = vector.broadcast %cst_13 : f32 to vector<2x1xf32>
    %22 = arith.divf %21, %20 : vector<2x1xf32>
    %c0_14 = arith.constant 0 : index
    %c0_15 = arith.constant 0 : index
    %23 = vector.load %arg4[%c0_14, %c0_15] : memref<2x1xf32, #tpu.memory_space<vmem>>, vector<2x1xf32>
    tpu.vector_store %arg4[%c0_14, %c0_15], %22 {strides = array<i32>} : memref<2x1xf32, #tpu.memory_space<vmem>>, vector<2x1xf32>,
    return
  }
}

module attributes {stable_mosaic.version = 11 : i64} {
  func.func @_layer_kernel(%arg0: i32, %arg1: memref<1x16x32xf32, #tpu.memory_space<vmem>>, %arg2: memref<1x1x16xf32, #tpu.memory_space<vmem>>, %arg3: memref<32x96xbf16, #tpu.memory_space<vmem>>, %arg4: memref<1x96xf32, #tpu.memory_space<vmem>>, %arg5: memref<32x32xbf16, #tpu.memory_space<vmem>>, %arg6: memref<1x32xf32, #tpu.memory_space<vmem>>, %arg7: memref<1x32xf32, #tpu.memory_space<vmem>>, %arg8: memref<1x32xf32, #tpu.memory_space<vmem>>, %arg9: memref<32x2048xbf16, #tpu.memory_space<vmem>>, %arg10: memref<1x2048xf32, #tpu.memory_space<vmem>>, %arg11: memref<2048x32xbf16, #tpu.memory_space<vmem>>, %arg12: memref<1x32xf32, #tpu.memory_space<vmem>>, %arg13: memref<1x32xf32, #tpu.memory_space<vmem>>, %arg14: memref<1x32xf32, #tpu.memory_space<vmem>>, %arg15: memref<1x16x32xf32, #tpu.memory_space<vmem>>) attributes {dimension_semantics = [#tpu.dimension_semantics<parallel>], iteration_bounds = array<i64: 2>, scalar_prefetch = 0 : i64, scratch_operands = 0 : i64, tpu.core_type = #tpu.core_type<tc>, window_params = [{transform_indices = @transform_0, window_bounds = array<i64: 1, 16, 32>}, {transform_indices = @transform_1, window_bounds = array<i64: 1, 1, 16>}, {pipeline_mode = #tpu.pipeline_mode<synchronous>, transform_indices = @transform_2, window_bounds = array<i64: 32, 96>}, {pipeline_mode = #tpu.pipeline_mode<synchronous>, transform_indices = @transform_3, window_bounds = array<i64: 1, 96>}, {pipeline_mode = #tpu.pipeline_mode<synchronous>, transform_indices = @transform_4, window_bounds = array<i64: 32, 32>}, {pipeline_mode = #tpu.pipeline_mode<synchronous>, transform_indices = @transform_5, window_bounds = array<i64: 1, 32>}, {pipeline_mode = #tpu.pipeline_mode<synchronous>, transform_indices = @transform_6, window_bounds = array<i64: 1, 32>}, {pipeline_mode = #tpu.pipeline_mode<synchronous>, transform_indices = @transform_7, window_bounds = array<i64: 1, 32>}, {pipeline_mode = #tpu.pipeline_mode<synchronous>, transform_indices = @transform_8, window_bounds = array<i64: 32, 2048>}, {pipeline_mode = #tpu.pipeline_mode<synchronous>, transform_indices = @transform_9, window_bounds = array<i64: 1, 2048>}, {pipeline_mode = #tpu.pipeline_mode<synchronous>, transform_indices = @transform_10, window_bounds = array<i64: 2048, 32>}, {pipeline_mode = #tpu.pipeline_mode<synchronous>, transform_indices = @transform_11, window_bounds = array<i64: 1, 32>}, {pipeline_mode = #tpu.pipeline_mode<synchronous>, transform_indices = @transform_12, window_bounds = array<i64: 1, 32>}, {pipeline_mode = #tpu.pipeline_mode<synchronous>, transform_indices = @transform_13, window_bounds = array<i64: 1, 32>}, {transform_indices = @transform_14, window_bounds = array<i64: 1, 16, 32>}]} {
    %c0 = arith.constant 0 : index
    %c0_0 = arith.constant 0 : index
    %c0_1 = arith.constant 0 : index
    %0 = vector.load %arg1[%c0, %c0_0, %c0_1] : memref<1x16x32xf32, #tpu.memory_space<vmem>>, vector<1x16x32xf32>
    %1 = vector.shape_cast %0 : vector<1x16x32xf32> to vector<16x32xf32>
    %c0_2 = arith.constant 0 : index
    %c0_3 = arith.constant 0 : index
    %c0_4 = arith.constant 0 : index
    %2 = vector.load %arg2[%c0_2, %c0_3, %c0_4] : memref<1x1x16xf32, #tpu.memory_space<vmem>>, vector<1x1x16xf32>
    %3 = vector.shape_cast %2 : vector<1x1x16xf32> to vector<1x16xf32>
    %cst = arith.constant 0.000000e+00 : f32
    %4 = vector.broadcast %cst : f32 to vector<1x16xf32>
    %5 = arith.cmpf ogt, %3, %4 : vector<1x16xf32>
    %cst_5 = arith.constant 0.000000e+00 : f32
    %cst_6 = arith.constant -1.000000e+09 : f32
    %6 = vector.broadcast %cst_5 : f32 to vector<1x16xf32>
    %7 = vector.broadcast %cst_6 : f32 to vector<1x16xf32>
    %8 = arith.select %5, %6, %7 : vector<1x16xi1>, vector<1x16xf32>
    %9 = arith.truncf %1 : vector<16x32xf32> to vector<16x32xbf16>
    %c0_7 = arith.constant 0 : index
    %c0_8 = arith.constant 0 : index
    %10 = vector.load %arg3[%c0_7, %c0_8] : memref<32x96xbf16, #tpu.memory_space<vmem>>, vector<32x96xbf16>
    %cst_9 = arith.constant dense<0.000000e+00> : vector<16x96xf32>
    %11 = tpu.matmul %9, %10, %cst_9 {dimension_numbers = #tpu.dot_dimension_numbers<[1], [0], [0], [1], [0, 0, 1, 1], [], []>} : vector<16x32xbf16>, vector<32x96xbf16>, vector<16x96xf32> -> vector<16x96xf32>
    %c0_10 = arith.constant 0 : index
    %c0_11 = arith.constant 0 : index
    %12 = vector.load %arg4[%c0_10, %c0_11] : memref<1x96xf32, #tpu.memory_space<vmem>>, vector<1x96xf32>
    %13 = vector.broadcast %12 : vector<1x96xf32> to vector<16x96xf32>
    %14 = arith.addf %11, %13 : vector<16x96xf32>
    %15 = vector.extract_strided_slice %14 {offsets = [0, 0], sizes = [16, 32], strides = [1, 1]} : vector<16x96xf32> to vector<16x32xf32>
    %16 = vector.extract_strided_slice %14 {offsets = [0, 32], sizes = [16, 32], strides = [1, 1]} : vector<16x96xf32> to vector<16x32xf32>
    %17 = vector.extract_strided_slice %14 {offsets = [0, 64], sizes = [16, 32], strides = [1, 1]} : vector<16x96xf32> to vector<16x32xf32>
    %18 = vector.extract_strided_slice %15 {offsets = [0, 0], sizes = [16, 8], strides = [1, 1]} : vector<16x32xf32> to vector<16x8xf32>
    %19 = arith.truncf %18 : vector<16x8xf32> to vector<16x8xbf16>
    %20 = vector.extract_strided_slice %16 {offsets = [0, 0], sizes = [16, 8], strides = [1, 1]} : vector<16x32xf32> to vector<16x8xf32>
    %21 = arith.truncf %20 : vector<16x8xf32> to vector<16x8xbf16>
    %22 = vector.extract_strided_slice %17 {offsets = [0, 0], sizes = [16, 8], strides = [1, 1]} : vector<16x32xf32> to vector<16x8xf32>
    %23 = arith.truncf %22 : vector<16x8xf32> to vector<16x8xbf16>
    %cst_12 = arith.constant dense<0.000000e+00> : vector<16x16xf32>
    %24 = tpu.matmul %19, %21, %cst_12 {dimension_numbers = #tpu.dot_dimension_numbers<[1], [1], [0], [0], [0, 0, 1, 0], [], []>} : vector<16x8xbf16>, vector<16x8xbf16>, vector<16x16xf32> -> vector<16x16xf32>
    %cst_13 = arith.constant 0.353553385 : f32
    %25 = vector.broadcast %cst_13 : f32 to vector<16x16xf32>
    %26 = arith.mulf %24, %25 : vector<16x16xf32>
    %27 = vector.broadcast %8 : vector<1x16xf32> to vector<16x16xf32>
    %28 = arith.addf %26, %27 : vector<16x16xf32>
    %cst_14 = arith.constant dense<0xFF800000> : vector<16xf32>
    %29 = vector.multi_reduction <maximumf>, %28, %cst_14 [1] : vector<16x16xf32> to vector<16xf32>
    %30 = vector.shape_cast %29 : vector<16xf32> to vector<16x1xf32>
    %31 = vector.broadcast %30 : vector<16x1xf32> to vector<16x16xf32>
    %32 = arith.subf %28, %31 : vector<16x16xf32>
    %33 = math.exp %32 : vector<16x16xf32>
    %cst_15 = arith.constant dense<0.000000e+00> : vector<16xf32>
    %34 = vector.multi_reduction <add>, %33, %cst_15 [1] : vector<16x16xf32> to vector<16xf32>
    %35 = vector.shape_cast %34 : vector<16xf32> to vector<16x1xf32>
    %36 = tpu.reciprocal %35 {approx = true} : vector<16x1xf32> -> vector<16x1xf32>
    %37 = vector.broadcast %36 : vector<16x1xf32> to vector<16x16xf32>
    %38 = arith.mulf %33, %37 : vector<16x16xf32>
    %39 = arith.truncf %38 : vector<16x16xf32> to vector<16x16xbf16>
    %cst_16 = arith.constant dense<0.000000e+00> : vector<16x8xf32>
    %40 = tpu.matmul %39, %23, %cst_16 {dimension_numbers = #tpu.dot_dimension_numbers<[1], [0], [0], [1], [0, 0, 1, 1], [], []>} : vector<16x16xbf16>, vector<16x8xbf16>, vector<16x8xf32> -> vector<16x8xf32>
    %41 = vector.extract_strided_slice %15 {offsets = [0, 8], sizes = [16, 8], strides = [1, 1]} : vector<16x32xf32> to vector<16x8xf32>
    %42 = arith.truncf %41 : vector<16x8xf32> to vector<16x8xbf16>
    %43 = vector.extract_strided_slice %16 {offsets = [0, 8], sizes = [16, 8], strides = [1, 1]} : vector<16x32xf32> to vector<16x8xf32>
    %44 = arith.truncf %43 : vector<16x8xf32> to vector<16x8xbf16>
    %45 = vector.extract_strided_slice %17 {offsets = [0, 8], sizes = [16, 8], strides = [1, 1]} : vector<16x32xf32> to vector<16x8xf32>
    %46 = arith.truncf %45 : vector<16x8xf32> to vector<16x8xbf16>
    %cst_17 = arith.constant dense<0.000000e+00> : vector<16x16xf32>
    %47 = tpu.matmul %42, %44, %cst_17 {dimension_numbers = #tpu.dot_dimension_numbers<[1], [1], [0], [0], [0, 0, 1, 0], [], []>} : vector<16x8xbf16>, vector<16x8xbf16>, vector<16x16xf32> -> vector<16x16xf32>
    %cst_18 = arith.constant 0.353553385 : f32
    %48 = vector.broadcast %cst_18 : f32 to vector<16x16xf32>
    %49 = arith.mulf %47, %48 : vector<16x16xf32>
    %50 = vector.broadcast %8 : vector<1x16xf32> to vector<16x16xf32>
    %51 = arith.addf %49, %50 : vector<16x16xf32>
    %cst_19 = arith.constant dense<0xFF800000> : vector<16xf32>
    %52 = vector.multi_reduction <maximumf>, %51, %cst_19 [1] : vector<16x16xf32> to vector<16xf32>
    %53 = vector.shape_cast %52 : vector<16xf32> to vector<16x1xf32>
    %54 = vector.broadcast %53 : vector<16x1xf32> to vector<16x16xf32>
    %55 = arith.subf %51, %54 : vector<16x16xf32>
    %56 = math.exp %55 : vector<16x16xf32>
    %cst_20 = arith.constant dense<0.000000e+00> : vector<16xf32>
    %57 = vector.multi_reduction <add>, %56, %cst_20 [1] : vector<16x16xf32> to vector<16xf32>
    %58 = vector.shape_cast %57 : vector<16xf32> to vector<16x1xf32>
    %59 = tpu.reciprocal %58 {approx = true} : vector<16x1xf32> -> vector<16x1xf32>
    %60 = vector.broadcast %59 : vector<16x1xf32> to vector<16x16xf32>
    %61 = arith.mulf %56, %60 : vector<16x16xf32>
    %62 = arith.truncf %61 : vector<16x16xf32> to vector<16x16xbf16>
    %cst_21 = arith.constant dense<0.000000e+00> : vector<16x8xf32>
    %63 = tpu.matmul %62, %46, %cst_21 {dimension_numbers = #tpu.dot_dimension_numbers<[1], [0], [0], [1], [0, 0, 1, 1], [], []>} : vector<16x16xbf16>, vector<16x8xbf16>, vector<16x8xf32> -> vector<16x8xf32>
    %64 = vector.extract_strided_slice %15 {offsets = [0, 16], sizes = [16, 8], strides = [1, 1]} : vector<16x32xf32> to vector<16x8xf32>
    %65 = arith.truncf %64 : vector<16x8xf32> to vector<16x8xbf16>
    %66 = vector.extract_strided_slice %16 {offsets = [0, 16], sizes = [16, 8], strides = [1, 1]} : vector<16x32xf32> to vector<16x8xf32>
    %67 = arith.truncf %66 : vector<16x8xf32> to vector<16x8xbf16>
    %68 = vector.extract_strided_slice %17 {offsets = [0, 16], sizes = [16, 8], strides = [1, 1]} : vector<16x32xf32> to vector<16x8xf32>
    %69 = arith.truncf %68 : vector<16x8xf32> to vector<16x8xbf16>
    %cst_22 = arith.constant dense<0.000000e+00> : vector<16x16xf32>
    %70 = tpu.matmul %65, %67, %cst_22 {dimension_numbers = #tpu.dot_dimension_numbers<[1], [1], [0], [0], [0, 0, 1, 0], [], []>} : vector<16x8xbf16>, vector<16x8xbf16>, vector<16x16xf32> -> vector<16x16xf32>
    %cst_23 = arith.constant 0.353553385 : f32
    %71 = vector.broadcast %cst_23 : f32 to vector<16x16xf32>
    %72 = arith.mulf %70, %71 : vector<16x16xf32>
    %73 = vector.broadcast %8 : vector<1x16xf32> to vector<16x16xf32>
    %74 = arith.addf %72, %73 : vector<16x16xf32>
    %cst_24 = arith.constant dense<0xFF800000> : vector<16xf32>
    %75 = vector.multi_reduction <maximumf>, %74, %cst_24 [1] : vector<16x16xf32> to vector<16xf32>
    %76 = vector.shape_cast %75 : vector<16xf32> to vector<16x1xf32>
    %77 = vector.broadcast %76 : vector<16x1xf32> to vector<16x16xf32>
    %78 = arith.subf %74, %77 : vector<16x16xf32>
    %79 = math.exp %78 : vector<16x16xf32>
    %cst_25 = arith.constant dense<0.000000e+00> : vector<16xf32>
    %80 = vector.multi_reduction <add>, %79, %cst_25 [1] : vector<16x16xf32> to vector<16xf32>
    %81 = vector.shape_cast %80 : vector<16xf32> to vector<16x1xf32>
    %82 = tpu.reciprocal %81 {approx = true} : vector<16x1xf32> -> vector<16x1xf32>
    %83 = vector.broadcast %82 : vector<16x1xf32> to vector<16x16xf32>
    %84 = arith.mulf %79, %83 : vector<16x16xf32>
    %85 = arith.truncf %84 : vector<16x16xf32> to vector<16x16xbf16>
    %cst_26 = arith.constant dense<0.000000e+00> : vector<16x8xf32>
    %86 = tpu.matmul %85, %69, %cst_26 {dimension_numbers = #tpu.dot_dimension_numbers<[1], [0], [0], [1], [0, 0, 1, 1], [], []>} : vector<16x16xbf16>, vector<16x8xbf16>, vector<16x8xf32> -> vector<16x8xf32>
    %87 = vector.extract_strided_slice %15 {offsets = [0, 24], sizes = [16, 8], strides = [1, 1]} : vector<16x32xf32> to vector<16x8xf32>
    %88 = arith.truncf %87 : vector<16x8xf32> to vector<16x8xbf16>
    %89 = vector.extract_strided_slice %16 {offsets = [0, 24], sizes = [16, 8], strides = [1, 1]} : vector<16x32xf32> to vector<16x8xf32>
    %90 = arith.truncf %89 : vector<16x8xf32> to vector<16x8xbf16>
    %91 = vector.extract_strided_slice %17 {offsets = [0, 24], sizes = [16, 8], strides = [1, 1]} : vector<16x32xf32> to vector<16x8xf32>
    %92 = arith.truncf %91 : vector<16x8xf32> to vector<16x8xbf16>
    %cst_27 = arith.constant dense<0.000000e+00> : vector<16x16xf32>
    %93 = tpu.matmul %88, %90, %cst_27 {dimension_numbers = #tpu.dot_dimension_numbers<[1], [1], [0], [0], [0, 0, 1, 0], [], []>} : vector<16x8xbf16>, vector<16x8xbf16>, vector<16x16xf32> -> vector<16x16xf32>
    %cst_28 = arith.constant 0.353553385 : f32
    %94 = vector.broadcast %cst_28 : f32 to vector<16x16xf32>
    %95 = arith.mulf %93, %94 : vector<16x16xf32>
    %96 = vector.broadcast %8 : vector<1x16xf32> to vector<16x16xf32>
    %97 = arith.addf %95, %96 : vector<16x16xf32>
    %cst_29 = arith.constant dense<0xFF800000> : vector<16xf32>
    %98 = vector.multi_reduction <maximumf>, %97, %cst_29 [1] : vector<16x16xf32> to vector<16xf32>
    %99 = vector.shape_cast %98 : vector<16xf32> to vector<16x1xf32>
    %100 = vector.broadcast %99 : vector<16x1xf32> to vector<16x16xf32>
    %101 = arith.subf %97, %100 : vector<16x16xf32>
    %102 = math.exp %101 : vector<16x16xf32>
    %cst_30 = arith.constant dense<0.000000e+00> : vector<16xf32>
    %103 = vector.multi_reduction <add>, %102, %cst_30 [1] : vector<16x16xf32> to vector<16xf32>
    %104 = vector.shape_cast %103 : vector<16xf32> to vector<16x1xf32>
    %105 = tpu.reciprocal %104 {approx = true} : vector<16x1xf32> -> vector<16x1xf32>
    %106 = vector.broadcast %105 : vector<16x1xf32> to vector<16x16xf32>
    %107 = arith.mulf %102, %106 : vector<16x16xf32>
    %108 = arith.truncf %107 : vector<16x16xf32> to vector<16x16xbf16>
    %cst_31 = arith.constant dense<0.000000e+00> : vector<16x8xf32>
    %109 = tpu.matmul %108, %92, %cst_31 {dimension_numbers = #tpu.dot_dimension_numbers<[1], [0], [0], [1], [0, 0, 1, 1], [], []>} : vector<16x16xbf16>, vector<16x8xbf16>, vector<16x8xf32> -> vector<16x8xf32>
    %110 = tpu.concatenate %40, %63, %86, %109 in 1 : vector<16x8xf32>, vector<16x8xf32>, vector<16x8xf32>, vector<16x8xf32> -> vector<16x32xf32>
    %111 = arith.truncf %110 : vector<16x32xf32> to vector<16x32xbf16>
    %c0_32 = arith.constant 0 : index
    %c0_33 = arith.constant 0 : index
    %112 = vector.load %arg5[%c0_32, %c0_33] : memref<32x32xbf16, #tpu.memory_space<vmem>>, vector<32x32xbf16>
    %cst_34 = arith.constant dense<0.000000e+00> : vector<16x32xf32>
    %113 = tpu.matmul %111, %112, %cst_34 {dimension_numbers = #tpu.dot_dimension_numbers<[1], [0], [0], [1], [0, 0, 1, 1], [], []>} : vector<16x32xbf16>, vector<32x32xbf16>, vector<16x32xf32> -> vector<16x32xf32>
    %c0_35 = arith.constant 0 : index
    %c0_36 = arith.constant 0 : index
    %114 = vector.load %arg6[%c0_35, %c0_36] : memref<1x32xf32, #tpu.memory_space<vmem>>, vector<1x32xf32>
    %115 = vector.broadcast %114 : vector<1x32xf32> to vector<16x32xf32>
    %116 = arith.addf %113, %115 : vector<16x32xf32>
    %117 = arith.addf %1, %116 : vector<16x32xf32>
    %c0_37 = arith.constant 0 : index
    %c0_38 = arith.constant 0 : index
    %118 = vector.load %arg7[%c0_37, %c0_38] : memref<1x32xf32, #tpu.memory_space<vmem>>, vector<1x32xf32>
    %c0_39 = arith.constant 0 : index
    %c0_40 = arith.constant 0 : index
    %119 = vector.load %arg8[%c0_39, %c0_40] : memref<1x32xf32, #tpu.memory_space<vmem>>, vector<1x32xf32>
    %cst_41 = arith.constant dense<0.000000e+00> : vector<16xf32>
    %120 = vector.multi_reduction <add>, %117, %cst_41 [1] : vector<16x32xf32> to vector<16xf32>
    %121 = vector.shape_cast %120 : vector<16xf32> to vector<16x1xf32>
    %cst_42 = arith.constant 3.200000e+01 : f32
    %122 = vector.broadcast %cst_42 : f32 to vector<16x1xf32>
    %123 = arith.divf %121, %122 : vector<16x1xf32>
    %124 = vector.broadcast %123 : vector<16x1xf32> to vector<16x32xf32>
    %125 = arith.subf %117, %124 : vector<16x32xf32>
    %126 = arith.mulf %125, %125 : vector<16x32xf32>
    %cst_43 = arith.constant dense<0.000000e+00> : vector<16xf32>
    %127 = vector.multi_reduction <add>, %126, %cst_43 [1] : vector<16x32xf32> to vector<16xf32>
    %128 = vector.shape_cast %127 : vector<16xf32> to vector<16x1xf32>
    %cst_44 = arith.constant 3.200000e+01 : f32
    %129 = vector.broadcast %cst_44 : f32 to vector<16x1xf32>
    %130 = arith.divf %128, %129 : vector<16x1xf32>
    %cst_45 = arith.constant 9.99999974E-6 : f32
    %131 = vector.broadcast %cst_45 : f32 to vector<16x1xf32>
    %132 = arith.addf %130, %131 : vector<16x1xf32>
    %133 = math.rsqrt %132 : vector<16x1xf32>
    %134 = vector.broadcast %133 : vector<16x1xf32> to vector<16x32xf32>
    %135 = arith.mulf %125, %134 : vector<16x32xf32>
    %136 = vector.broadcast %118 : vector<1x32xf32> to vector<16x32xf32>
    %137 = arith.mulf %135, %136 : vector<16x32xf32>
    %138 = vector.broadcast %119 : vector<1x32xf32> to vector<16x32xf32>
    %139 = arith.addf %137, %138 : vector<16x32xf32>
    %140 = arith.truncf %139 : vector<16x32xf32> to vector<16x32xbf16>
    %c0_46 = arith.constant 0 : index
    %c0_47 = arith.constant 0 : index
    %141 = vector.load %arg9[%c0_46, %c0_47] : memref<32x2048xbf16, #tpu.memory_space<vmem>>, vector<32x2048xbf16>
    %cst_48 = arith.constant dense<0.000000e+00> : vector<16x2048xf32>
    %142 = tpu.matmul %140, %141, %cst_48 {dimension_numbers = #tpu.dot_dimension_numbers<[1], [0], [0], [1], [0, 0, 1, 1], [], []>} : vector<16x32xbf16>, vector<32x2048xbf16>, vector<16x2048xf32> -> vector<16x2048xf32>
    %c0_49 = arith.constant 0 : index
    %c0_50 = arith.constant 0 : index
    %143 = vector.load %arg10[%c0_49, %c0_50] : memref<1x2048xf32, #tpu.memory_space<vmem>>, vector<1x2048xf32>
    %144 = vector.broadcast %143 : vector<1x2048xf32> to vector<16x2048xf32>
    %145 = arith.addf %142, %144 : vector<16x2048xf32>
    %cst_51 = arith.constant 0.000000e+00 : f32
    %146 = vector.broadcast %cst_51 : f32 to vector<16x2048xf32>
    %147 = arith.maximumf %145, %146 : vector<16x2048xf32>
    %148 = arith.truncf %147 : vector<16x2048xf32> to vector<16x2048xbf16>
    %c0_52 = arith.constant 0 : index
    %c0_53 = arith.constant 0 : index
    %149 = vector.load %arg11[%c0_52, %c0_53] : memref<2048x32xbf16, #tpu.memory_space<vmem>>, vector<2048x32xbf16>
    %cst_54 = arith.constant dense<0.000000e+00> : vector<16x32xf32>
    %150 = tpu.matmul %148, %149, %cst_54 {dimension_numbers = #tpu.dot_dimension_numbers<[1], [0], [0], [1], [0, 0, 1, 1], [], []>} : vector<16x2048xbf16>, vector<2048x32xbf16>, vector<16x32xf32> -> vector<16x32xf32>
    %c0_55 = arith.constant 0 : index
    %c0_56 = arith.constant 0 : index
    %151 = vector.load %arg12[%c0_55, %c0_56] : memref<1x32xf32, #tpu.memory_space<vmem>>, vector<1x32xf32>
    %152 = vector.broadcast %151 : vector<1x32xf32> to vector<16x32xf32>
    %153 = arith.addf %150, %152 : vector<16x32xf32>
    %154 = arith.addf %139, %153 : vector<16x32xf32>
    %c0_57 = arith.constant 0 : index
    %c0_58 = arith.constant 0 : index
    %155 = vector.load %arg13[%c0_57, %c0_58] : memref<1x32xf32, #tpu.memory_space<vmem>>, vector<1x32xf32>
    %c0_59 = arith.constant 0 : index
    %c0_60 = arith.constant 0 : index
    %156 = vector.load %arg14[%c0_59, %c0_60] : memref<1x32xf32, #tpu.memory_space<vmem>>, vector<1x32xf32>
    %cst_61 = arith.constant dense<0.000000e+00> : vector<16xf32>
    %157 = vector.multi_reduction <add>, %154, %cst_61 [1] : vector<16x32xf32> to vector<16xf32>
    %158 = vector.shape_cast %157 : vector<16xf32> to vector<16x1xf32>
    %cst_62 = arith.constant 3.200000e+01 : f32
    %159 = vector.broadcast %cst_62 : f32 to vector<16x1xf32>
    %160 = arith.divf %158, %159 : vector<16x1xf32>
    %161 = vector.broadcast %160 : vector<16x1xf32> to vector<16x32xf32>
    %162 = arith.subf %154, %161 : vector<16x32xf32>
    %163 = arith.mulf %162, %162 : vector<16x32xf32>
    %cst_63 = arith.constant dense<0.000000e+00> : vector<16xf32>
    %164 = vector.multi_reduction <add>, %163, %cst_63 [1] : vector<16x32xf32> to vector<16xf32>
    %165 = vector.shape_cast %164 : vector<16xf32> to vector<16x1xf32>
    %cst_64 = arith.constant 3.200000e+01 : f32
    %166 = vector.broadcast %cst_64 : f32 to vector<16x1xf32>
    %167 = arith.divf %165, %166 : vector<16x1xf32>
    %cst_65 = arith.constant 9.99999974E-6 : f32
    %168 = vector.broadcast %cst_65 : f32 to vector<16x1xf32>
    %169 = arith.addf %167, %168 : vector<16x1xf32>
    %170 = math.rsqrt %169 : vector<16x1xf32>
    %171 = vector.broadcast %170 : vector<16x1xf32> to vector<16x32xf32>
    %172 = arith.mulf %162, %171 : vector<16x32xf32>
    %173 = vector.broadcast %155 : vector<1x32xf32> to vector<16x32xf32>
    %174 = arith.mulf %172, %173 : vector<16x32xf32>
    %175 = vector.broadcast %156 : vector<1x32xf32> to vector<16x32xf32>
    %176 = arith.addf %174, %175 : vector<16x32xf32>
    %c0_66 = arith.constant 0 : index
    %c0_67 = arith.constant 0 : index
    %c0_68 = arith.constant 0 : index
    %177 = vector.load %arg15[%c0_66, %c0_67, %c0_68] : memref<1x16x32xf32, #tpu.memory_space<vmem>>, vector<1x16x32xf32>
    %178 = vector.shape_cast %177 : vector<1x16x32xf32> to vector<16x32xf32>
    %179 = vector.shape_cast %176 : vector<16x32xf32> to vector<1x16x32xf32>
    tpu.vector_store %arg15[%c0_66, %c0_67, %c0_68], %179 {strides = array<i32>} : memref<1x16x32xf32, #tpu.memory_space<vmem>>, vector<1x16x32xf32>,
    return
  }
  func.func @transform_0(%arg0: i32) -> (i32, i32, i32) {
    %c0_i32 = arith.constant 0 : i32
    %c0_i32_0 = arith.constant 0 : i32
    %c0_i32_1 = arith.constant 0 : i32
    return %arg0, %c0_i32, %c0_i32_0 : i32, i32, i32
  }
  func.func @transform_1(%arg0: i32) -> (i32, i32, i32) {
    %c0_i32 = arith.constant 0 : i32
    %c0_i32_0 = arith.constant 0 : i32
    %c0_i32_1 = arith.constant 0 : i32
    return %arg0, %c0_i32, %c0_i32_0 : i32, i32, i32
  }
  func.func @transform_2(%arg0: i32) -> (i32, i32) {
    %c0_i32 = arith.constant 0 : i32
    %c0_i32_0 = arith.constant 0 : i32
    %c0_i32_1 = arith.constant 0 : i32
    return %c0_i32, %c0_i32_0 : i32, i32
  }
  func.func @transform_3(%arg0: i32) -> (i32, i32) {
    %c0_i32 = arith.constant 0 : i32
    %c0_i32_0 = arith.constant 0 : i32
    %c0_i32_1 = arith.constant 0 : i32
    return %c0_i32, %c0_i32_0 : i32, i32
  }
  func.func @transform_4(%arg0: i32) -> (i32, i32) {
    %c0_i32 = arith.constant 0 : i32
    %c0_i32_0 = arith.constant 0 : i32
    %c0_i32_1 = arith.constant 0 : i32
    return %c0_i32, %c0_i32_0 : i32, i32
  }
  func.func @transform_5(%arg0: i32) -> (i32, i32) {
    %c0_i32 = arith.constant 0 : i32
    %c0_i32_0 = arith.constant 0 : i32
    %c0_i32_1 = arith.constant 0 : i32
    return %c0_i32, %c0_i32_0 : i32, i32
  }
  func.func @transform_6(%arg0: i32) -> (i32, i32) {
    %c0_i32 = arith.constant 0 : i32
    %c0_i32_0 = arith.constant 0 : i32
    %c0_i32_1 = arith.constant 0 : i32
    return %c0_i32, %c0_i32_0 : i32, i32
  }
  func.func @transform_7(%arg0: i32) -> (i32, i32) {
    %c0_i32 = arith.constant 0 : i32
    %c0_i32_0 = arith.constant 0 : i32
    %c0_i32_1 = arith.constant 0 : i32
    return %c0_i32, %c0_i32_0 : i32, i32
  }
  func.func @transform_8(%arg0: i32) -> (i32, i32) {
    %c0_i32 = arith.constant 0 : i32
    %c0_i32_0 = arith.constant 0 : i32
    %c0_i32_1 = arith.constant 0 : i32
    return %c0_i32, %c0_i32_0 : i32, i32
  }
  func.func @transform_9(%arg0: i32) -> (i32, i32) {
    %c0_i32 = arith.constant 0 : i32
    %c0_i32_0 = arith.constant 0 : i32
    %c0_i32_1 = arith.constant 0 : i32
    return %c0_i32, %c0_i32_0 : i32, i32
  }
  func.func @transform_10(%arg0: i32) -> (i32, i32) {
    %c0_i32 = arith.constant 0 : i32
    %c0_i32_0 = arith.constant 0 : i32
    %c0_i32_1 = arith.constant 0 : i32
    return %c0_i32, %c0_i32_0 : i32, i32
  }
  func.func @transform_11(%arg0: i32) -> (i32, i32) {
    %c0_i32 = arith.constant 0 : i32
    %c0_i32_0 = arith.constant 0 : i32
    %c0_i32_1 = arith.constant 0 : i32
    return %c0_i32, %c0_i32_0 : i32, i32
  }
  func.func @transform_12(%arg0: i32) -> (i32, i32) {
    %c0_i32 = arith.constant 0 : i32
    %c0_i32_0 = arith.constant 0 : i32
    %c0_i32_1 = arith.constant 0 : i32
    return %c0_i32, %c0_i32_0 : i32, i32
  }
  func.func @transform_13(%arg0: i32) -> (i32, i32) {
    %c0_i32 = arith.constant 0 : i32
    %c0_i32_0 = arith.constant 0 : i32
    %c0_i32_1 = arith.constant 0 : i32
    return %c0_i32, %c0_i32_0 : i32, i32
  }
  func.func @transform_14(%arg0: i32) -> (i32, i32, i32) {
    %c0_i32 = arith.constant 0 : i32
    %c0_i32_0 = arith.constant 0 : i32
    %c0_i32_1 = arith.constant 0 : i32
    return %arg0, %c0_i32, %c0_i32_0 : i32, i32, i32
  }
}

</mosaic_0001>

<bundles_post_ra>
// kernel: run.7
= control target key start
LH: loop header
LB: loop body
LE: loop exit
PB: predicated region body
PF: predicated region fallthrough
CT: control target
= control target key end

     0   :  { %vm18_vm0 = vcmask 261120   ;;  %v95_v4 = vmov 32.0   ;;  %s140_s0 = inlined_call_operand.vmem [shape: f32[2,8,32], index: 0, kind: input, shape index: {}]   ;;  %s141_s1 = inlined_call_operand.vmem [shape: f32[1,1,32], index: 1, kind: input, shape index: {}]   ;;  %s142_s2 = inlined_call_operand.vmem [shape: f32[1,1,32], index: 2, kind: input, shape index: {}]   ;;  %s143_s3 = inlined_call_operand.vmem [shape: f32[2,8,32], index: 3, kind: output, shape index: {}]  }
   0x1   :  { %v14_v0 = vld [vmem:[%s140_s0] sm:$0xff]  ;;  %v15_v2 = vld [vmem:[%s140_s0 + $0x8] sm:$0xff]  ;;  %89 = vrcp.f32 %v95_v4 }
   0x2   :  { %v19_v1 = vsel %vm18_vm0, %v14_v0, 0.0  ;;  %v22_v3 = vsel %vm18_vm0, %v15_v2, 0.0  ;;  %v87_v35 = vld [vmem:[%s141_s1] ss:$0 sm:$0xff] }
   0x3   :  { %20 = vadd.xlane.f32.xlu0 %v19_v1  ;;  %v88_v38 = vld [vmem:[%s142_s2] ss:$0 sm:$0xff] }
   0x7   :  { %v90_v5 = vpop.eup %89 }
   0x8   :  { %v26_v6 = vmul.f32 32.0, %v90_v5  ;;  %vm30_vm1 = vweird.f32 %v90_v5 }
   0xa   :  { %v27_v7 = vsub.f32 1.0, %v26_v6 }
   0xb   :  { %23 = vadd.xlane.f32.xlu0 %v22_v3 }
   0xc   :  { %v28_v8 = vmul.f32 %v90_v5, %v27_v7 }
   0xe   :  { %v29_v9 = vadd.f32 %v90_v5, %v28_v8 }
  0x10   :  { %v31_v10 = vsel %vm30_vm1, %v90_v5, %v29_v9 }
  0x76   :  { %v21_v11 = vpop.xlane.xlu0 %20 }
  0x77   :  { %v32_v12 = vmul.f32 %v31_v10, %v21_v11 }
  0x79   :  { %v34_v13 = vsub.f32 %v14_v0, %v32_v12 }
  0x7b   :  { %v36_v14 = vmul.f32 %v34_v13, %v34_v13 }
  0x7d   :  { %v38_v15 = vsel %vm18_vm0, %v36_v14, 0.0 }
  0x7e   :  { %39 = vadd.xlane.f32.xlu1 %v38_v15  ;;  %v24_v16 = vpop.xlane.xlu0 %23 }
  0x7f   :  { %v33_v17 = vmul.f32 %v31_v10, %v24_v16 }
  0x81   :  { %v35_v18 = vsub.f32 %v15_v2, %v33_v17 }
  0x83   :  { %v37_v19 = vmul.f32 %v35_v18, %v35_v18 }
  0x85   :  { %v41_v20 = vsel %vm18_vm0, %v37_v19, 0.0 }
  0x86   :  { %42 = vadd.xlane.f32.xlu1 %v41_v20 }
  0xf1   :  { %v40_v21 = vpop.xlane.xlu1 %39 }
  0xf2   :  { %v44_v22 = vmul.f32 %v40_v21, %v31_v10 }
  0xf4   :  { %v46_v23 = vadd.f32 1e-05, %v44_v22 }
  0xf6   :  { %91 = vrsqrt.f32 %v46_v23  ;;  %vm54_vm3 = vweird.f32 %v46_v23 }
  0xf9   :  { %v43_v24 = vpop.xlane.xlu1 %42 }
  0xfa   :  { %v45_v25 = vmul.f32 %v43_v24, %v31_v10 }
  0xfc   :  { %v92_v26 = vpop.eup %91  ;;  %v47_v27 = vadd.f32 1e-05, %v45_v25 }
  0xfd   :  { %v49_v28 = vmul.f32 %v92_v26, %v46_v23  ;;  %vm55_vm2 = vweird.f32 %v92_v26 }
  0xfe   :  { %93 = vrsqrt.f32 %v47_v27  ;;  %vm56_vm4 = vmor %vm54_vm3, %vm55_vm2  ;;  %vm64_vm6 = vweird.f32 %v47_v27 }
  0xff   :  { %v50_v29 = vmul.f32 %v92_v26, %v49_v28 }
 0x101   :  { %v51_v30 = vmul.f32 0.5, %v50_v29 }
 0x103   :  { %v52_v31 = vsub.f32 1.5, %v51_v30 }
 0x104   :  { %v94_v32 = vpop.eup %93 }
 0x105   :  { %v53_v33 = vmul.f32 %v92_v26, %v52_v31  ;;  %v59_v34 = vmul.f32 %v94_v32, %v47_v27  ;;  %vm65_vm5 = vweird.f32 %v94_v32 }
 0x106   :  { %vm66_vm7 = vmor %vm64_vm6, %vm65_vm5 }
 0x107   :  { %v57_v36 = vsel %vm56_vm4, %v92_v26, %v53_v33  ;;  %v60_v37 = vmul.f32 %v94_v32, %v59_v34 }
 0x108   :  { %v68_v39 = vmul.f32 %v57_v36, %v34_v13 }
 0x109   :  { %v61_v40 = vmul.f32 0.5, %v60_v37 }
 0x10a   :  { %v73_v41 = vmul.f32 %v87_v35, %v68_v39 }
 0x10b   :  { %v62_v42 = vsub.f32 1.5, %v61_v40 }
 0x10c   :  { %v78_v43 = vadd.f32 %v88_v38, %v73_v41 }
 0x10d   :  { %v63_v44 = vmul.f32 %v94_v32, %v62_v42 }
 0x10e   :  { %80 = vst.msk [vmem:[%s143_s3] sm:$0xff] %vm18_vm0, %v78_v43 }
 0x10f   :  { %v67_v45 = vsel %vm66_vm7, %v94_v32, %v63_v44 }
 0x110   :  { %v69_v46 = vmul.f32 %v67_v45, %v35_v18 }
 0x112   :  { %v74_v47 = vmul.f32 %v87_v35, %v69_v46 }
 0x114   :  { %v79_v48 = vadd.f32 %v88_v38, %v74_v47 }
 0x116   :  { %81 = vst.msk [vmem:[%s143_s3 + $0x8] sm:$0xff] %vm18_vm0, %v79_v48 }

// kernel: run.10
= control target key start
LH: loop header
LB: loop body
LE: loop exit
PB: predicated region body
PF: predicated region fallthrough
CT: control target
= control target key end

     0   :  { %s466_s21 = smov 0   ;;  %s513_s0 = inlined_call_operand.vmem [shape: f32[2,8,32], index: 0, kind: input, shape index: {}]   ;;  %s514_s1 = inlined_call_operand.vmem [shape: f32[2,8,16], index: 1, kind: input, shape index: {}]   ;;  %s515_s2 = inlined_call_operand.vmem [shape: f32[32,32], index: 2, kind: input, shape index: {}]   ;;  %s516_s3 = inlined_call_operand.vmem [shape: f32[1,32], index: 3, kind: input, shape index: {}]   ;;  %s517_s4 = inlined_call_operand.vmem [shape: f32[16,32], index: 4, kind: input, shape index: {}]   ;;  %s518_s5 = inlined_call_operand.vmem [shape: f32[1,32], index: 5, kind: input, shape index: {}]   ;;  %s519_s6 = inlined_call_operand.vmem [shape: f32[2,16,32], index: 6, kind: output, shape index: {}]  }
   0x1 LB: > { %s399_s22 = sadd.s32 4294967295, %s429_s21   ;;  %p403_p0 = scmp.ge.s32.totalorder %s429_s21, 1  ;;  %s429_s21 = sphi %s466_s21, %s16_s21  }
   0x2   : > { %p220_p1 = scmp.lt.s32.totalorder %s429_s21, 3 }
   0x4   : > { %p221_p2 = pnand %p403_p0, %p220_p1 }
   0x5   : > { %p253_p3 = scmp.lt.s32.totalorder (!%p221_p2), %s399_s22, 1 }
   0x6   : > { %224 = sbr.rel (%p221_p2) target bundleno = 148 (0x94), region = 44 }
   0xb   : > { %v270_v0 = vld [vmem:[%s515_s2 + $0x18] sm:$0xff]  ;;  %v269_v1 = vld [vmem:[%s515_s2 + $0x10] sm:$0xff]  ;;  %v301_v2 = vld [vmem:[%s517_s4 + $0x8] sm:$0xff]  ;;  %s521_s22 = smov (!%p253_p3, %s399_s22), 1  ;;  %vm306_vm0 = vcmask 130048   ;;  %vm275_vm1 = vcmask 261120  }
   0xc   : > { %291 = vmatpush.msra.mxu0 %v270_v0  ;;  %v300_v3 = vld [vmem:[%s517_s4] sm:$0xff]  ;;  %v268_v4 = vld [vmem:[%s515_s2 + $0x8] sm:$0xff]  ;;  %324 = vmatpush.msra.mxu1 %v301_v2  ;;  %s404_s11 = sshll.u32 %s521_s22, 3  ;;  %s412_s18 = sshll.u32 %s521_s22, 4 }
   0xd   : > { %v267_v5 = vld [vmem:[%s515_s2] sm:$0xff]  ;;  %s256_s14 = scalar_lea.vmem %s513_s0, %s404_s11  ;;  %s260_s17 = scalar_lea.vmem %s514_s1, %s404_s11 }
   0xe   : > { %292 = vmatpush.msra.mxu0 %v269_v1  ;;  %325 = vmatpush.msra.mxu1 %v300_v3  ;;  %v266_v6 = vld [vmem:[%s256_s14] sm:$0xff]  ;;  %s265_s27 = scalar_lea.vmem %s519_s6, %s412_s18 }
   0xf   : > { %v299_v7 = vld [vmem:[%s260_s17] sm:$0xff] }
  0x10   : > { %293 = vmatpush.msra.mxu0 %v268_v4  ;;  %409 = vmatmul.msk.f32.vlgmr.msra.gmra.mxu1 %vm306_vm0, %v299_v7  ;;  %v422_v8 = vld [vmem:[%s518_s5] ss:$0 sm:$0xff] }
  0x11   : > { %v421_v9 = vld [vmem:[%s516_s3] ss:$0 sm:$0xff] }
  0x12   : > { %294 = vmatpush.msra.mxu0 %v267_v5 }
  0x13   : > { %408 = vmatmul.msk.f32.vlgmr.msra.gmra.mxu0 %vm275_vm1, %v266_v6 }
  0x8d   : > { %v327_v10 = vpop.f32.mrf.mxu1 }
  0x8e   : > { %v328_v12 = vadd.f32 %v422_v8, %v327_v10 }
  0x90   : > { %v296_v11 = vpop.f32.mrf.mxu0  ;;  %330 = vst.msk [vmem:[%s265_s27] sm:$0xff] %vm275_vm1, %v328_v12 }
  0x91   : > { %v297_v13 = vadd.f32 %v421_v9, %v296_v11 }
  0x93   : > { %331 = vst.msk [vmem:[%s265_s27 + $0x8] sm:$0xff] %vm275_vm1, %v297_v13 }
  0x94 PF: > { %s16_s21 = sadd.s32 1, %s429_s21  }
  0x95   : > { %p13_p4 = scmp.ge.s32.totalorder %s16_s21, 4  }
  0x97   :  { %15 = sbr.rel (!%p13_p4) target bundleno = 1 (0x1), region = 77 }

// kernel: run.8
= control target key start
LH: loop header
LB: loop body
LE: loop exit
PB: predicated region body
PF: predicated region fallthrough
CT: control target
= control target key end

     0   :  { %s1309_s29 = smov 0   ;;  %s1454_s0 = inlined_call_operand.vmem [shape: f32[2,8,32], index: 0, kind: input, shape index: {}]   ;;  %s1455_s1 = inlined_call_operand.vmem [shape: f32[2,1,8], index: 1, kind: input, shape index: {}]   ;;  %s1456_s2 = inlined_call_operand.vmem [shape: bf16[32,96], index: 2, kind: input, shape index: {}]   ;;  %s1457_s3 = inlined_call_operand.vmem [shape: f32[1,96], index: 3, kind: input, shape index: {}]   ;;  %s1458_s4 = inlined_call_operand.vmem [shape: bf16[32,32], index: 4, kind: input, shape index: {}]   ;;  %s1459_s5 = inlined_call_operand.vmem [shape: f32[1,32], index: 5, kind: input, shape index: {}]   ;;  %s1460_s6 = inlined_call_operand.vmem [shape: f32[1,32], index: 6, kind: input, shape index: {}]   ;;  %s1461_s7 = inlined_call_operand.vmem [shape: f32[1,32], index: 7, kind: input, shape index: {}]   ;;  %s1462_s8 = inlined_call_operand.vmem [shape: bf16[32,64], index: 8, kind: input, shape index: {}]   ;;  %s1463_s9 = inlined_call_operand.vmem [shape: f32[1,64], index: 9, kind: input, shape index: {}]   ;;  %s1464_s10 = inlined_call_operand.vmem [shape: bf16[64,32], index: 10, kind: input, shape index: {}]   ;;  %s1465_s11 = inlined_call_operand.vmem [shape: f32[1,32], index: 11, kind: input, shape index: {}]   ;;  %s1466_s12 = inlined_call_operand.vmem [shape: f32[1,32], index: 12, kind: input, shape index: {}]   ;;  %s1467_s13 = inlined_call_operand.vmem [shape: f32[1,32], index: 13, kind: input, shape index: {}]   ;;  %s1468_s14 = inlined_call_operand.vmem [shape: f32[2,8,32], index: 14, kind: output, shape index: {}]  }
   0x1 LB: > { %s1082_s30 = sadd.s32 4294967295, %s1216_s29   ;;  %p1086_p0 = scmp.ge.s32.totalorder %s1216_s29, 1  ;;  %s1216_s29 = sphi %s1309_s29, %s24_s29  }
   0x2   : > { %p419_p1 = scmp.lt.s32.totalorder %s1216_s29, 3 }
   0x4   : > { %p420_p2 = pnand %p1086_p0, %p419_p1 }
   0x5   : > { %p466_p3 = scmp.lt.s32.totalorder (!%p420_p2), %s1082_s30, 1  ;;  %s1218_s25 = smov (!%p420_p2), 104  }
   0x6   : > { %423 = sbr.rel (%p420_p2) target bundleno = 1941 (0x795), region = 76  ;;  %s1219_s26 = smov (!%p420_p2), 120  }
   0x7   : > { %s1220_s27 = smov (!%p420_p2), 96   ;;  %s1221_s28 = smov (!%p420_p2), 80  }
   0x8   : > { %s1222_s15 = smov (!%p420_p2), 72   ;;  %s1223_s16 = smov (!%p420_p2), 88  }
   0x9   : > { %s1224_s17 = smov (!%p420_p2), 112   ;;  %s1227_s23 = smov (!%p420_p2), 40  }
   0xa   : > { %s1228_s24 = smov (!%p420_p2), 56  }
   0xb   : > { %v1145_v0 = vld [vmem:[%s1456_s2 + $0x8] sm:$0xff]  ;;  %v1144_v1 = vld [vmem:[%s1456_s2] sm:$0xff]  ;;  %s1470_s30 = smov (!%p466_p3, %s1082_s30), 1  ;;  %vm503_vm0 = vcmask 261120   ;;  %vm524_vm1 = vcmask 64512   ;;  %vm566_vm3 = vcmask 1043456  }
   0xc   : > { %513 = vmatpush.bf16.msra.mxu0 %v1145_v0  ;;  %s1087_s19 = sshll.u32 %s1470_s30, 3  ;;  %v1178_v4 = vld [vmem:[%s1457_s3] ss:$0 sm:$0xff]  ;;  %s472_s21 = scalar_lea.vmem %s1455_s1, %s1470_s30  ;;  %v1225_v21 = vmov -1e+09   ;;  %vm770_vm4 = vcmask 130048  }
   0xd   : > { %s469_s22 = scalar_lea.vmem %s1454_s0, %s1087_s19  ;;  %v479_v20 = vld [vmem:[%s472_s21] sm:$0x1]  ;;  %vm772_vm5 = vcmask 195584   ;;  %vm969_vm14 = vcmask 523264  }
   0xe   : > { %v1331_v2 = vld [vmem:[%s469_s22] sm:$0xff]  ;;  %vm480_vm2 = vcmp.gt.f32.partialorder %v479_v20, 0.0  ;;  %s1226_s22 = smov 64  }
   0xf   : > { %v482_v3 = vpack.c.bf16 %v1331_v2, %v1331_v2  ;;  %v481_v22 = vsel %vm480_vm2, 0.0, %v1225_v21 }
  0x10   : > { %514 = vmatpush.bf16.msra.mxu0 %v1144_v1  ;;  %v546_v23 = vperm.slane %v481_v22, 0 }
  0x13   : > { %1097 = vmatmul.msk.bf16.vlgmr.msra.gmra.mxu0 %vm503_vm0, %v482_v3 }
  0x90   : > { %v516_v5 = vpop.f32.mrf.mxu0 }
  0x91   : > { %v517_v6 = vadd.f32 %v1178_v4, %v516_v5 }
  0x93   : > { %v1339_v7 = vpack.c.bf16 %v517_v6, %v517_v6 }
  0x95   : > { %699 = vrot.lane.b32.xlu2 %v1339_v7, %s1218_s25  ;;  %583 = vrot.lane.b32.xlu1 %v1339_v7, %s1219_s26  ;;  %s1229_s25 = smov 48   ;;  %s1230_s26 = smov 8  }
  0x96   : > { %522 = vrot.lane.b32.xlu0 %v1339_v7, %s1220_s27  ;;  %s1231_s27 = smov 16  }
  0x98   : > { %v518_v8 = vpop.f32.mrf.mxu0 }
  0x9d   : > { %643 = vrot.lane.b32.xlu2 %v1339_v7, %s1221_s28  ;;  %701 = vrot.lane.b32.xlu1 %v1339_v7, %s1222_s15  ;;  %s1232_s28 = smov 24  }
  0x9e   : > { %585 = vrot.lane.b32.xlu0 %v1339_v7, %s1223_s16 }
  0xa6   : > { %641 = vrot.lane.b32.xlu0 %v1339_v7, %s1224_s17 }
  0xef   : > { %v700_v9 = vpop.permute.xlu2 %699 }
  0xf7   : > { %v644_v10 = vpop.permute.xlu2 %643 }
  0xf8   : > { %v649_v11 = vsel %vm524_vm1, %v644_v10, 0 }
  0xf9   : > { %658 = vmatpush.bf16.xpose.msrb.mxu0 %v649_v11 }
 0x107   : > { %v584_v12 = vpop.permute.xlu1 %583 }
 0x108   : > { %v523_v13 = vpop.permute.xlu0 %522 }
 0x109   : > { %v529_v14 = vsel %vm524_vm1, %v523_v13, 0 }
 0x10a   : > { %538 = vmatpush.bf16.xpose.msra.mxu1 %v529_v14 }
 0x10f   : > { %v702_v15 = vpop.permute.xlu1 %701 }
 0x110   : > { %v586_v16 = vpop.permute.xlu0 %585  ;;  %v707_v17 = vsel %vm524_vm1, %v702_v15, 0 }
 0x111   : > { %1098 = vmatmul.msk.bf16.vlgmr.msra.gmra.mxu1 %vm524_vm1, %v1339_v7  ;;  %v591_v18 = vsel %vm524_vm1, %v586_v16, 0 }
 0x112   : > { %600 = vmatpush.bf16.xpose.msra.mxu3 %v591_v18 }
 0x118   : > { %v642_v19 = vpop.permute.xlu0 %641 }
 0x119   : > { %1100 = vmatmul.msk.bf16.vlgmr.msra.gmra.mxu3 %vm524_vm1, %v584_v12  ;;  %1102 = vmatmul.msk.bf16.vlgmr.msrb.gmra.mxu0 %vm524_vm1, %v642_v19 }
 0x11a   : > { %716 = vmatpush.bf16.xpose.msrb.mxu3 %v707_v17 }
 0x129   : > { %1104 = vmatmul.msk.bf16.vlgmr.msrb.gmra.mxu3 %vm524_vm1, %v700_v9 }
 0x18e   : > { %v540_v24 = vpop.f32.mrf.mxu1 }
 0x18f   : > { %v544_v25 = vmul.f32 0.35355338, %v540_v24 }
 0x191   : > { %v548_v26 = vadd.f32 %v546_v23, %v544_v25 }
 0x193   : > { %v549_v27 = vsel %vm524_vm1, %v548_v26, -inf }
 0x194   : > { %550 = vmax.xlane.f32.xlu1 %v549_v27 }
 0x196   : > { %v542_v28 = vpop.f32.mrf.mxu1  ;;  %v660_v29 = vpop.f32.mrf.mxu0 }
 0x197   : > { %v664_v34 = vmul.f32 0.35355338, %v660_v29 }
 0x199   : > { %v665_v37 = vadd.f32 %v664_v34, %v546_v23  ;;  %v1146_v34 = vld [vmem:[%s1458_s4] sm:$0xff] }
 0x19b   : > { %v666_v38 = vsel %vm524_vm1, %v665_v37, -inf }
 0x19c   : > { %v602_v30 = vpop.f32.mrf.mxu3 }
 0x19d   : > { %v606_v31 = vmul.f32 0.35355338, %v602_v30 }
 0x19e   : > { %v662_v32 = vpop.f32.mrf.mxu0 }
 0x19f   : > { %v607_v33 = vadd.f32 %v606_v31, %v546_v23 }
 0x1a1   : > { %v608_v35 = vsel %vm524_vm1, %v607_v33, -inf }
 0x1a2   : > { %609 = vmax.xlane.f32.xlu2 %v608_v35 }
 0x1a4   : > { %v604_v36 = vpop.f32.mrf.mxu3 }
 0x1aa   : > { %667 = vmax.xlane.f32.xlu2 %v666_v38 }
 0x1ac   : > { %v718_v39 = vpop.f32.mrf.mxu3 }
 0x1ad   : > { %v722_v40 = vmul.f32 0.35355338, %v718_v39 }
 0x1af   : > { %v723_v41 = vadd.f32 %v722_v40, %v546_v23 }
 0x1b1   : > { %v724_v42 = vsel %vm524_vm1, %v723_v41, -inf }
 0x1b2   : > { %725 = vmax.xlane.f32.xlu0 %v724_v42  ;;  %v1179_v42 = vld [vmem:[%s1459_s5] ss:$0 sm:$0xff] }
 0x1b4   : > { %v720_v43 = vpop.f32.mrf.mxu3 }
 0x1c2   : > { %561 = vrot.lane.b32.xlu2 %v1339_v7, %s1226_s22  ;;  %s476_s22 = scalar_lea.vmem %s1468_s14, %s1087_s19 }
 0x1ca   : > { %736 = vrot.lane.b32.xlu2 %v1339_v7, %s1227_s23 }
 0x207   : > { %v551_v44 = vpop.xlane.xlu1 %550 }
 0x208   : > { %v552_v45 = vsub.f32 %v548_v26, %v551_v44 }
 0x20a   : > { %v553_v46 = vmul.f32 1.442695, %v552_v45 }
 0x20c   : > { %1186 = vpow2.f32 %v553_v46 }
 0x212   : > { %v1187_v47 = vpop.eup %1186 }
 0x213   : > { %v555_v48 = vsel %vm524_vm1, %v1187_v47, 0.0 }
 0x214   : > { %556 = vadd.xlane.f32.xlu1 %v555_v48  ;;  %v1233_v48 = vmov 32.0  }
 0x215   : > { %v610_v49 = vpop.xlane.xlu2 %609 }
 0x216   : > { %v611_v52 = vsub.f32 %v607_v33, %v610_v49  ;;  %v1147_v33 = vld [vmem:[%s1458_s4 + $0x8] sm:$0xff] }
 0x217   : > { %804 = vmatpush.bf16.msra.mxu0 %v1147_v33 }
 0x218   : > { %v612_v54 = vmul.f32 1.442695, %v611_v52 }
 0x21b   : > { %805 = vmatpush.bf16.msra.mxu0 %v1146_v34 }
 0x21d   : > { %v668_v50 = vpop.xlane.xlu2 %667 }
 0x21e   : > { %v669_v51 = vsub.f32 %v665_v37, %v668_v50 }
 0x220   : > { %v670_v53 = vmul.f32 1.442695, %v669_v51 }
 0x222   : > { %1188 = vpow2.f32 %v670_v53 }
 0x223   : > { %1190 = vpow2.f32 %v612_v54 }
 0x225   : > { %v562_v55 = vpop.permute.xlu2 %561  ;;  %v726_v56 = vpop.xlane.xlu0 %725 }
 0x226   : > { %v568_v57 = vsel %vm566_vm3, %v562_v55, 0  ;;  %v727_v59 = vsub.f32 %v723_v41, %v726_v56 }
 0x227   : > { %577 = vmatpush.bf16.msra.mxu2 %v568_v57 }
 0x228   : > { %v1189_v58 = vpop.eup %1188  ;;  %v728_v61 = vmul.f32 1.442695, %v727_v59  ;;  %v1149_v59 = vld [vmem:[%s1462_s8 + $0x8] sm:$0xff] }
 0x229   : > { %v672_v60 = vsel %vm524_vm1, %v1189_v58, 0.0  ;;  %v1191_v62 = vpop.eup %1190 }
 0x22a   : > { %673 = vadd.xlane.f32.xlu0 %v672_v60  ;;  %1192 = vpow2.f32 %v728_v61  ;;  %v614_v63 = vsel %vm524_vm1, %v1191_v62, 0.0  ;;  %v1148_v60 = vld [vmem:[%s1462_s8] sm:$0xff] }
 0x22d   : > { %620 = vrot.lane.b32.xlu1 %v1339_v7, %s1228_s24  ;;  %v737_v9 = vpop.permute.xlu2 %736 }
 0x22e   : > { %v742_v12 = vsel %vm566_vm3, %v737_v9, 0 }
 0x230   : > { %v1193_v0 = vpop.eup %1192 }
 0x231   : > { %v730_v1 = vsel %vm524_vm1, %v1193_v0, 0.0 }
 0x232   : > { %615 = vadd.xlane.f32.xlu0 %v614_v63 }
 0x23a   : > { %731 = vadd.xlane.f32.xlu0 %v730_v1 }
 0x24e   : > { %678 = vrot.lane.b32.xlu0 %v1339_v7, %s1229_s25 }
 0x287   : > { %v557_v3 = vpop.xlane.xlu1 %556 }
 0x288   : > { %1194 = vrcp.f32 %v557_v3 }
 0x28e   : > { %v1195_v4 = vpop.eup %1194 }
 0x28f   : > { %v559_v5 = vmul.f32 %v1195_v4, %v1187_v47 }
 0x291   : > { %v560_v6 = vpack.c.bf16 %v559_v5, %v559_v5 }
 0x293   : > { %1099 = vmatmul.msk.bf16.vlgmr.msra.gmra.mxu2 %vm524_vm1, %v560_v6 }
 0x29d   : > { %v674_v8 = vpop.xlane.xlu0 %673 }
 0x29f   : > { %v621_v10 = vpop.permute.xlu1 %620 }
 0x2a0   : > { %v626_v11 = vsel %vm566_vm3, %v621_v10, 0  ;;  %v1181_v10 = vld [vmem:[%s1461_s7] ss:$0 sm:$0xff] }
 0x2a1   : > { %635 = vmatpush.bf16.msrb.mxu2 %v626_v11 }
 0x2a5   : > { %751 = vmatpush.bf16.msra.mxu2 %v742_v12  ;;  %v616_v13 = vpop.xlane.xlu0 %615 }
 0x2a6   : > { %1196 = vrcp.f32 %v616_v13 }
 0x2ac   : > { %v1197_v14 = vpop.eup %1196 }
 0x2ad   : > { %v618_v7 = vmul.f32 %v1197_v14, %v1191_v62  ;;  %v732_v15 = vpop.xlane.xlu0 %731 }
 0x2ae   : > { %1198 = vrcp.f32 %v732_v15 }
 0x2af   : > { %v619_v16 = vpack.c.bf16 %v618_v7, %v618_v7  ;;  %1200 = vrcp.f32 %v674_v8  ;;  %v1180_v8 = vld [vmem:[%s1460_s6] ss:$0 sm:$0xff] }
 0x2b0   : > { %1202 = vrcp.f32 %v1233_v48  ;;  %v1182_v7 = vld [vmem:[%s1463_s9] ss:$0 sm:$0xff] }
 0x2b1   : > { %1101 = vmatmul.msk.bf16.vlgmr.msrb.gmra.mxu2 %vm524_vm1, %v619_v16 }
 0x2b4   : > { %v1199_v17 = vpop.eup %1198 }
 0x2b5   : > { %v734_v18 = vmul.f32 %v1199_v17, %v1193_v0  ;;  %v1201_v19 = vpop.eup %1200 }
 0x2b6   : > { %v676_v20 = vmul.f32 %v1201_v19, %v1189_v58  ;;  %v1203_v49 = vpop.eup %1202 }
 0x2b7   : > { %v735_v21 = vpack.c.bf16 %v734_v18, %v734_v18  ;;  %v818_v50 = vmul.f32 32.0, %v1203_v49  ;;  %vm822_vm6 = vweird.f32 %v1203_v49 }
 0x2b8   : > { %v677_v24 = vpack.c.bf16 %v676_v20, %v676_v20 }
 0x2b9   : > { %v819_v51 = vsub.f32 1.0, %v818_v50 }
 0x2bb   : > { %v820_v52 = vmul.f32 %v1203_v49, %v819_v51 }
 0x2bd   : > { %v821_v53 = vadd.f32 %v1203_v49, %v820_v52 }
 0x2bf   : > { %v1394_v54 = vsel %vm822_vm6, %v1203_v49, %v821_v53 }
 0x2c0   : > { %v679_v22 = vpop.permute.xlu0 %678 }
 0x2c1   : > { %1105 = vmatmul.msk.bf16.vlgmr.msra.gmra.mxu2 %vm524_vm1, %v735_v21  ;;  %v684_v23 = vsel %vm566_vm3, %v679_v22, 0  ;;  %v1153_v21 = vld [vmem:[%s1464_s10 + $0x18] sm:$0xff] }
 0x2c2   : > { %693 = vmatpush.bf16.msrb.mxu1 %v684_v23  ;;  %977 = vmatpush.bf16.msra.mxu3 %v1153_v21 }
 0x2c5   : > { %1103 = vmatmul.msk.bf16.vlgmr.msrb.gmra.mxu1 %vm524_vm1, %v677_v24 }
 0x2c6   : > { %881 = vmatpush.bf16.msra.mxu1 %v1149_v59 }
 0x2ca   : > { %882 = vmatpush.bf16.msra.mxu1 %v1148_v60 }
 0x316   : > { %v579_v25 = vpop.f32.mrf.mxu2 }
 0x31e   : > { %v581_v26 = vpop.f32.mrf.mxu2 }
 0x31f   : > { %v1152_v26 = vld [vmem:[%s1464_s10 + $0x10] sm:$0xff] }
 0x320   : > { %978 = vmatpush.bf16.msra.mxu3 %v1152_v26 }
 0x334   : > { %v637_v27 = vpop.f32.mrf.mxu2 }
 0x335   : > { %758 = vrot.lane.b32.xlu1 %v637_v27, %s1230_s26 }
 0x33c   : > { %v639_v28 = vpop.f32.mrf.mxu2 }
 0x342   : > { %v695_v29 = vpop.f32.mrf.mxu1 }
 0x343   : > { %762 = vrot.lane.b32.xlu2 %v695_v29, %s1231_s27 }
 0x344   : > { %v753_v30 = vpop.f32.mrf.mxu2 }
 0x345   : > { %766 = vrot.lane.b32.xlu1 %v753_v30, %s1232_s28 }
 0x34a   : > { %v697_v31 = vpop.f32.mrf.mxu1 }
 0x34b   : > { %v1151_v31 = vld [vmem:[%s1464_s10 + $0x8] sm:$0xff] }
 0x34c   : > { %v755_v32 = vpop.f32.mrf.mxu2  ;;  %979 = vmatpush.bf16.msra.mxu3 %v1151_v31 }
 0x39d   : > { %v763_v37 = vpop.permute.xlu2 %762 }
 0x3a7   : > { %v759_v35 = vpop.permute.xlu1 %758 }
 0x3a8   : > { %v769_v36 = vsel %vm524_vm1, %v579_v25, %v759_v35  ;;  %v1150_v35 = vld [vmem:[%s1464_s10] sm:$0xff] }
 0x3a9   : > { %v771_v39 = vsel %vm770_vm4, %v769_v36, %v763_v37  ;;  %980 = vmatpush.bf16.msra.mxu3 %v1150_v35 }
 0x3b7   : > { %v767_v38 = vpop.permute.xlu1 %766 }
 0x3b8   : > { %v773_v40 = vsel %vm772_vm5, %v771_v39, %v767_v38 }
 0x3b9   : > { %v774_v41 = vpack.c.bf16 %v773_v40, %v773_v40 }
 0x3bb   : > { %1114 = vmatmul.msk.bf16.vlgmr.msra.gmra.mxu0 %vm503_vm0, %v774_v41 }
 0x438   : > { %v807_v43 = vpop.f32.mrf.mxu0 }
 0x439   : > { %v808_v44 = vadd.f32 %v1179_v42, %v807_v43 }
 0x43b   : > { %v811_v45 = vadd.f32 %v808_v44, %v1331_v2 }
 0x43d   : > { %v814_v46 = vsel %vm503_vm0, %v811_v45, 0.0 }
 0x43e   : > { %815 = vadd.xlane.f32.xlu2 %v814_v46 }
 0x440   : > { %v809_v47 = vpop.f32.mrf.mxu0 }
 0x4b1   : > { %v816_v55 = vpop.xlane.xlu2 %815 }
 0x4b2   : > { %v824_v56 = vmul.f32 %v1394_v54, %v816_v55 }
 0x4b4   : > { %v825_v57 = vsub.f32 %v811_v45, %v824_v56 }
 0x4b6   : > { %v826_v58 = vmul.f32 %v825_v57, %v825_v57 }
 0x4b8   : > { %v827_v2 = vsel %vm503_vm0, %v826_v58, 0.0 }
 0x4b9   : > { %828 = vadd.xlane.f32.xlu1 %v827_v2 }
 0x52c   : > { %v829_v61 = vpop.xlane.xlu1 %828 }
 0x52d   : > { %v830_v62 = vmul.f32 %v829_v61, %v1394_v54 }
 0x52f   : > { %v831_v63 = vadd.f32 1e-05, %v830_v62  ;;  %v1183_v62 = vld [vmem:[%s1465_s11] ss:$0 sm:$0xff] }
 0x531   : > { %1204 = vrsqrt.f32 %v831_v63  ;;  %vm838_vm8 = vweird.f32 %v831_v63 }
 0x537   : > { %v1205_v0 = vpop.eup %1204 }
 0x538   : > { %v833_v1 = vmul.f32 %v1205_v0, %v831_v63  ;;  %vm839_vm7 = vweird.f32 %v1205_v0 }
 0x539   : > { %vm840_vm9 = vmor %vm838_vm8, %vm839_vm7 }
 0x53a   : > { %v834_v3 = vmul.f32 %v1205_v0, %v833_v1 }
 0x53c   : > { %v835_v4 = vmul.f32 0.5, %v834_v3 }
 0x53e   : > { %v836_v5 = vsub.f32 1.5, %v835_v4 }
 0x540   : > { %v837_v6 = vmul.f32 %v1205_v0, %v836_v5 }
 0x542   : > { %v841_v9 = vsel %vm840_vm9, %v1205_v0, %v837_v6 }
 0x543   : > { %v842_v11 = vmul.f32 %v841_v9, %v825_v57 }
 0x545   : > { %v846_v12 = vmul.f32 %v1180_v8, %v842_v11 }
 0x547   : > { %v1411_v13 = vadd.f32 %v1181_v10, %v846_v12 }
 0x549   : > { %v851_v14 = vpack.c.bf16 %v1411_v13, %v1411_v13 }
 0x54b   : > { %1123 = vmatmul.msk.bf16.vlgmr.msra.gmra.mxu1 %vm503_vm0, %v851_v14 }
 0x5c8   : > { %v884_v15 = vpop.f32.mrf.mxu1 }
 0x5c9   : > { %v885_v16 = vadd.f32 %v1182_v7, %v884_v15 }
 0x5cb   : > { %v889_v17 = vmul.f32 0.70710677, %v885_v16  ;;  %v888_v2 = vmul.f32 0.5, %v885_v16 }
 0x5cd   : > { %v890_v18 = vmul.f32 %v889_v17, %v889_v17 }
 0x5cf   : > { %v891_v19 = vmin.f32 %v890_v18, 16.0 }
 0x5d0   : > { %v886_v20 = vpop.f32.mrf.mxu1 }
 0x5d1   : > { %v892_v22 = vmul.f32 2.1237322e-06, %v891_v19  ;;  %v903_v23 = vmul.f32 3.8918573e-05, %v891_v19 }
 0x5d3   : > { %v893_v24 = vadd.f32 0.00028619796, %v892_v22  ;;  %v904_v25 = vadd.f32 0.001143296, %v903_v23 }
 0x5d5   : > { %v894_v27 = vmul.f32 %v893_v24, %v891_v19  ;;  %v905_v28 = vmul.f32 %v904_v25, %v891_v19 }
 0x5d7   : > { %v906_v29 = vadd.f32 0.014752088, %v905_v28  ;;  %v895_v30 = vadd.f32 0.0036580483, %v894_v27 }
 0x5d9   : > { %v907_v32 = vmul.f32 %v906_v29, %v891_v19  ;;  %v896_v34 = vmul.f32 %v895_v30, %v891_v19 }
 0x5db   : > { %v908_v33 = vadd.f32 0.112945676, %v907_v32  ;;  %v897_v38 = vadd.f32 0.05243302, %v896_v34 }
 0x5dd   : > { %v909_v36 = vmul.f32 %v908_v33, %v891_v19  ;;  %v898_v41 = vmul.f32 %v897_v38, %v891_v19 }
 0x5df   : > { %v910_v37 = vadd.f32 0.4994258, %v909_v36  ;;  %v899_v42 = vadd.f32 0.18741608, %v898_v41 }
 0x5e1   : > { %v911_v39 = vmul.f32 %v910_v37, %v891_v19  ;;  %v900_v44 = vmul.f32 %v899_v42, %v891_v19  ;;  %v1184_v19 = vld [vmem:[%s1466_s12] ss:$0 sm:$0xff] }
 0x5e3   : > { %v912_v40 = vadd.f32 1.0, %v911_v39  ;;  %v901_v48 = vadd.f32 1.1283791, %v900_v44 }
 0x5e5   : > { %1206 = vrcp.f32 %v912_v40  ;;  %v924_v47 = vand.u32 2147483648, %v912_v40  ;;  %v922_v50 = vand.u32 2147483647, %v912_v40  ;;  %vm918_vm11 = vweird.f32 %v912_v40 }
 0x5e6   : > { %v902_v53 = vmul.f32 %v901_v48, %v889_v17 }
 0x5e7   : > { %v925_v52 = vor.u32 1.1754944e-38, %v924_v47  ;;  %vm923_vm13 = vcmp.eq.f32.partialorder %v922_v50, 8.507059e+37 }
 0x5eb   : > { %v1207_v43 = vpop.eup %1206 }
 0x5ec   : > { %v914_v45 = vmul.f32 %v1207_v43, %v912_v40  ;;  %vm919_vm10 = vweird.f32 %v1207_v43 }
 0x5ed   : > { %vm920_vm12 = vmor %vm918_vm11, %vm919_vm10 }
 0x5ee   : > { %v915_v46 = vsub.f32 1.0, %v914_v45 }
 0x5f0   : > { %v916_v49 = vmul.f32 %v1207_v43, %v915_v46 }
 0x5f2   : > { %v917_v51 = vadd.f32 %v1207_v43, %v916_v49 }
 0x5f4   : > { %v921_v55 = vsel %vm920_vm12, %v1207_v43, %v917_v51 }
 0x5f5   : > { %v926_v56 = vsel %vm923_vm13, %v925_v52, %v921_v55 }
 0x5f6   : > { %v927_v57 = vmul.f32 %v926_v56, %v902_v53 }
 0x5f8   : > { %v1124_v58 = vclamps-f32 %v927_v57, 1.0 }
 0x5fa   : > { %v930_v59 = vadd.f32 1.0, %v1124_v58 }
 0x5fc   : > { %v931_v60 = vmul.f32 %v930_v59, %v888_v2 }
 0x5fe   : > { %v932_v61 = vpack.c.bf16 %v931_v60, %v931_v60 }
 0x600   : > { %1141 = vmatmul.msk.bf16.vlgmr.msra.gmra.mxu3 %vm969_vm14, %v932_v61 }
 0x683   : > { %v982_v63 = vpop.f32.mrf.mxu3 }
 0x684   : > { %v983_v0 = vadd.f32 %v1183_v62, %v982_v63 }
 0x686   : > { %v986_v1 = vadd.f32 %v983_v0, %v1411_v13 }
 0x688   : > { %v989_v3 = vsel %vm503_vm0, %v986_v1, 0.0 }
 0x689   : > { %990 = vadd.xlane.f32.xlu0 %v989_v3 }
 0x68b   : > { %v984_v4 = vpop.f32.mrf.mxu3 }
 0x6fc   : > { %v991_v5 = vpop.xlane.xlu0 %990 }
 0x6fd   : > { %v992_v6 = vmul.f32 %v991_v5, %v1394_v54 }
 0x6ff   : > { %v993_v8 = vsub.f32 %v986_v1, %v992_v6 }
 0x701   : > { %v994_v9 = vmul.f32 %v993_v8, %v993_v8 }
 0x703   : > { %v995_v10 = vsel %vm503_vm0, %v994_v9, 0.0 }
 0x704   : > { %996 = vadd.xlane.f32.xlu2 %v995_v10 }
 0x777   : > { %v997_v11 = vpop.xlane.xlu2 %996 }
 0x778   : > { %v998_v12 = vmul.f32 %v997_v11, %v1394_v54  ;;  %v1185_v54 = vld [vmem:[%s1467_s13] ss:$0 sm:$0xff] }
 0x77a   : > { %v999_v14 = vadd.f32 1e-05, %v998_v12 }
 0x77c   : > { %1208 = vrsqrt.f32 %v999_v14  ;;  %vm1006_vm1 = vweird.f32 %v999_v14 }
 0x782   : > { %v1209_v7 = vpop.eup %1208 }
 0x783   : > { %v1001_v13 = vmul.f32 %v1209_v7, %v999_v14  ;;  %vm1007_vm15 = vweird.f32 %v1209_v7 }
 0x784   : > { %vm1008_vm2 = vmor %vm1006_vm1, %vm1007_vm15 }
 0x785   : > { %v1002_v15 = vmul.f32 %v1209_v7, %v1001_v13 }
 0x787   : > { %v1003_v16 = vmul.f32 0.5, %v1002_v15 }
 0x789   : > { %v1004_v17 = vsub.f32 1.5, %v1003_v16 }
 0x78b   : > { %v1005_v18 = vmul.f32 %v1209_v7, %v1004_v17 }
 0x78d   : > { %v1009_v20 = vsel %vm1008_vm2, %v1209_v7, %v1005_v18 }
 0x78e   : > { %v1010_v21 = vmul.f32 %v1009_v20, %v993_v8 }
 0x790   : > { %v1014_v22 = vmul.f32 %v1184_v19, %v1010_v21 }
 0x792   : > { %v1018_v23 = vadd.f32 %v1185_v54, %v1014_v22 }
 0x794   : > { %1019 = vst.msk [vmem:[%s476_s22] sm:$0xff] %vm503_vm0, %v1018_v23 }
 0x795 PF: > { %s24_s29 = sadd.s32 1, %s1216_s29  }
 0x796   : > { %p21_p4 = scmp.ge.s32.totalorder %s24_s29, 4  }
 0x798   :  { %23 = sbr.rel (!%p21_p4) target bundleno = 1 (0x1), region = 109 }

// kernel: run.13
= control target key start
LH: loop header
LB: loop body
LE: loop exit
PB: predicated region body
PF: predicated region fallthrough
CT: control target
= control target key end

     0   :  { %v26_v0 = vlaneseq  ;;  %vm81_vm0 = vcmask 123904   ;;  %vm55_vm1 = vcmask 261120   ;;  %vm130_vm10 = vcmask 1041409   ;;  %s275_s1 = inlined_call_operand.vmem [shape: f32[2,1,16], index: 1, kind: input, shape index: {}]   ;;  %s276_s2 = inlined_call_operand.vmem [shape: f32[32,1], index: 2, kind: input, shape index: {}]   ;;  %s277_s3 = inlined_call_operand.<no memory space> [shape: f32[1,1], index: 3, kind: input, shape index: {}]   ;;  %s278_s0 = inlined_call_operand.vmem [shape: f32[2,16,32], index: 0, kind: input, shape index: {}]   ;;  %s279_s4 = inlined_call_operand.vmem [shape: f32[2,1], index: 4, kind: output, shape index: {}]  }
   0x1   :  { %v23_v1 = vld [vmem:[%s275_s1] sm:$0x1]  ;;  %v24_v2 = vld [vmem:[%s275_s1 + $0x1] sm:$0x1]  ;;  %v122_v10 = vld [vmem:[%s276_s2 + $0x18] sm:$0xff]  ;;  %v9_v16 = vstv %s277_s3  ;;  %vm173_vm14 = vcmask 1024  }
   0x2   :  { %v27_v3 = vshrl.u32 %v26_v0, 7  ;;  %76 = vst [vmem:[#allocation1] ss:$9 sm:$0xff] %v23_v1  ;;  %v38_v6 = vperm.slane %v24_v2, 0  ;;  %v25_v8 = vperm.slane %v23_v1, 0  ;;  %v121_v11 = vld [vmem:[%s276_s2 + $0x10] sm:$0xff]  ;;  %146 = vmatpush.msra.mxu0 %v122_v10 }
   0x3   :  { %78 = vst [vmem:[#allocation1 + $0x1] ss:$9 sm:$0xff] %v24_v2  ;;  %v120_v12 = vld [vmem:[%s276_s2 + $0x8] sm:$0xff]  ;;  %v119_v14 = vld [vmem:[%s276_s2] sm:$0xff]  ;;  %v22_v21 = vld [vmem:[%s278_s0 + $0x18] sm:$0xff] }
   0x4   :  { %v34_v4 = vadd.s32 8, %v27_v3  ;;  %180 = vset.pattern.permute.xlu0 %v27_v3  ;;  %147 = vmatpush.msra.mxu0 %v121_v11  ;;  %v20_v18 = vld [vmem:[%s278_s0 + $0x8] sm:$0xff]  ;;  %10 = vst [vmem:[#allocation2] sm:$0x1] %v9_v16  ;;  %v19_v22 = vld [vmem:[%s278_s0] sm:$0xff]  ;;  %v21_v25 = vld [vmem:[%s278_s0 + $0x10] sm:$0xff] }
   0x6   :  { %181 = vset.pattern.permute.xlu1 %v34_v4  ;;  %183 = vset.pattern.permute.xlu2 %v34_v4 }
   0x7   :  { %148 = vmatpush.msra.mxu0 %v120_v12 }
   0x9   :  { %149 = vmatpush.msra.mxu0 %v119_v14 }
   0xa   :  { %v79_v5 = vld [vmem:[#allocation1] sm:$0xff] }
   0xb   :  { %v82_v7 = vsel %vm81_vm0, %v79_v5, 0.0 }
   0xc   :  { %83 = vadd.xlane.f32.xlu0 %v82_v7 }
   0xe   :  { %49 = vperm.xlu1 %181, %v38_v6   ;;  %36 = vperm.xlu2 %183, %v25_v8  }
  0x16   :  { %182 = vset.pattern.permute.xlu1 %v27_v3 }
  0x1e   :  { %30 = vperm.xlu1 %182, %v25_v8  }
  0x20   :  { %43 = vperm.xlu0 %180, %v38_v6   ;;  %v185_v6 = vld [vmem:[#allocation2] ss:$0 sm:$0xff] }
  0x28   :  { %184 = vset.pattern.permute.xlu0 %v34_v4 }
  0x68   :  { %v37_v17 = vpop.permute.xlu2 %36 }
  0x69   :  { %v52_v20 = vmul.f32 %v37_v17, %v20_v18 }
  0x6b   :  { %v57_v28 = vsel %vm55_vm1, %v52_v20, 0.0 }
  0x7f   :  { %v225_v9 = vpop.xlane.xlu0 %83 }
  0x80   :  { %v237_v13 = vrot.slane %v225_v9, 1  ;;  %v50_v15 = vpop.permute.xlu1 %49  ;;  %v100_v55 = vand.u32 2147483648, %v225_v9  ;;  %vm94_vm6 = vweird.f32 %v225_v9  ;;  %v98_v57 = vand.u32 2147483647, %v225_v9 }
  0x81   :  { %v54_v27 = vmul.f32 %v50_v15, %v22_v21 }
  0x82   :  { %186 = vrcp.f32 %v237_v13  ;;  %vm109_vm3 = vweird.f32 %v237_v13  ;;  %v113_v50 = vand.u32 2147483647, %v237_v13  ;;  %v115_v51 = vand.u32 2147483648, %v237_v13 }
  0x83   :  { %188 = vrcp.f32 %v225_v9  ;;  %v66_v36 = vsel %vm55_vm1, %v54_v27, 0.0  ;;  %v101_v63 = vor.u32 1.1754944e-38, %v100_v55  ;;  %vm99_vm9 = vcmp.eq.f32.partialorder %v98_v57, 8.507059e+37 }
  0x84   :  { %v116_v59 = vor.u32 1.1754944e-38, %v115_v51  ;;  %vm114_vm8 = vcmp.eq.f32.partialorder %v113_v50, 8.507059e+37 }
  0x88   :  { %v187_v19 = vpop.eup %186 }
  0x89   :  { %v189_v23 = vpop.eup %188  ;;  %v105_v26 = vmul.f32 %v187_v19, %v237_v13  ;;  %vm110_vm2 = vweird.f32 %v187_v19 }
  0x8a   :  { %v90_v30 = vmul.f32 %v189_v23, %v225_v9  ;;  %vm95_vm4 = vweird.f32 %v189_v23  ;;  %vm111_vm5 = vmor %vm109_vm3, %vm110_vm2 }
  0x8b   :  { %v106_v35 = vsub.f32 1.0, %v105_v26  ;;  %vm96_vm7 = vmor %vm94_vm6, %vm95_vm4 }
  0x8c   :  { %v91_v38 = vsub.f32 1.0, %v90_v30 }
  0x8d   :  { %v107_v43 = vmul.f32 %v187_v19, %v106_v35 }
  0x8e   :  { %v92_v44 = vmul.f32 %v189_v23, %v91_v38 }
  0x8f   :  { %v108_v49 = vadd.f32 %v187_v19, %v107_v43 }
  0x90   :  { %v31_v24 = vpop.permute.xlu1 %30  ;;  %v93_v54 = vadd.f32 %v189_v23, %v92_v44 }
  0x91   :  { %v51_v29 = vmul.f32 %v31_v24, %v19_v22  ;;  %v112_v58 = vsel %vm111_vm5, %v187_v19, %v108_v49 }
  0x92   :  { %v44_v31 = vpop.permute.xlu0 %43  ;;  %v97_v62 = vsel %vm96_vm7, %v189_v23, %v93_v54  ;;  %v117_v0 = vsel %vm114_vm8, %v116_v59, %v112_v58 }
  0x93   :  { %v56_v32 = vsel %vm55_vm1, %v51_v29, 0.0  ;;  %v53_v33 = vmul.f32 %v44_v31, %v21_v25  ;;  %v102_v2 = vsel %vm99_vm9, %v101_v63, %v97_v62 }
  0x94   :  { %v58_v34 = vadd.f32 %v57_v28, %v56_v32 }
  0x95   :  { %v65_v37 = vsel %vm55_vm1, %v53_v33, 0.0 }
  0x96   :  { %v59_v39 = vrot.slane %v58_v34, 4  ;;  %v67_v40 = vadd.f32 %v66_v36, %v65_v37 }
  0x98   :  { %v60_v41 = vadd.f32 %v59_v39, %v58_v34  ;;  %v68_v42 = vrot.slane %v67_v40, 4 }
  0x9a   :  { %v61_v45 = vrot.slane %v60_v41, 2  ;;  %v69_v46 = vadd.f32 %v68_v42, %v67_v40 }
  0x9c   :  { %v62_v47 = vadd.f32 %v61_v45, %v60_v41  ;;  %v70_v48 = vrot.slane %v69_v46, 2 }
  0x9e   :  { %v63_v52 = vrot.slane %v62_v47, 1  ;;  %v71_v53 = vadd.f32 %v70_v48, %v69_v46 }
  0xa0   :  { %v72_v56 = vrot.slane %v71_v53, 1  ;;  %v64_v60 = vadd.f32 %v63_v52, %v62_v47 }
  0xa2   :  { %v73_v61 = vadd.f32 %v72_v56, %v71_v53  ;;  %v103_v3 = vmul.f32 %v102_v2, %v64_v60 }
  0xa4   :  { %v118_v1 = vmul.f32 %v117_v0, %v73_v61 }
  0xa6   :  { %v129_v4 = vrot.slane %v118_v1, 7 }
  0xa8   :  { %v131_v5 = vsel %vm130_vm10, %v129_v4, %v103_v3 }
  0xa9   :  { %179 = vmatmul.msk.f32.vlgmr.msra.gmra.mxu0 %vm55_vm1, %v131_v5 }
 0x126   :  { %v151_v7 = vpop.f32.mrf.mxu0 }
 0x127   :  { %v152_v8 = vadd.f32 %v185_v6, %v151_v7 }
 0x129   :  { %v154_v9 = vsub.f32 0.0, %v152_v8 }
 0x12b   :  { %v155_v10 = vmul.f32 1.442695, %v154_v9 }
 0x12d   :  { %190 = vpow2.f32 %v155_v10 }
 0x133   :  { %v191_v11 = vpop.eup %190 }
 0x134   :  { %v157_v12 = vadd.f32 1.0, %v191_v11 }
 0x136   :  { %192 = vrcp.f32 %v157_v12  ;;  %v169_v16 = vand.u32 2147483648, %v157_v12  ;;  %v167_v18 = vand.u32 2147483647, %v157_v12  ;;  %vm163_vm12 = vweird.f32 %v157_v12 }
 0x138   :  { %v170_v20 = vor.u32 1.1754944e-38, %v169_v16  ;;  %vm168_vm15 = vcmp.eq.f32.partialorder %v167_v18, 8.507059e+37 }
 0x13c   :  { %v193_v13 = vpop.eup %192 }
 0x13d   :  { %v159_v14 = vmul.f32 %v193_v13, %v157_v12  ;;  %vm164_vm11 = vweird.f32 %v193_v13 }
 0x13e   :  { %vm165_vm13 = vmor %vm163_vm12, %vm164_vm11 }
 0x13f   :  { %v160_v15 = vsub.f32 1.0, %v159_v14 }
 0x141   :  { %v161_v17 = vmul.f32 %v193_v13, %v160_v15 }
 0x143   :  { %v162_v19 = vadd.f32 %v193_v13, %v161_v17 }
 0x145   :  { %v166_v21 = vsel %vm165_vm13, %v193_v13, %v162_v19 }
 0x146   :  { %v171_v22 = vsel %vm168_vm15, %v170_v20, %v166_v21 }
 0x147   :  { %174 = vst.msk [vmem:[%s279_s4] sm:$0x3] %vm173_vm14, %v171_v22 }

// kernel: run.11
= control target key start
LH: loop header
LB: loop body
LE: loop exit
PB: predicated region body
PF: predicated region fallthrough
CT: control target
= control target key end

     0   :  { %s3876_s29 = smov 0   ;;  %s4679_s0 = inlined_call_operand.vmem [shape: f32[2,16,32], index: 0, kind: input, shape index: {}]   ;;  %s4680_s1 = inlined_call_operand.vmem [shape: f32[2,1,16], index: 1, kind: input, shape index: {}]   ;;  %s4681_s2 = inlined_call_operand.vmem [shape: bf16[32,96], index: 2, kind: input, shape index: {}]   ;;  %s4682_s3 = inlined_call_operand.vmem [shape: f32[1,96], index: 3, kind: input, shape index: {}]   ;;  %s4683_s4 = inlined_call_operand.vmem [shape: bf16[32,32], index: 4, kind: input, shape index: {}]   ;;  %s4684_s5 = inlined_call_operand.vmem [shape: f32[1,32], index: 5, kind: input, shape index: {}]   ;;  %s4685_s6 = inlined_call_operand.vmem [shape: f32[1,32], index: 6, kind: input, shape index: {}]   ;;  %s4686_s7 = inlined_call_operand.vmem [shape: f32[1,32], index: 7, kind: input, shape index: {}]   ;;  %s4687_s8 = inlined_call_operand.vmem [shape: bf16[32,2048], index: 8, kind: input, shape index: {}]   ;;  %s4688_s9 = inlined_call_operand.vmem [shape: f32[1,2048], index: 9, kind: input, shape index: {}]   ;;  %s4689_s10 = inlined_call_operand.vmem [shape: bf16[2048,32], index: 10, kind: input, shape index: {}]   ;;  %s4690_s11 = inlined_call_operand.vmem [shape: f32[1,32], index: 11, kind: input, shape index: {}]   ;;  %s4691_s12 = inlined_call_operand.vmem [shape: f32[1,32], index: 12, kind: input, shape index: {}]   ;;  %s4692_s13 = inlined_call_operand.vmem [shape: f32[1,32], index: 13, kind: input, shape index: {}]   ;;  %s4693_s14 = inlined_call_operand.vmem [shape: f32[2,16,32], index: 14, kind: output, shape index: {}]  }
   0x1 LB: > { %s2830_s30 = sadd.s32 4294967295, %s3783_s29   ;;  %p2834_p0 = scmp.ge.s32.totalorder %s3783_s29, 1  ;;  %s3783_s29 = sphi %s3876_s29, %s24_s29  }
   0x2   : > { %p420_p1 = scmp.lt.s32.totalorder %s3783_s29, 3 }
   0x4   : > { %p421_p2 = pnand %p2834_p0, %p420_p1 }
   0x5   : > { %p469_p3 = scmp.lt.s32.totalorder (!%p421_p2), %s2830_s30, 1  ;;  %s3785_s25 = smov (!%p421_p2), 104  }
   0x6   : > { %424 = sbr.rel (%p421_p2) target bundleno = 2005 (0x7d5), region = 76  ;;  %s3786_s26 = smov (!%p421_p2), 120  }
   0x7   : > { %s3787_s27 = smov (!%p421_p2), 96   ;;  %s3788_s28 = smov (!%p421_p2), 80  }
   0x8   : > { %s3789_s15 = smov (!%p421_p2), 72   ;;  %s3790_s16 = smov (!%p421_p2), 88  }
   0x9   : > { %s3791_s17 = smov (!%p421_p2), 112   ;;  %s3794_s23 = smov (!%p421_p2), 56  }
   0xa   : > { %s3795_s24 = smov (!%p421_p2), 40  }
   0xb   : > { %v3526_v0 = vld [vmem:[%s4681_s2 + $0x8] sm:$0xff]  ;;  %v3525_v1 = vld [vmem:[%s4681_s2] sm:$0xff]  ;;  %s4695_s30 = smov (!%p469_p3, %s2830_s30), 1  ;;  %vm509_vm0 = vcmask 261120   ;;  %vm531_vm1 = vcmask 64512   ;;  %vm559_vm3 = vcmask 130048  }
   0xc   : > { %519 = vmatpush.bf16.msra.mxu0 %v3526_v0  ;;  %s3523_s19 = sshll.u32 %s4695_s30, 4  ;;  %v3728_v6 = vld [vmem:[%s4682_s3] ss:$0 sm:$0xff]  ;;  %s476_s21 = scalar_lea.vmem %s4680_s1, %s4695_s30  ;;  %v3792_v23 = vmov -1e+09   ;;  %vm844_vm4 = vcmask 195584  }
   0xd   : > { %s473_s22 = scalar_lea.vmem %s4679_s0, %s3523_s19  ;;  %v485_v22 = vld [vmem:[%s476_s21] sm:$0x1]  ;;  %s481_s18 = scalar_lea.vmem %s4693_s14, %s3523_s19 }
   0xe   : > { %v3898_v2 = vld [vmem:[%s473_s22] sm:$0xff]  ;;  %v3900_v3 = vld [vmem:[%s473_s22 + $0x8] sm:$0xff]  ;;  %vm486_vm2 = vcmp.gt.f32.partialorder %v485_v22, 0.0  ;;  %s3793_s22 = smov 64  }
   0xf   : > { %v488_v4 = vpack.c.bf16 %v3900_v3, %v3898_v2  ;;  %v487_v24 = vsel %vm486_vm2, 0.0, %v3792_v23 }
  0x10   : > { %520 = vmatpush.bf16.msra.mxu0 %v3525_v1  ;;  %v555_v25 = vperm.slane %v487_v24, 0 }
  0x13   : > { %2847 = vmatmul.msk.bf16.vlgmr.msra.gmra.mxu0 %vm509_vm0, %v488_v4 }
  0x90   : > { %v522_v5 = vpop.f32.mrf.mxu0 }
  0x91   : > { %v523_v8 = vadd.f32 %v3728_v6, %v522_v5 }
  0x98   : > { %v524_v7 = vpop.f32.mrf.mxu0 }
  0x99   : > { %v525_v9 = vadd.f32 %v3728_v6, %v524_v7 }
  0x9b   : > { %v3908_v10 = vpack.c.bf16 %v525_v9, %v523_v8 }
  0x9d   : > { %745 = vrot.lane.b32.xlu2 %v3908_v10, %s3785_s25  ;;  %603 = vrot.lane.b32.xlu1 %v3908_v10, %s3786_s26  ;;  %s3796_s25 = smov 48   ;;  %s3797_s26 = smov 8  }
  0x9e   : > { %529 = vrot.lane.b32.xlu0 %v3908_v10, %s3787_s27  ;;  %s3798_s27 = smov 24  }
  0xa5   : > { %676 = vrot.lane.b32.xlu2 %v3908_v10, %s3788_s28  ;;  %747 = vrot.lane.b32.xlu1 %v3908_v10, %s3789_s15  ;;  %s3799_s28 = smov 16  }
  0xa6   : > { %605 = vrot.lane.b32.xlu0 %v3908_v10, %s3790_s16 }
  0xae   : > { %674 = vrot.lane.b32.xlu0 %v3908_v10, %s3791_s17 }
  0xf7   : > { %v746_v11 = vpop.permute.xlu2 %745 }
  0xff   : > { %v677_v12 = vpop.permute.xlu2 %676 }
 0x100   : > { %v682_v13 = vsel %vm531_vm1, %v677_v12, 0 }
 0x101   : > { %691 = vmatpush.bf16.xpose.msrb.mxu0 %v682_v13 }
 0x10f   : > { %v604_v14 = vpop.permute.xlu1 %603 }
 0x110   : > { %v530_v15 = vpop.permute.xlu0 %529 }
 0x111   : > { %v536_v16 = vsel %vm531_vm1, %v530_v15, 0 }
 0x112   : > { %545 = vmatpush.bf16.xpose.msra.mxu1 %v536_v16 }
 0x117   : > { %v748_v17 = vpop.permute.xlu1 %747 }
 0x118   : > { %v606_v18 = vpop.permute.xlu0 %605  ;;  %v753_v19 = vsel %vm531_vm1, %v748_v17, 0 }
 0x119   : > { %2848 = vmatmul.msk.bf16.vlgmr.msra.gmra.mxu1 %vm531_vm1, %v3908_v10  ;;  %v611_v20 = vsel %vm531_vm1, %v606_v18, 0 }
 0x11a   : > { %620 = vmatpush.bf16.xpose.msra.mxu3 %v611_v20 }
 0x120   : > { %v675_v21 = vpop.permute.xlu0 %674 }
 0x121   : > { %2850 = vmatmul.msk.bf16.vlgmr.msra.gmra.mxu3 %vm531_vm1, %v604_v14  ;;  %2852 = vmatmul.msk.bf16.vlgmr.msrb.gmra.mxu0 %vm531_vm1, %v675_v21 }
 0x122   : > { %762 = vmatpush.bf16.xpose.msrb.mxu3 %v753_v19 }
 0x131   : > { %2854 = vmatmul.msk.bf16.vlgmr.msrb.gmra.mxu3 %vm531_vm1, %v746_v11 }
 0x196   : > { %v547_v26 = vpop.f32.mrf.mxu1 }
 0x197   : > { %v552_v27 = vmul.f32 0.35355338, %v547_v26 }
 0x199   : > { %v557_v28 = vadd.f32 %v555_v25, %v552_v27 }
 0x19b   : > { %v560_v29 = vsel %vm559_vm3, %v557_v28, -inf }
 0x19c   : > { %561 = vmax.xlane.f32.xlu1 %v560_v29 }
 0x19e   : > { %v549_v30 = vpop.f32.mrf.mxu1  ;;  %v693_v31 = vpop.f32.mrf.mxu0 }
 0x19f   : > { %v553_v32 = vmul.f32 0.35355338, %v549_v30  ;;  %v698_v33 = vmul.f32 0.35355338, %v693_v31 }
 0x1a1   : > { %v558_v34 = vadd.f32 %v555_v25, %v553_v32  ;;  %v700_v35 = vadd.f32 %v698_v33, %v555_v25 }
 0x1a3   : > { %v563_v36 = vsel %vm559_vm3, %v558_v34, -inf  ;;  %v702_v37 = vsel %vm559_vm3, %v700_v35, -inf }
 0x1a4   : > { %564 = vmax.xlane.f32.xlu2 %v563_v36  ;;  %v622_v38 = vpop.f32.mrf.mxu3  ;;  %703 = vmax.xlane.f32.xlu0 %v702_v37 }
 0x1a5   : > { %v627_v39 = vmul.f32 0.35355338, %v622_v38 }
 0x1a6   : > { %v695_v40 = vpop.f32.mrf.mxu0 }
 0x1a7   : > { %v699_v41 = vmul.f32 0.35355338, %v695_v40  ;;  %v629_v42 = vadd.f32 %v627_v39, %v555_v25 }
 0x1a9   : > { %v701_v43 = vadd.f32 %v699_v41, %v555_v25  ;;  %v631_v44 = vsel %vm559_vm3, %v629_v42, -inf }
 0x1ab   : > { %v705_v45 = vsel %vm559_vm3, %v701_v43, -inf }
 0x1ac   : > { %v624_v46 = vpop.f32.mrf.mxu3  ;;  %632 = vmax.xlane.f32.xlu0 %v631_v44  ;;  %706 = vmax.xlane.f32.xlu1 %v705_v45 }
 0x1ad   : > { %v628_v47 = vmul.f32 0.35355338, %v624_v46 }
 0x1af   : > { %v630_v48 = vadd.f32 %v628_v47, %v555_v25 }
 0x1b1   : > { %v634_v49 = vsel %vm559_vm3, %v630_v48, -inf }
 0x1b2   : > { %635 = vmax.xlane.f32.xlu2 %v634_v49 }
 0x1b4   : > { %v764_v50 = vpop.f32.mrf.mxu3 }
 0x1b5   : > { %v769_v51 = vmul.f32 0.35355338, %v764_v50 }
 0x1b7   : > { %v771_v52 = vadd.f32 %v769_v51, %v555_v25 }
 0x1b9   : > { %v773_v53 = vsel %vm559_vm3, %v771_v52, -inf }
 0x1ba   : > { %774 = vmax.xlane.f32.xlu1 %v773_v53 }
 0x1bc   : > { %v766_v54 = vpop.f32.mrf.mxu3 }
 0x1bd   : > { %v770_v55 = vmul.f32 0.35355338, %v766_v54 }
 0x1bf   : > { %v772_v56 = vadd.f32 %v770_v55, %v555_v25 }
 0x1c1   : > { %v776_v57 = vsel %vm559_vm3, %v772_v56, -inf }
 0x1c2   : > { %777 = vmax.xlane.f32.xlu2 %v776_v57 }
 0x1d3   : > { %583 = vrot.lane.b32.xlu1 %v3908_v10, %s3793_s22 }
 0x1da   : > { %654 = vrot.lane.b32.xlu2 %v3908_v10, %s3794_s23 }
 0x20f   : > { %v562_v58 = vpop.xlane.xlu1 %561 }
 0x210   : > { %v566_v59 = vsub.f32 %v557_v28, %v562_v58 }
 0x212   : > { %v568_v60 = vmul.f32 1.442695, %v566_v59 }
 0x214   : > { %3735 = vpow2.f32 %v568_v60 }
 0x217   : > { %v565_v61 = vpop.xlane.xlu2 %564  ;;  %v704_v62 = vpop.xlane.xlu0 %703 }
 0x218   : > { %v567_v63 = vsub.f32 %v558_v34, %v565_v61  ;;  %v708_v0 = vsub.f32 %v700_v35, %v704_v62 }
 0x21a   : > { %v3940_v1 = vpop.eup %3735  ;;  %v570_v4 = vmul.f32 1.442695, %v567_v63  ;;  %v710_v5 = vmul.f32 1.442695, %v708_v0 }
 0x21b   : > { %v572_v6 = vsel %vm559_vm3, %v3940_v1, 0.0 }
 0x21c   : > { %3737 = vpow2.f32 %v570_v4  ;;  %573 = vadd.xlane.f32.xlu2 %v572_v6 }
 0x21d   : > { %3739 = vpow2.f32 %v710_v5 }
 0x21f   : > { %v633_v7 = vpop.xlane.xlu0 %632  ;;  %v707_v8 = vpop.xlane.xlu1 %706 }
 0x220   : > { %v637_v9 = vsub.f32 %v629_v42, %v633_v7  ;;  %v709_v11 = vsub.f32 %v701_v43, %v707_v8 }
 0x222   : > { %v3738_v12 = vpop.eup %3737  ;;  %v639_v13 = vmul.f32 1.442695, %v637_v9  ;;  %v712_v14 = vmul.f32 1.442695, %v709_v11 }
 0x223   : > { %v3944_v15 = vpop.eup %3739  ;;  %v575_v16 = vsel %vm559_vm3, %v3738_v12, 0.0 }
 0x224   : > { %3741 = vpow2.f32 %v639_v13  ;;  %576 = vadd.xlane.f32.xlu0 %v575_v16  ;;  %v714_v17 = vsel %vm559_vm3, %v3944_v15, 0.0 }
 0x225   : > { %3743 = vpow2.f32 %v712_v14  ;;  %715 = vadd.xlane.f32.xlu1 %v714_v17  ;;  %v636_v18 = vpop.xlane.xlu2 %635 }
 0x226   : > { %v638_v19 = vsub.f32 %v630_v48, %v636_v18  ;;  %v3528_v18 = vld [vmem:[%s4683_s4 + $0x8] sm:$0xff] }
 0x227   : > { %877 = vmatpush.bf16.msra.mxu0 %v3528_v18  ;;  %v3538_v18 = vld [vmem:[%s4687_s8 + $0x44] sm:$0xf0] }
 0x228   : > { %v641_v20 = vmul.f32 1.442695, %v638_v19  ;;  %v3527_v19 = vld [vmem:[%s4683_s4] sm:$0xff] }
 0x22a   : > { %v3742_v21 = vpop.eup %3741  ;;  %3745 = vpow2.f32 %v641_v20 }
 0x22b   : > { %v3949_v22 = vpop.eup %3743  ;;  %v643_v23 = vsel %vm559_vm3, %v3742_v21, 0.0  ;;  %878 = vmatpush.bf16.msra.mxu0 %v3527_v19 }
 0x22c   : > { %644 = vadd.xlane.f32.xlu2 %v643_v23  ;;  %v717_v24 = vsel %vm559_vm3, %v3949_v22, 0.0 }
 0x22d   : > { %718 = vadd.xlane.f32.xlu0 %v717_v24  ;;  %v775_v25 = vpop.xlane.xlu1 %774 }
 0x22e   : > { %v779_v26 = vsub.f32 %v771_v52, %v775_v25 }
 0x230   : > { %v781_v27 = vmul.f32 1.442695, %v779_v26  ;;  %v3746_v28 = vpop.eup %3745 }
 0x231   : > { %v646_v29 = vsel %vm559_vm3, %v3746_v28, 0.0 }
 0x232   : > { %3747 = vpow2.f32 %v781_v27 }
 0x235   : > { %647 = vadd.xlane.f32.xlu0 %v646_v29  ;;  %v778_v30 = vpop.xlane.xlu2 %777 }
 0x236   : > { %v780_v31 = vsub.f32 %v772_v56, %v778_v30 }
 0x238   : > { %v783_v32 = vmul.f32 1.442695, %v780_v31  ;;  %v3748_v33 = vpop.eup %3747 }
 0x239   : > { %v785_v34 = vsel %vm559_vm3, %v3748_v33, 0.0 }
 0x23a   : > { %3749 = vpow2.f32 %v783_v32 }
 0x23d   : > { %786 = vadd.xlane.f32.xlu0 %v785_v34  ;;  %v655_v38 = vpop.permute.xlu2 %654 }
 0x240   : > { %v3750_v35 = vpop.eup %3749 }
 0x241   : > { %v788_v36 = vsel %vm559_vm3, %v3750_v35, 0.0 }
 0x244   : > { %796 = vrot.lane.b32.xlu2 %v3908_v10, %s3795_s24 }
 0x245   : > { %789 = vadd.xlane.f32.xlu0 %v788_v36  ;;  %v584_v37 = vpop.permute.xlu1 %583  ;;  %v3729_v36 = vld [vmem:[%s4684_s5] ss:$0 sm:$0xff] }
 0x246   : > { %596 = vmatpush.bf16.msra.mxu2 %v584_v37 }
 0x24a   : > { %667 = vmatpush.bf16.msrb.mxu2 %v655_v38 }
 0x259   : > { %725 = vrot.lane.b32.xlu0 %v3908_v10, %s3796_s25 }
 0x28f   : > { %v574_v39 = vpop.xlane.xlu2 %573 }
 0x290   : > { %3751 = vrcp.f32 %v574_v39 }
 0x296   : > { %v3752_v41 = vpop.eup %3751 }
 0x297   : > { %v577_v40 = vpop.xlane.xlu0 %576  ;;  %v580_v44 = vmul.f32 %v3752_v41, %v3940_v1 }
 0x298   : > { %3753 = vrcp.f32 %v577_v40  ;;  %v716_v58 = vpop.xlane.xlu1 %715 }
 0x29e   : > { %v3754_v42 = vpop.eup %3753 }
 0x29f   : > { %v645_v43 = vpop.xlane.xlu2 %644  ;;  %v581_v45 = vmul.f32 %v3754_v42, %v3738_v12 }
 0x2a0   : > { %v719_v46 = vpop.xlane.xlu0 %718  ;;  %3755 = vrcp.f32 %v645_v43 }
 0x2a1   : > { %v582_v47 = vpack.c.bf16 %v581_v45, %v580_v44  ;;  %v3800_v45 = vmov 32.0  }
 0x2a3   : > { %2849 = vmatmul.msk.bf16.vlgmr.msra.gmra.mxu2 %vm559_vm3, %v582_v47 }
 0x2a6   : > { %v3756_v10 = vpop.eup %3755 }
 0x2a7   : > { %v797_v48 = vpop.permute.xlu2 %796  ;;  %v651_v51 = vmul.f32 %v3756_v10, %v3742_v21 }
 0x2a8   : > { %v648_v49 = vpop.xlane.xlu0 %647  ;;  %809 = vmatpush.bf16.msra.mxu2 %v797_v48 }
 0x2a9   : > { %3757 = vrcp.f32 %v648_v49 }
 0x2af   : > { %v3758_v50 = vpop.eup %3757 }
 0x2b0   : > { %v652_v52 = vmul.f32 %v3758_v50, %v3746_v28  ;;  %v787_v53 = vpop.xlane.xlu0 %786 }
 0x2b1   : > { %3759 = vrcp.f32 %v787_v53 }
 0x2b2   : > { %v653_v54 = vpack.c.bf16 %v652_v52, %v651_v51 }
 0x2b4   : > { %2851 = vmatmul.msk.bf16.vlgmr.msrb.gmra.mxu2 %vm559_vm3, %v653_v54 }
 0x2b7   : > { %v3760_v56 = vpop.eup %3759 }
 0x2b8   : > { %v790_v55 = vpop.xlane.xlu0 %789  ;;  %v793_v59 = vmul.f32 %v3760_v56, %v3748_v33 }
 0x2b9   : > { %3761 = vrcp.f32 %v790_v55 }
 0x2ba   : > { %3763 = vrcp.f32 %v719_v46 }
 0x2bb   : > { %3765 = vrcp.f32 %v716_v58 }
 0x2bc   : > { %3767 = vrcp.f32 %v3800_v45 }
 0x2bf   : > { %v3762_v57 = vpop.eup %3761 }
 0x2c0   : > { %v794_v60 = vmul.f32 %v3762_v57, %v3750_v35  ;;  %v3764_v62 = vpop.eup %3763 }
 0x2c1   : > { %v3766_v63 = vpop.eup %3765  ;;  %v723_v0 = vmul.f32 %v3764_v62, %v3949_v22 }
 0x2c2   : > { %v795_v61 = vpack.c.bf16 %v794_v60, %v793_v59  ;;  %v722_v1 = vmul.f32 %v3766_v63, %v3944_v15  ;;  %v3768_v46 = vpop.eup %3767  ;;  %v2931_v59 = vld [vmem:[%s4687_s8 + $0x80] sm:$0xf]  ;;  %v2933_v63 = vld [vmem:[%s4687_s8 + $0xc0] sm:$0xf0] }
 0x2c3   : > { %v896_v47 = vmul.f32 32.0, %v3768_v46  ;;  %vm900_vm5 = vweird.f32 %v3768_v46  ;;  %v3553_v60 = vld [vmem:[%s4687_s8 + $0xbc] sm:$0xf0] }
 0x2c4   : > { %2855 = vmatmul.msk.bf16.vlgmr.msra.gmra.mxu2 %vm559_vm3, %v795_v61  ;;  %v724_v5 = vpack.c.bf16 %v723_v0, %v722_v1  ;;  %v3545_v61 = vld [vmem:[%s4687_s8 + $0x84] sm:$0xf]  ;;  %v2932_v62 = vor.u32 %v3553_v60, %v2931_v59  ;;  %v2939_v0 = vld [vmem:[%s4687_s8 + $0x88] sm:$0xf] }
 0x2c5   : > { %v897_v48 = vsub.f32 1.0, %v896_v47  ;;  %v3554_v1 = vld [vmem:[%s4687_s8 + $0xc4] sm:$0xf0]  ;;  %v2891_v47 = vld [vmem:[%s4687_s8 + $0x18] sm:$0xf] }
 0x2c7   : > { %v898_v49 = vmul.f32 %v3768_v46, %v897_v48  ;;  %v3540_v48 = vld [vmem:[%s4687_s8 + $0x54] sm:$0xf0] }
 0x2c9   : > { %v899_v10 = vadd.f32 %v3768_v46, %v898_v49 }
 0x2cb   : > { %v726_v4 = vpop.permute.xlu0 %725  ;;  %v3984_v50 = vsel %vm900_vm5, %v3768_v46, %v899_v10  ;;  %v2885_v46 = vld [vmem:[%s4687_s8 + $0x50] sm:$0xf0]  ;;  %v2892_v10 = vor.u32 %v3540_v48, %v2891_v47  ;;  %v3543_v47 = vld [vmem:[%s4687_s8 + $0x6c] sm:$0xf0] }
 0x2cc   : > { %738 = vmatpush.bf16.msrb.mxu1 %v726_v4  ;;  %v2936_v4 = vor.u32 %v3545_v61, %v2933_v63 }
 0x2ce   : > { %1202 = vmatpush.bf16.msra.mxu3 %v2936_v4 }
 0x2cf   : > { %2853 = vmatmul.msk.bf16.vlgmr.msrb.gmra.mxu1 %vm559_vm3, %v724_v5  ;;  %v2940_v5 = vor.u32 %v3554_v1, %v2939_v0  ;;  %v3730_v0 = vld [vmem:[%s4685_s6] ss:$0 sm:$0xff] }
 0x2d0   : > { %1188 = vmatpush.bf16.msra.mxu1 %v2932_v62 }
 0x2d1   : > { %1216 = vmatpush.bf16.msrb.mxu2 %v2940_v5 }
 0x326   : > { %v598_v6 = vpop.f32.mrf.mxu2 }
 0x32e   : > { %v600_v7 = vpop.f32.mrf.mxu2 }
 0x337   : > { %v669_v8 = vpop.f32.mrf.mxu2 }
 0x33f   : > { %v671_v9 = vpop.f32.mrf.mxu2 }
 0x340   : > { %v3713_v11 = vpack.i.bf16 %v671_v9, %v669_v8 }
 0x342   : > { %3714 = vrot.lane.b32.xlu2 %v3713_v11, %s3797_s26 }
 0x347   : > { %v811_v12 = vpop.f32.mrf.mxu2 }
 0x34c   : > { %v740_v13 = vpop.f32.mrf.mxu1 }
 0x34f   : > { %v813_v14 = vpop.f32.mrf.mxu2 }
 0x350   : > { %v3723_v16 = vpack.i.bf16 %v813_v14, %v811_v12  ;;  %v2867_v12 = vld [vmem:[%s4687_s8] sm:$0xf]  ;;  %v3529_v14 = vld [vmem:[%s4687_s8 + $0x4] sm:$0xf] }
 0x352   : > { %3724 = vrot.lane.b32.xlu0 %v3723_v16, %s3798_s27 }
 0x354   : > { %v742_v17 = vpop.f32.mrf.mxu1 }
 0x355   : > { %v3718_v15 = vpack.i.bf16 %v742_v17, %v740_v13  ;;  %v3537_v13 = vld [vmem:[%s4687_s8 + $0x3c] sm:$0xf0]  ;;  %v2869_v17 = vld [vmem:[%s4687_s8 + $0x40] sm:$0xf0] }
 0x356   : > { %v2868_v16 = vor.u32 %v3537_v13, %v2867_v12  ;;  %v3549_v12 = vld [vmem:[%s4687_s8 + $0xa4] sm:$0xf] }
 0x357   : > { %3719 = vrot.lane.b32.xlu2 %v3718_v15, %s3799_s28  ;;  %v2875_v15 = vld [vmem:[%s4687_s8 + $0x8] sm:$0xf]  ;;  %v2965_v13 = vld [vmem:[%s4687_s8 + $0xe0] sm:$0xf0] }
 0x358   : > { %1189 = vmatpush.bf16.msra.mxu1 %v2868_v16 }
 0x39c   : > { %v3715_v20 = vpop.permute.xlu2 %3714 }
 0x39d   : > { %v3717_v22 = vunpack.i.h.bf16 %v3715_v20  ;;  %v3716_v23 = vunpack.i.l.bf16 %v3715_v20  ;;  %v2872_v20 = vor.u32 %v3529_v14, %v2869_v17  ;;  %v3558_v17 = vld [vmem:[%s4687_s8 + $0xe4] sm:$0xf0] }
 0x39f   : > { %v841_v27 = vsel %vm531_vm1, %v600_v7, %v3717_v22  ;;  %v840_v28 = vsel %vm531_vm1, %v598_v6, %v3716_v23  ;;  %v3546_v6 = vld [vmem:[%s4687_s8 + $0x8c] sm:$0xf]  ;;  %1203 = vmatpush.bf16.msra.mxu3 %v2872_v20 }
 0x3a0   : > { %v2941_v7 = vld [vmem:[%s4687_s8 + $0xc8] sm:$0xf0] }
 0x3a1   : > { %v2944_v9 = vor.u32 %v3546_v6, %v2941_v7  ;;  %v3530_v22 = vld [vmem:[%s4687_s8 + $0xc] sm:$0xf]  ;;  %v3731_v6 = vld [vmem:[%s4686_s7] ss:$0 sm:$0xff] }
 0x3a2   : > { %v2877_v23 = vld [vmem:[%s4687_s8 + $0x48] sm:$0xf0] }
 0x3a3   : > { %1230 = vmatpush.bf16.msrb.mxu0 %v2944_v9 }
 0x3b1   : > { %v3720_v21 = vpop.permute.xlu2 %3719 }
 0x3b2   : > { %v3722_v24 = vunpack.i.h.bf16 %v3720_v21  ;;  %v3721_v25 = vunpack.i.l.bf16 %v3720_v21  ;;  %v2876_v21 = vor.u32 %v3538_v18, %v2875_v15  ;;  %v3550_v15 = vld [vmem:[%s4687_s8 + $0xac] sm:$0xf] }
 0x3b3   : > { %v2973_v18 = vld [vmem:[%s4687_s8 + $0xe8] sm:$0xf0] }
 0x3b4   : > { %v843_v31 = vsel %vm559_vm3, %v841_v27, %v3722_v24  ;;  %v842_v32 = vsel %vm559_vm3, %v840_v28, %v3721_v25  ;;  %v2880_v24 = vor.u32 %v3530_v22, %v2877_v23  ;;  %1217 = vmatpush.bf16.msrb.mxu2 %v2876_v21  ;;  %v3555_v27 = vld [vmem:[%s4687_s8 + $0xcc] sm:$0xf0]  ;;  %v3547_v28 = vld [vmem:[%s4687_s8 + $0x94] sm:$0xf]  ;;  %v2968_v21 = vor.u32 %v3549_v12, %v2965_v13  ;;  %v2899_v22 = vld [vmem:[%s4687_s8 + $0x20] sm:$0xf] }
 0x3b5   : > { %v3541_v23 = vld [vmem:[%s4687_s8 + $0x5c] sm:$0xf0] }
 0x3b6   : > { %1231 = vmatpush.bf16.msrb.mxu0 %v2880_v24  ;;  %v3573_v12 = vld [vmem:[%s4689_s10 + $0x60] sm:$0xff] }
 0x3b7   : > { %v3581_v13 = vld [vmem:[%s4689_s10 + $0xa0] sm:$0xff] }
 0x3c4   : > { %v3725_v26 = vpop.permute.xlu0 %3724 }
 0x3c5   : > { %v3727_v29 = vunpack.i.h.bf16 %v3725_v26  ;;  %v3726_v30 = vunpack.i.l.bf16 %v3725_v26  ;;  %v2947_v26 = vld [vmem:[%s4687_s8 + $0x90] sm:$0xf] }
 0x3c7   : > { %v845_v33 = vsel %vm844_vm4, %v842_v32, %v3726_v30  ;;  %v846_v34 = vsel %vm844_vm4, %v843_v31, %v3727_v29  ;;  %v2948_v30 = vor.u32 %v3555_v27, %v2947_v26  ;;  %v2949_v31 = vld [vmem:[%s4687_s8 + $0xd0] sm:$0xf0]  ;;  %v2955_v32 = vld [vmem:[%s4687_s8 + $0x98] sm:$0xf]  ;;  %v3533_v26 = vld [vmem:[%s4687_s8 + $0x24] sm:$0xf] }
 0x3c8   : > { %v847_v35 = vpack.c.bf16 %v846_v34, %v845_v33  ;;  %v3556_v33 = vld [vmem:[%s4687_s8 + $0xd4] sm:$0xf0]  ;;  %v2952_v34 = vor.u32 %v3547_v28, %v2949_v31  ;;  %v2901_v27 = vld [vmem:[%s4687_s8 + $0x60] sm:$0xf0]  ;;  %v2907_v28 = vld [vmem:[%s4687_s8 + $0x28] sm:$0xf] }
 0x3c9   : > { %1244 = vmatpush.bf16.msrb.mxu1 %v2948_v30  ;;  %v3534_v30 = vld [vmem:[%s4687_s8 + $0x2c] sm:$0xf] }
 0x3ca   : > { %2864 = vmatmul.msk.bf16.vlgmr.msra.gmra.mxu0 %vm509_vm0, %v847_v35  ;;  %v2956_v35 = vor.u32 %v3556_v33, %v2955_v32  ;;  %1258 = vmatpush.bf16.msrb.mxu3 %v2952_v34  ;;  %v2909_v31 = vld [vmem:[%s4687_s8 + $0x68] sm:$0xf0]  ;;  %v2900_v32 = vor.u32 %v3541_v23, %v2899_v22  ;;  %v2904_v33 = vor.u32 %v3533_v26, %v2901_v27  ;;  %v3571_v22 = vld [vmem:[%s4689_s10 + $0x50] sm:$0xff]  ;;  %v3561_v27 = vld [vmem:[%s4689_s10] sm:$0xff] }
 0x3cb   : > { %v3562_v23 = vld [vmem:[%s4689_s10 + $0x8] sm:$0xff] }
 0x3cc   : > { %1272 = vmatpush.bf16.msra.mxu2 %v2956_v35  ;;  %v2912_v35 = vor.u32 %v3534_v30, %v2909_v31  ;;  %v3578_v26 = vld [vmem:[%s4689_s10 + $0x88] sm:$0xff]  ;;  %v3624_v30 = vld [vmem:[%s4689_s10 + $0x1f8] sm:$0xff]  ;;  %v3569_v31 = vld [vmem:[%s4689_s10 + $0x40] sm:$0xff] }
 0x3d0   : > { %1273 = vmatpush.bf16.msra.mxu2 %v2892_v10  ;;  %v3535_v10 = vld [vmem:[%s4687_s8 + $0x34] sm:$0xf] }
 0x447   : > { %v880_v37 = vpop.f32.mrf.mxu0 }
 0x448   : > { %v881_v38 = vadd.f32 %v3729_v36, %v880_v37  ;;  %v2957_v37 = vld [vmem:[%s4687_s8 + $0xd8] sm:$0xf0] }
 0x44a   : > { %v885_v39 = vadd.f32 %v881_v38, %v3898_v2  ;;  %v2883_v38 = vld [vmem:[%s4687_s8 + $0x10] sm:$0xf] }
 0x44c   : > { %v889_v40 = vsel %vm509_vm0, %v885_v39, 0.0 }
 0x44d   : > { %890 = vadd.xlane.f32.xlu2 %v889_v40 }
 0x44f   : > { %v882_v41 = vpop.f32.mrf.mxu0 }
 0x450   : > { %v883_v42 = vadd.f32 %v3729_v36, %v882_v41  ;;  %v3548_v36 = vld [vmem:[%s4687_s8 + $0x9c] sm:$0xf] }
 0x451   : > { %v2960_v41 = vor.u32 %v3548_v36, %v2957_v37  ;;  %v2979_v36 = vld [vmem:[%s4687_s8 + $0xb0] sm:$0xf] }
 0x452   : > { %v886_v43 = vadd.f32 %v883_v42, %v3900_v3  ;;  %v3539_v42 = vld [vmem:[%s4687_s8 + $0x4c] sm:$0xf0] }
 0x453   : > { %v2884_v45 = vor.u32 %v3539_v42, %v2883_v38  ;;  %1286 = vmatpush.bf16.msra.mxu0 %v2960_v41  ;;  %v3559_v37 = vld [vmem:[%s4687_s8 + $0xec] sm:$0xf0]  ;;  %v3551_v38 = vld [vmem:[%s4687_s8 + $0xb4] sm:$0xf]  ;;  %v3560_v41 = vld [vmem:[%s4687_s8 + $0xf4] sm:$0xf0] }
 0x454   : > { %v892_v44 = vsel %vm509_vm0, %v886_v43, 0.0  ;;  %v3552_v42 = vld [vmem:[%s4687_s8 + $0xbc] sm:$0xf] }
 0x455   : > { %893 = vadd.xlane.f32.xlu1 %v892_v44  ;;  %1245 = vmatpush.bf16.msrb.mxu1 %v2884_v45 }
 0x4c0   : > { %v891_v2 = vpop.xlane.xlu2 %890 }
 0x4c1   : > { %v902_v51 = vmul.f32 %v3984_v50, %v891_v2  ;;  %v3532_v2 = vld [vmem:[%s4687_s8 + $0x1c] sm:$0xf] }
 0x4c3   : > { %v3987_v52 = vsub.f32 %v885_v39, %v902_v51  ;;  %v2893_v51 = vld [vmem:[%s4687_s8 + $0x58] sm:$0xf0] }
 0x4c5   : > { %v906_v3 = vmul.f32 %v3987_v52, %v3987_v52 }
 0x4c7   : > { %v908_v53 = vsel %vm509_vm0, %v906_v3, 0.0 }
 0x4c8   : > { %v894_v54 = vpop.xlane.xlu1 %893  ;;  %909 = vadd.xlane.f32.xlu0 %v908_v53  ;;  %v2896_v53 = vor.u32 %v3532_v2, %v2893_v51  ;;  %v2917_v2 = vld [vmem:[%s4687_s8 + $0x70] sm:$0xf0]  ;;  %v2923_v51 = vld [vmem:[%s4687_s8 + $0x38] sm:$0xf] }
 0x4c9   : > { %v903_v55 = vmul.f32 %v3984_v50, %v894_v54 }
 0x4ca   : > { %1287 = vmatpush.bf16.msra.mxu0 %v2896_v53  ;;  %v3536_v53 = vld [vmem:[%s4687_s8 + $0x3c] sm:$0xf] }
 0x4cb   : > { %v3993_v56 = vsub.f32 %v886_v43, %v903_v55  ;;  %v3531_v43 = vld [vmem:[%s4687_s8 + $0x14] sm:$0xf] }
 0x4cc   : > { %v2888_v49 = vor.u32 %v3531_v43, %v2885_v46  ;;  %v2989_v43 = vld [vmem:[%s4687_s8 + $0xf8] sm:$0xf0]  ;;  %v2915_v46 = vld [vmem:[%s4687_s8 + $0x30] sm:$0xf] }
 0x4cd   : > { %v907_v57 = vmul.f32 %v3993_v56, %v3993_v56 }
 0x4ce   : > { %1259 = vmatpush.bf16.msrb.mxu3 %v2888_v49  ;;  %v2992_v49 = vor.u32 %v3552_v42, %v2989_v43  ;;  %v3621_v42 = vld [vmem:[%s4689_s10 + $0x1e0] sm:$0xff]  ;;  %v3606_v43 = vld [vmem:[%s4689_s10 + $0x168] sm:$0xff] }
 0x4cf   : > { %v911_v58 = vsel %vm509_vm0, %v907_v57, 0.0 }
 0x4d0   : > { %912 = vadd.xlane.f32.xlu1 %v911_v58 }
 0x53b   : > { %v910_v8 = vpop.xlane.xlu0 %909 }
 0x53c   : > { %v914_v11 = vmul.f32 %v910_v8, %v3984_v50 }
 0x53e   : > { %v916_v19 = vadd.f32 1e-05, %v914_v11  ;;  %v2963_v11 = vld [vmem:[%s4687_s8 + $0xa0] sm:$0xf] }
 0x540   : > { %3769 = vrsqrt.f32 %v916_v19  ;;  %vm924_vm7 = vweird.f32 %v916_v19 }
 0x543   : > { %v913_v25 = vpop.xlane.xlu1 %912 }
 0x544   : > { %v915_v29 = vmul.f32 %v913_v25, %v3984_v50  ;;  %v2976_v25 = vor.u32 %v3550_v15, %v2973_v18  ;;  %v3572_v15 = vld [vmem:[%s4689_s10 + $0x58] sm:$0xff] }
 0x545   : > { %v3580_v18 = vld [vmem:[%s4689_s10 + $0x98] sm:$0xff] }
 0x546   : > { %v3770_v39 = vpop.eup %3769  ;;  %v917_v40 = vadd.f32 1e-05, %v915_v29  ;;  %v3542_v29 = vld [vmem:[%s4687_s8 + $0x64] sm:$0xf0] }
 0x547   : > { %v919_v44 = vmul.f32 %v3770_v39, %v916_v19  ;;  %vm925_vm6 = vweird.f32 %v3770_v39  ;;  %v2908_v34 = vor.u32 %v3542_v29, %v2907_v28  ;;  %v3585_v28 = vld [vmem:[%s4689_s10 + $0xc0] sm:$0xff]  ;;  %v3600_v29 = vld [vmem:[%s4689_s10 + $0x138] sm:$0xff] }
 0x548   : > { %3771 = vrsqrt.f32 %v917_v40  ;;  %vm926_vm8 = vmor %vm924_vm7, %vm925_vm6  ;;  %vm934_vm10 = vweird.f32 %v917_v40 }
 0x549   : > { %v920_v3 = vmul.f32 %v3770_v39, %v919_v44  ;;  %v2980_v44 = vor.u32 %v3559_v37, %v2979_v36  ;;  %v3623_v36 = vld [vmem:[%s4689_s10 + $0x1f0] sm:$0xff] }
 0x54a   : > { %v3607_v37 = vld [vmem:[%s4689_s10 + $0x170] sm:$0xff] }
 0x54b   : > { %v921_v54 = vmul.f32 0.5, %v920_v3  ;;  %v3544_v3 = vld [vmem:[%s4687_s8 + $0x74] sm:$0xf0] }
 0x54d   : > { %v922_v55 = vsub.f32 1.5, %v921_v54  ;;  %v2925_v54 = vld [vmem:[%s4687_s8 + $0x78] sm:$0xf0] }
 0x54e   : > { %v3772_v57 = vpop.eup %3771 }
 0x54f   : > { %v923_v58 = vmul.f32 %v3770_v39, %v922_v55  ;;  %v929_v59 = vmul.f32 %v3772_v57, %v917_v40  ;;  %vm935_vm9 = vweird.f32 %v3772_v57  ;;  %v2987_v40 = vld [vmem:[%s4687_s8 + $0xb8] sm:$0xf]  ;;  %v2916_v55 = vor.u32 %v3543_v47, %v2915_v46  ;;  %v3605_v47 = vld [vmem:[%s4689_s10 + $0x160] sm:$0xff] }
 0x550   : > { %vm936_vm11 = vmor %vm934_vm10, %vm935_vm9  ;;  %v2988_v48 = vor.u32 %v3560_v41, %v2987_v40  ;;  %v3622_v40 = vld [vmem:[%s4689_s10 + $0x1e8] sm:$0xff]  ;;  %v3597_v41 = vld [vmem:[%s4689_s10 + $0x120] sm:$0xff] }
 0x551   : > { %v930_v60 = vmul.f32 %v3772_v57, %v929_v59  ;;  %v927_v61 = vsel %vm926_vm8, %v3770_v39, %v923_v58  ;;  %v2981_v39 = vld [vmem:[%s4687_s8 + $0xf0] sm:$0xf0]  ;;  %v2924_v58 = vor.u32 %v3544_v3, %v2923_v51  ;;  %v2928_v59 = vor.u32 %v3536_v53, %v2925_v54  ;;  %v3620_v46 = vld [vmem:[%s4689_s10 + $0x1d8] sm:$0xff]  ;;  %v3594_v3 = vld [vmem:[%s4689_s10 + $0x108] sm:$0xff] }
 0x552   : > { %v938_v1 = vmul.f32 %v927_v61, %v3987_v52  ;;  %v3557_v52 = vld [vmem:[%s4687_s8 + $0xdc] sm:$0xf0]  ;;  %v2984_v45 = vor.u32 %v3551_v38, %v2981_v39  ;;  %v3592_v61 = vld [vmem:[%s4689_s10 + $0xf8] sm:$0xff]  ;;  %v3615_v38 = vld [vmem:[%s4689_s10 + $0x1b0] sm:$0xff] }
 0x553   : > { %v931_v62 = vmul.f32 0.5, %v930_v60  ;;  %v2964_v20 = vor.u32 %v3557_v52, %v2963_v11  ;;  %v3568_v60 = vld [vmem:[%s4689_s10 + $0x38] sm:$0xff]  ;;  %v3565_v11 = vld [vmem:[%s4689_s10 + $0x20] sm:$0xff]  ;;  %v3598_v39 = vld [vmem:[%s4689_s10 + $0x128] sm:$0xff] }
 0x554   : > { %v943_v7 = vmul.f32 %v3730_v0, %v938_v1  ;;  %v3591_v1 = vld [vmem:[%s4689_s10 + $0xf0] sm:$0xff]  ;;  %v3589_v52 = vld [vmem:[%s4689_s10 + $0xe0] sm:$0xff]  ;;  %v3612_v51 = vld [vmem:[%s4689_s10 + $0x198] sm:$0xff] }
 0x555   : > { %v932_v63 = vsub.f32 1.5, %v931_v62  ;;  %v3576_v62 = vld [vmem:[%s4689_s10 + $0x78] sm:$0xff]  ;;  %v3618_v53 = vld [vmem:[%s4689_s10 + $0x1c8] sm:$0xff]  ;;  %v3603_v54 = vld [vmem:[%s4689_s10 + $0x150] sm:$0xff] }
 0x556   : > { %v4119_v14 = vadd.f32 %v3731_v6, %v943_v7  ;;  %v3590_v7 = vld [vmem:[%s4689_s10 + $0xe8] sm:$0xff] }
 0x557   : > { %v933_v4 = vmul.f32 %v3772_v57, %v932_v63  ;;  %v3584_v63 = vld [vmem:[%s4689_s10 + $0xb8] sm:$0xff] }
 0x559   : > { %v937_v5 = vsel %vm936_vm11, %v3772_v57, %v933_v4  ;;  %v2920_v57 = vor.u32 %v3535_v10, %v2917_v2  ;;  %v3575_v4 = vld [vmem:[%s4689_s10 + $0x70] sm:$0xff]  ;;  %v3604_v2 = vld [vmem:[%s4689_s10 + $0x158] sm:$0xff] }
 0x55a   : > { %v939_v8 = vmul.f32 %v937_v5, %v3993_v56  ;;  %v2971_v56 = vld [vmem:[%s4687_s8 + $0xa8] sm:$0xf]  ;;  %v3583_v5 = vld [vmem:[%s4689_s10 + $0xb0] sm:$0xff] }
 0x55b   : > { %v2972_v24 = vor.u32 %v3558_v17, %v2971_v56  ;;  %v3564_v56 = vld [vmem:[%s4689_s10 + $0x18] sm:$0xff]  ;;  %v3619_v10 = vld [vmem:[%s4689_s10 + $0x1d0] sm:$0xff] }
 0x55c   : > { %v944_v9 = vmul.f32 %v3730_v0, %v939_v8  ;;  %v3567_v0 = vld [vmem:[%s4689_s10 + $0x30] sm:$0xff]  ;;  %v3574_v8 = vld [vmem:[%s4689_s10 + $0x68] sm:$0xff]  ;;  %v3588_v17 = vld [vmem:[%s4689_s10 + $0xd8] sm:$0xff] }
 0x55e   : > { %v4121_v16 = vadd.f32 %v3731_v6, %v944_v9  ;;  %v3566_v6 = vld [vmem:[%s4689_s10 + $0x28] sm:$0xff] }
 0x55f   : > { %v3582_v9 = vld [vmem:[%s4689_s10 + $0xa8] sm:$0xff] }
 0x560   : > { %v4134_v19 = vpack.c.bf16 %v4121_v16, %v4119_v14 }
 0x562   : > { %2993 = vmatmul.msk.bf16.vlgmr.msra.gmra.mxu1 %vm509_vm0, %v4134_v19  ;;  %2994 = vmatmul.msk.bf16.vlgmr.msra.gmra.mxu3 %vm509_vm0, %v4134_v19 }
 0x563   : > { %2995 = vmatmul.msk.bf16.vlgmr.msrb.gmra.mxu2 %vm509_vm0, %v4134_v19  ;;  %2996 = vmatmul.msk.bf16.vlgmr.msrb.gmra.mxu0 %vm509_vm0, %v4134_v19 }
 0x564   : > { %1300 = vmatpush.bf16.msra.mxu1 %v2964_v20  ;;  %1314 = vmatpush.bf16.msra.mxu3 %v2968_v21  ;;  %v3563_v20 = vld [vmem:[%s4689_s10 + $0x10] sm:$0xff] }
 0x565   : > { %1328 = vmatpush.bf16.msrb.mxu2 %v2972_v24  ;;  %1342 = vmatpush.bf16.msrb.mxu0 %v2976_v25  ;;  %v3587_v21 = vld [vmem:[%s4689_s10 + $0xd0] sm:$0xff]  ;;  %v3586_v24 = vld [vmem:[%s4689_s10 + $0xc8] sm:$0xff] }
 0x566   : > { %v3570_v25 = vld [vmem:[%s4689_s10 + $0x48] sm:$0xff] }
 0x568   : > { %1301 = vmatpush.bf16.msra.mxu1 %v2900_v32  ;;  %1315 = vmatpush.bf16.msra.mxu3 %v2904_v33  ;;  %v3577_v32 = vld [vmem:[%s4689_s10 + $0x80] sm:$0xff]  ;;  %v3608_v33 = vld [vmem:[%s4689_s10 + $0x178] sm:$0xff] }
 0x569   : > { %1329 = vmatpush.bf16.msrb.mxu2 %v2908_v34  ;;  %1343 = vmatpush.bf16.msrb.mxu0 %v2912_v35  ;;  %v3616_v34 = vld [vmem:[%s4689_s10 + $0x1b8] sm:$0xff]  ;;  %v3599_v35 = vld [vmem:[%s4689_s10 + $0x130] sm:$0xff] }
 0x572   : > { %2997 = vmatmul.msk.bf16.vlgmr.msrb.gmra.mxu1 %vm509_vm0, %v4134_v19  ;;  %2998 = vmatmul.msk.bf16.vlgmr.msrb.gmra.mxu3 %vm509_vm0, %v4134_v19 }
 0x573   : > { %2999 = vmatmul.msk.bf16.vlgmr.msra.gmra.mxu2 %vm509_vm0, %v4134_v19  ;;  %3000 = vmatmul.msk.bf16.vlgmr.msra.gmra.mxu0 %vm509_vm0, %v4134_v19 }
 0x574   : > { %1356 = vmatpush.bf16.msrb.mxu1 %v2980_v44  ;;  %1370 = vmatpush.bf16.msrb.mxu3 %v2984_v45  ;;  %v3614_v44 = vld [vmem:[%s4689_s10 + $0x1a8] sm:$0xff]  ;;  %v3596_v45 = vld [vmem:[%s4689_s10 + $0x118] sm:$0xff] }
 0x575   : > { %1384 = vmatpush.bf16.msra.mxu2 %v2988_v48  ;;  %1398 = vmatpush.bf16.msra.mxu0 %v2992_v49  ;;  %v3613_v48 = vld [vmem:[%s4689_s10 + $0x1a0] sm:$0xff]  ;;  %v3595_v49 = vld [vmem:[%s4689_s10 + $0x110] sm:$0xff] }
 0x578   : > { %1357 = vmatpush.bf16.msrb.mxu1 %v2916_v55  ;;  %1371 = vmatpush.bf16.msrb.mxu3 %v2920_v57  ;;  %v3611_v55 = vld [vmem:[%s4689_s10 + $0x190] sm:$0xff]  ;;  %v3593_v57 = vld [vmem:[%s4689_s10 + $0x100] sm:$0xff] }
 0x579   : > { %1385 = vmatpush.bf16.msra.mxu2 %v2924_v58  ;;  %1399 = vmatpush.bf16.msra.mxu0 %v2928_v59  ;;  %v3617_v58 = vld [vmem:[%s4689_s10 + $0x1c0] sm:$0xff]  ;;  %v3602_v59 = vld [vmem:[%s4689_s10 + $0x148] sm:$0xff] }
 0x582   : > { %3001 = vmatmul.msk.bf16.vlgmr.msra.gmra.mxu1 %vm509_vm0, %v4134_v19  ;;  %3002 = vmatmul.msk.bf16.vlgmr.msra.gmra.mxu3 %vm509_vm0, %v4134_v19 }
 0x583   : > { %3003 = vmatmul.msk.bf16.vlgmr.msrb.gmra.mxu2 %vm509_vm0, %v4134_v19  ;;  %3004 = vmatmul.msk.bf16.vlgmr.msrb.gmra.mxu0 %vm509_vm0, %v4134_v19 }
 0x584   : > { %2482 = vmatpush.bf16.msra.mxu1 %v3568_v60  ;;  %2524 = vmatpush.bf16.msrb.mxu0 %v3592_v61  ;;  %v3610_v60 = vld [vmem:[%s4689_s10 + $0x188] sm:$0xff]  ;;  %v3601_v61 = vld [vmem:[%s4689_s10 + $0x140] sm:$0xff] }
 0x585   : > { %2496 = vmatpush.bf16.msra.mxu3 %v3576_v62  ;;  %2510 = vmatpush.bf16.msrb.mxu2 %v3584_v63  ;;  %v3609_v62 = vld [vmem:[%s4689_s10 + $0x180] sm:$0xff] }
 0x586   : > { %v4435_v63 = vld [vmem:[%s4688_s9] sm:$0xff] }
 0x588   : > { %2483 = vmatpush.bf16.msra.mxu1 %v3567_v0  ;;  %2525 = vmatpush.bf16.msrb.mxu0 %v3591_v1 }
 0x589   : > { %2497 = vmatpush.bf16.msra.mxu3 %v3575_v4  ;;  %2511 = vmatpush.bf16.msrb.mxu2 %v3583_v5  ;;  %v987_v4 = vperm.slane %v4435_v63, 0  ;;  %v990_v5 = vperm.slane %v4435_v63, 3 }
 0x58c   : > { %2484 = vmatpush.bf16.msra.mxu1 %v3566_v6  ;;  %2526 = vmatpush.bf16.msrb.mxu0 %v3590_v7 }
 0x58d   : > { %2498 = vmatpush.bf16.msra.mxu3 %v3574_v8  ;;  %2512 = vmatpush.bf16.msrb.mxu2 %v3582_v9 }
 0x590   : > { %2485 = vmatpush.bf16.msra.mxu1 %v3565_v11  ;;  %2527 = vmatpush.bf16.msrb.mxu0 %v3589_v52  ;;  %v988_v52 = vperm.slane %v4435_v63, 1 }
 0x591   : > { %2499 = vmatpush.bf16.msra.mxu3 %v3573_v12  ;;  %2513 = vmatpush.bf16.msrb.mxu2 %v3581_v13 }
 0x592   : > { %3005 = vmatmul.msk.bf16.vlgmr.msrb.gmra.mxu1 %vm509_vm0, %v4134_v19  ;;  %3006 = vmatmul.msk.bf16.vlgmr.msrb.gmra.mxu3 %vm509_vm0, %v4134_v19 }
 0x593   : > { %3007 = vmatmul.msk.bf16.vlgmr.msra.gmra.mxu2 %vm509_vm0, %v4134_v19  ;;  %3008 = vmatmul.msk.bf16.vlgmr.msra.gmra.mxu0 %vm509_vm0, %v4134_v19  ;;  %v3579_v19 = vld [vmem:[%s4689_s10 + $0x90] sm:$0xff] }
 0x594   : > { %2486 = vmatpush.bf16.msra.mxu1 %v3564_v56  ;;  %2528 = vmatpush.bf16.msrb.mxu0 %v3588_v17  ;;  %v989_v56 = vperm.slane %v4435_v63, 2 }
 0x595   : > { %2500 = vmatpush.bf16.msra.mxu3 %v3572_v15  ;;  %2514 = vmatpush.bf16.msrb.mxu2 %v3580_v18 }
 0x598   : > { %2487 = vmatpush.bf16.msra.mxu1 %v3563_v20  ;;  %2529 = vmatpush.bf16.msrb.mxu0 %v3587_v21 }
 0x599   : > { %2501 = vmatpush.bf16.msra.mxu3 %v3571_v22  ;;  %2515 = vmatpush.bf16.msrb.mxu2 %v3579_v19  ;;  %v3632_v22 = vld [vmem:[%s4689_s10 + $0x238] sm:$0xff] }
 0x59c   : > { %2488 = vmatpush.bf16.msra.mxu1 %v3562_v23  ;;  %2530 = vmatpush.bf16.msrb.mxu0 %v3586_v24  ;;  %v3656_v24 = vld [vmem:[%s4689_s10 + $0x2f8] sm:$0xff] }
 0x59d   : > { %2502 = vmatpush.bf16.msra.mxu3 %v3570_v25  ;;  %2516 = vmatpush.bf16.msrb.mxu2 %v3578_v26 }
 0x5a0   : > { %2489 = vmatpush.bf16.msra.mxu1 %v3561_v27  ;;  %2531 = vmatpush.bf16.msrb.mxu0 %v3585_v28 }
 0x5a1   : > { %2503 = vmatpush.bf16.msra.mxu3 %v3569_v31  ;;  %2517 = vmatpush.bf16.msrb.mxu2 %v3577_v32  ;;  %v3631_v32 = vld [vmem:[%s4689_s10 + $0x230] sm:$0xff] }
 0x5a4   : > { %2538 = vmatpush.bf16.msrb.mxu1 %v3600_v29  ;;  %2580 = vmatpush.bf16.msra.mxu0 %v3624_v30 }
 0x5a5   : > { %2552 = vmatpush.bf16.msrb.mxu3 %v3608_v33  ;;  %2566 = vmatpush.bf16.msra.mxu2 %v3616_v34 }
 0x5a8   : > { %2539 = vmatpush.bf16.msrb.mxu1 %v3599_v35  ;;  %2581 = vmatpush.bf16.msra.mxu0 %v3623_v36  ;;  %v3655_v36 = vld [vmem:[%s4689_s10 + $0x2f0] sm:$0xff] }
 0x5a9   : > { %2553 = vmatpush.bf16.msrb.mxu3 %v3607_v37  ;;  %2567 = vmatpush.bf16.msra.mxu2 %v3615_v38 }
 0x5ac   : > { %2540 = vmatpush.bf16.msrb.mxu1 %v3598_v39  ;;  %2582 = vmatpush.bf16.msra.mxu0 %v3622_v40  ;;  %v3640_v39 = vld [vmem:[%s4689_s10 + $0x278] sm:$0xff] }
 0x5ad   : > { %2554 = vmatpush.bf16.msrb.mxu3 %v3606_v43  ;;  %2568 = vmatpush.bf16.msra.mxu2 %v3614_v44  ;;  %v994_v44 = vperm.slane %v4435_v63, 7 }
 0x5b0   : > { %2541 = vmatpush.bf16.msrb.mxu1 %v3597_v41  ;;  %2583 = vmatpush.bf16.msra.mxu0 %v3621_v42  ;;  %v991_v41 = vperm.slane %v4435_v63, 4  ;;  %v3648_v42 = vld [vmem:[%s4689_s10 + $0x2b8] sm:$0xff] }
 0x5b1   : > { %2555 = vmatpush.bf16.msrb.mxu3 %v3605_v47  ;;  %2569 = vmatpush.bf16.msra.mxu2 %v3613_v48  ;;  %v3639_v48 = vld [vmem:[%s4689_s10 + $0x270] sm:$0xff] }
 0x5b4   : > { %2542 = vmatpush.bf16.msrb.mxu1 %v3596_v45  ;;  %2584 = vmatpush.bf16.msra.mxu0 %v3620_v46  ;;  %v3630_v45 = vld [vmem:[%s4689_s10 + $0x228] sm:$0xff] }
 0x5b5   : > { %2556 = vmatpush.bf16.msrb.mxu3 %v3604_v2  ;;  %2570 = vmatpush.bf16.msra.mxu2 %v3612_v51  ;;  %v3654_v46 = vld [vmem:[%s4689_s10 + $0x2e8] sm:$0xff]  ;;  %v3647_v2 = vld [vmem:[%s4689_s10 + $0x2b0] sm:$0xff] }
 0x5b8   : > { %2543 = vmatpush.bf16.msrb.mxu1 %v3595_v49  ;;  %2585 = vmatpush.bf16.msra.mxu0 %v3619_v10 }
 0x5b9   : > { %2557 = vmatpush.bf16.msrb.mxu3 %v3603_v54  ;;  %2571 = vmatpush.bf16.msra.mxu2 %v3611_v55  ;;  %v992_v54 = vperm.slane %v4435_v63, 5 }
 0x5bc   : > { %2544 = vmatpush.bf16.msrb.mxu1 %v3594_v3  ;;  %2586 = vmatpush.bf16.msra.mxu0 %v3618_v53  ;;  %v3629_v53 = vld [vmem:[%s4689_s10 + $0x220] sm:$0xff] }
 0x5bd   : > { %2558 = vmatpush.bf16.msrb.mxu3 %v3602_v59  ;;  %2572 = vmatpush.bf16.msra.mxu2 %v3610_v60  ;;  %v993_v59 = vperm.slane %v4435_v63, 6  ;;  %v3628_v63 = vld [vmem:[%s4689_s10 + $0x218] sm:$0xff] }
 0x5c0   : > { %2545 = vmatpush.bf16.msrb.mxu1 %v3593_v57  ;;  %2587 = vmatpush.bf16.msra.mxu0 %v3617_v58  ;;  %v3653_v58 = vld [vmem:[%s4689_s10 + $0x2e0] sm:$0xff] }
 0x5c1   : > { %2559 = vmatpush.bf16.msrb.mxu3 %v3601_v61  ;;  %2573 = vmatpush.bf16.msra.mxu2 %v3609_v62  ;;  %v3638_v61 = vld [vmem:[%s4689_s10 + $0x268] sm:$0xff] }
 0x5df   : > { %v1191_v0 = vpop.f32.mrf.mxu1 }
 0x5e0   : > { %v1233_v1 = vpop.f32.mrf.mxu0  ;;  %v1192_v7 = vadd.f32 %v1191_v0, %v987_v4 }
 0x5e1   : > { %v1234_v9 = vadd.f32 %v1233_v1, %v990_v5  ;;  %v3646_v1 = vld [vmem:[%s4689_s10 + $0x2a8] sm:$0xff] }
 0x5e2   : > { %v1406_v15 = vmax.f32 %v1192_v7, 0.0 }
 0x5e3   : > { %v1409_v20 = vmax.f32 %v1234_v9, 0.0 }
 0x5e5   : > { %v1205_v6 = vpop.f32.mrf.mxu3 }
 0x5e6   : > { %v1219_v8 = vpop.f32.mrf.mxu2  ;;  %v1206_v19 = vadd.f32 %v1205_v6, %v988_v52 }
 0x5e7   : > { %v1193_v11 = vpop.f32.mrf.mxu1  ;;  %v1220_v25 = vadd.f32 %v1219_v8, %v989_v56  ;;  %v3652_v8 = vld [vmem:[%s4689_s10 + $0x2d8] sm:$0xff] }
 0x5e8   : > { %v1194_v12 = vadd.f32 %v1193_v11, %v987_v4  ;;  %v1235_v13 = vpop.f32.mrf.mxu0  ;;  %v1407_v33 = vmax.f32 %v1206_v19, 0.0 }
 0x5e9   : > { %v1236_v17 = vadd.f32 %v1235_v13, %v990_v5  ;;  %v1408_v37 = vmax.f32 %v1220_v25, 0.0 }
 0x5ea   : > { %v1422_v18 = vmax.f32 %v1194_v12, 0.0  ;;  %v3637_v12 = vld [vmem:[%s4689_s10 + $0x260] sm:$0xff] }
 0x5eb   : > { %v1425_v21 = vmax.f32 %v1236_v17, 0.0  ;;  %v3645_v17 = vld [vmem:[%s4689_s10 + $0x2a0] sm:$0xff] }
 0x5ec   : > { %v1438_v23 = vpack.c.bf16 %v1422_v18, %v1406_v15  ;;  %v4502_v18 = vld [vmem:[%s4688_s9 + $0x8] sm:$0xff] }
 0x5ed   : > { %v1441_v26 = vpack.c.bf16 %v1425_v21, %v1409_v20  ;;  %v1207_v27 = vpop.f32.mrf.mxu3  ;;  %v3627_v21 = vld [vmem:[%s4689_s10 + $0x210] sm:$0xff] }
 0x5ee   : > { %v1208_v28 = vadd.f32 %v1207_v27, %v988_v52  ;;  %v1221_v29 = vpop.f32.mrf.mxu2  ;;  %2490 = vmatmul.bf16.vlgmr.msra.gmra.mxu1 %v1438_v23  ;;  %v3636_v27 = vld [vmem:[%s4689_s10 + $0x258] sm:$0xff] }
 0x5ef   : > { %v1222_v30 = vadd.f32 %v1221_v29, %v989_v56  ;;  %2532 = vmatmul.bf16.vlgmr.msrb.gmra.mxu0 %v1441_v26  ;;  %2594 = vmatpush.bf16.msra.mxu1 %v3632_v22  ;;  %v1247_v31 = vpop.f32.mrf.mxu1  ;;  %v995_v29 = vperm.slane %v4502_v18, 0 }
 0x5f0   : > { %v1423_v34 = vmax.f32 %v1208_v28, 0.0  ;;  %2636 = vmatpush.bf16.msrb.mxu0 %v3656_v24  ;;  %v1289_v35 = vpop.f32.mrf.mxu0  ;;  %v1248_v49 = vadd.f32 %v1247_v31, %v991_v41  ;;  %v3651_v24 = vld [vmem:[%s4689_s10 + $0x2d0] sm:$0xff] }
 0x5f1   : > { %v1424_v38 = vmax.f32 %v1222_v30, 0.0  ;;  %v1290_v51 = vadd.f32 %v1289_v35, %v994_v44  ;;  %v3644_v30 = vld [vmem:[%s4689_s10 + $0x298] sm:$0xff] }
 0x5f2   : > { %v1439_v40 = vpack.c.bf16 %v1423_v34, %v1407_v33  ;;  %v1410_v62 = vmax.f32 %v1248_v49, 0.0  ;;  %v3626_v33 = vld [vmem:[%s4689_s10 + $0x208] sm:$0xff] }
 0x5f3   : > { %v1440_v43 = vpack.c.bf16 %v1424_v38, %v1408_v37  ;;  %2595 = vmatpush.bf16.msra.mxu1 %v3631_v32  ;;  %v1413_v4 = vmax.f32 %v1290_v51, 0.0  ;;  %v998_v32 = vperm.slane %v4502_v18, 3  ;;  %v3650_v34 = vld [vmem:[%s4689_s10 + $0x2c8] sm:$0xff] }
 0x5f4   : > { %2637 = vmatpush.bf16.msrb.mxu0 %v3655_v36  ;;  %2504 = vmatmul.bf16.vlgmr.msra.gmra.mxu3 %v1439_v40  ;;  %v3635_v36 = vld [vmem:[%s4689_s10 + $0x250] sm:$0xff] }
 0x5f5   : > { %2518 = vmatmul.bf16.vlgmr.msrb.gmra.mxu2 %v1440_v43  ;;  %2608 = vmatpush.bf16.msra.mxu3 %v3640_v39  ;;  %v1261_v47 = vpop.f32.mrf.mxu3  ;;  %v3643_v39 = vld [vmem:[%s4689_s10 + $0x290] sm:$0xff]  ;;  %v996_v43 = vperm.slane %v4502_v18, 1 }
 0x5f6   : > { %2622 = vmatpush.bf16.msrb.mxu2 %v3648_v42  ;;  %v1275_v10 = vpop.f32.mrf.mxu2  ;;  %v1262_v6 = vadd.f32 %v1261_v47, %v992_v54  ;;  %v3625_v42 = vld [vmem:[%s4689_s10 + $0x200] sm:$0xff]  ;;  %v3664_v47 = vld [vmem:[%s4689_s10 + $0x338] sm:$0xff] }
 0x5f7   : > { %2596 = vmatpush.bf16.msra.mxu1 %v3630_v45  ;;  %v1249_v3 = vpop.f32.mrf.mxu1  ;;  %v1276_v9 = vadd.f32 %v1275_v10, %v993_v59  ;;  %v3688_v10 = vld [vmem:[%s4689_s10 + $0x3f8] sm:$0xff] }
 0x5f8   : > { %2638 = vmatpush.bf16.msrb.mxu0 %v3654_v46  ;;  %v1250_v55 = vadd.f32 %v1249_v3, %v991_v41  ;;  %v1291_v57 = vpop.f32.mrf.mxu0  ;;  %v1411_v22 = vmax.f32 %v1262_v6, 0.0  ;;  %v3649_v46 = vld [vmem:[%s4689_s10 + $0x2c0] sm:$0xff]  ;;  %v3672_v6 = vld [vmem:[%s4689_s10 + $0x378] sm:$0xff] }
 0x5f9   : > { %v1292_v60 = vadd.f32 %v1291_v57, %v994_v44  ;;  %2609 = vmatpush.bf16.msra.mxu3 %v3639_v48  ;;  %v1412_v25 = vmax.f32 %v1276_v9, 0.0  ;;  %v997_v48 = vperm.slane %v4502_v18, 2 }
 0x5fa   : > { %v1426_v0 = vmax.f32 %v1250_v55, 0.0  ;;  %2623 = vmatpush.bf16.msrb.mxu2 %v3647_v2  ;;  %v3634_v2 = vld [vmem:[%s4689_s10 + $0x248] sm:$0xff] }
 0x5fb   : > { %v1429_v5 = vmax.f32 %v1292_v60, 0.0  ;;  %2597 = vmatpush.bf16.msra.mxu1 %v3629_v53  ;;  %v3642_v53 = vld [vmem:[%s4689_s10 + $0x288] sm:$0xff] }
 0x5fc   : > { %v1442_v7 = vpack.c.bf16 %v1426_v0, %v1410_v62  ;;  %2639 = vmatpush.bf16.msrb.mxu0 %v3653_v58  ;;  %v3687_v0 = vld [vmem:[%s4689_s10 + $0x3f0] sm:$0xff] }
 0x5fd   : > { %v1445_v11 = vpack.c.bf16 %v1429_v5, %v1413_v4  ;;  %2610 = vmatpush.bf16.msra.mxu3 %v3638_v61  ;;  %v1263_v52 = vpop.f32.mrf.mxu3 }
 0x5fe   : > { %2624 = vmatpush.bf16.msrb.mxu2 %v3646_v1  ;;  %v1264_v13 = vadd.f32 %v1263_v52, %v992_v54  ;;  %v1277_v56 = vpop.f32.mrf.mxu2  ;;  %2546 = vmatmul.bf16.vlgmr.msrb.gmra.mxu1 %v1442_v7  ;;  %v3633_v1 = vld [vmem:[%s4689_s10 + $0x240] sm:$0xff]  ;;  %v3662_v52 = vld [vmem:[%s4689_s10 + $0x328] sm:$0xff] }
 0x5ff   : > { %v1278_v15 = vadd.f32 %v1277_v56, %v993_v59  ;;  %2588 = vmatmul.bf16.vlgmr.msra.gmra.mxu0 %v1445_v11  ;;  %2598 = vmatpush.bf16.msra.mxu1 %v3628_v63  ;;  %v1303_v20 = vpop.f32.mrf.mxu1  ;;  %v3663_v59 = vld [vmem:[%s4689_s10 + $0x330] sm:$0xff]  ;;  %v3641_v63 = vld [vmem:[%s4689_s10 + $0x280] sm:$0xff]  ;;  %v3686_v56 = vld [vmem:[%s4689_s10 + $0x3e8] sm:$0xff] }
 0x600   : > { %v1427_v19 = vmax.f32 %v1264_v13, 0.0  ;;  %2640 = vmatpush.bf16.msrb.mxu0 %v3652_v8  ;;  %v1345_v23 = vpop.f32.mrf.mxu0  ;;  %v1304_v37 = vadd.f32 %v1303_v20, %v995_v29  ;;  %v3680_v8 = vld [vmem:[%s4689_s10 + $0x3b8] sm:$0xff] }
 0x601   : > { %v1428_v26 = vmax.f32 %v1278_v15, 0.0  ;;  %2611 = vmatpush.bf16.msra.mxu3 %v3637_v12  ;;  %v1346_v40 = vadd.f32 %v1345_v23, %v998_v32  ;;  %v3671_v15 = vld [vmem:[%s4689_s10 + $0x370] sm:$0xff] }
 0x602   : > { %v1443_v28 = vpack.c.bf16 %v1427_v19, %v1411_v22  ;;  %2625 = vmatpush.bf16.msrb.mxu2 %v3645_v17  ;;  %v1414_v51 = vmax.f32 %v1304_v37, 0.0  ;;  %v3661_v19 = vld [vmem:[%s4689_s10 + $0x320] sm:$0xff]  ;;  %v999_v37 = vperm.slane %v4502_v18, 4 }
 0x603   : > { %v1444_v31 = vpack.c.bf16 %v1428_v26, %v1412_v25  ;;  %2599 = vmatpush.bf16.msra.mxu1 %v3627_v21  ;;  %v1417_v54 = vmax.f32 %v1346_v40, 0.0  ;;  %v3679_v21 = vld [vmem:[%s4689_s10 + $0x3b0] sm:$0xff]  ;;  %v3670_v25 = vld [vmem:[%s4689_s10 + $0x368] sm:$0xff]  ;;  %v1002_v40 = vperm.slane %v4502_v18, 7 }
 0x604   : > { %2641 = vmatpush.bf16.msrb.mxu0 %v3651_v24  ;;  %2560 = vmatmul.bf16.vlgmr.msrb.gmra.mxu3 %v1443_v28  ;;  %v3685_v24 = vld [vmem:[%s4689_s10 + $0x3e0] sm:$0xff]  ;;  %v3678_v26 = vld [vmem:[%s4689_s10 + $0x3a8] sm:$0xff]  ;;  %v3684_v28 = vld [vmem:[%s4689_s10 + $0x3d8] sm:$0xff] }
 0x605   : > { %2574 = vmatmul.bf16.vlgmr.msra.gmra.mxu2 %v1444_v31  ;;  %2612 = vmatpush.bf16.msra.mxu3 %v3636_v27  ;;  %v1317_v35 = vpop.f32.mrf.mxu3  ;;  %v3660_v27 = vld [vmem:[%s4689_s10 + $0x318] sm:$0xff] }
 0x606   : > { %2626 = vmatpush.bf16.msrb.mxu2 %v3644_v30  ;;  %v1331_v38 = vpop.f32.mrf.mxu2  ;;  %v1318_v57 = vadd.f32 %v1317_v35, %v996_v43  ;;  %v3669_v30 = vld [vmem:[%s4689_s10 + $0x360] sm:$0xff] }
 0x607   : > { %2600 = vmatpush.bf16.msra.mxu1 %v3626_v33  ;;  %v1305_v41 = vpop.f32.mrf.mxu1  ;;  %v1332_v60 = vadd.f32 %v1331_v38, %v997_v48  ;;  %v3659_v33 = vld [vmem:[%s4689_s10 + $0x310] sm:$0xff] }
 0x608   : > { %2642 = vmatpush.bf16.msrb.mxu0 %v3650_v34  ;;  %v1306_v44 = vadd.f32 %v1305_v41, %v995_v29  ;;  %v1347_v45 = vpop.f32.mrf.mxu0  ;;  %v1415_v9 = vmax.f32 %v1318_v57, 0.0  ;;  %v3683_v34 = vld [vmem:[%s4689_s10 + $0x3d0] sm:$0xff]  ;;  %v3658_v41 = vld [vmem:[%s4689_s10 + $0x308] sm:$0xff] }
 0x609   : > { %v1348_v49 = vadd.f32 %v1347_v45, %v998_v32  ;;  %2613 = vmatpush.bf16.msra.mxu3 %v3635_v36  ;;  %v1416_v12 = vmax.f32 %v1332_v60, 0.0  ;;  %v3677_v32 = vld [vmem:[%s4689_s10 + $0x3a0] sm:$0xff]  ;;  %v3668_v36 = vld [vmem:[%s4689_s10 + $0x358] sm:$0xff]  ;;  %v3667_v45 = vld [vmem:[%s4689_s10 + $0x350] sm:$0xff] }
 0x60a   : > { %v1430_v3 = vmax.f32 %v1306_v44, 0.0  ;;  %2627 = vmatpush.bf16.msrb.mxu2 %v3643_v39  ;;  %v3676_v39 = vld [vmem:[%s4689_s10 + $0x398] sm:$0xff]  ;;  %v3666_v57 = vld [vmem:[%s4689_s10 + $0x348] sm:$0xff] }
 0x60b   : > { %v1433_v55 = vmax.f32 %v1348_v49, 0.0  ;;  %2601 = vmatpush.bf16.msra.mxu1 %v3625_v42  ;;  %v3674_v60 = vld [vmem:[%s4689_s10 + $0x388] sm:$0xff] }
 0x60c   : > { %v1446_v58 = vpack.c.bf16 %v1430_v3, %v1414_v51  ;;  %2643 = vmatpush.bf16.msrb.mxu0 %v3649_v46 }
 0x60d   : > { %v1449_v61 = vpack.c.bf16 %v1433_v55, %v1417_v54  ;;  %2614 = vmatpush.bf16.msra.mxu3 %v3634_v2  ;;  %v1319_v62 = vpop.f32.mrf.mxu3  ;;  %v1000_v2 = vperm.slane %v4502_v18, 5  ;;  %v1001_v54 = vperm.slane %v4502_v18, 6 }
 0x60e   : > { %2628 = vmatpush.bf16.msrb.mxu2 %v3642_v53  ;;  %v1320_v4 = vadd.f32 %v1319_v62, %v996_v43  ;;  %v1333_v5 = vpop.f32.mrf.mxu2  ;;  %2602 = vmatmul.bf16.vlgmr.msra.gmra.mxu1 %v1446_v58  ;;  %v3682_v43 = vld [vmem:[%s4689_s10 + $0x3c8] sm:$0xff]  ;;  %v3681_v53 = vld [vmem:[%s4689_s10 + $0x3c0] sm:$0xff] }
 0x60f   : > { %2650 = vmatpush.bf16.msrb.mxu1 %v3664_v47  ;;  %v1334_v7 = vadd.f32 %v1333_v5, %v997_v48  ;;  %2644 = vmatmul.bf16.vlgmr.msrb.gmra.mxu0 %v1449_v61  ;;  %v1359_v22 = vpop.f32.mrf.mxu1  ;;  %v3675_v47 = vld [vmem:[%s4689_s10 + $0x390] sm:$0xff]  ;;  %v3665_v5 = vld [vmem:[%s4689_s10 + $0x340] sm:$0xff] }
 0x610   : > { %2692 = vmatpush.bf16.msra.mxu0 %v3688_v10  ;;  %v1431_v11 = vmax.f32 %v1320_v4, 0.0  ;;  %v1401_v23 = vpop.f32.mrf.mxu0  ;;  %v1360_v46 = vadd.f32 %v1359_v22, %v999_v37  ;;  %v3657_v10 = vld [vmem:[%s4689_s10 + $0x300] sm:$0xff] }
 0x611   : > { %v1432_v13 = vmax.f32 %v1334_v7, 0.0  ;;  %2615 = vmatpush.bf16.msra.mxu3 %v3633_v1  ;;  %v1402_v48 = vadd.f32 %v1401_v23, %v1002_v40 }
 0x612   : > { %v1447_v17 = vpack.c.bf16 %v1431_v11, %v1415_v9  ;;  %2629 = vmatpush.bf16.msrb.mxu2 %v3641_v63  ;;  %v1418_v58 = vmax.f32 %v1360_v46, 0.0 }
 0x613   : > { %2651 = vmatpush.bf16.msrb.mxu1 %v3663_v59  ;;  %v1448_v20 = vpack.c.bf16 %v1432_v13, %v1416_v12  ;;  %v1421_v61 = vmax.f32 %v1402_v48, 0.0 }
 0x614   : > { %2693 = vmatpush.bf16.msra.mxu0 %v3687_v0  ;;  %2616 = vmatmul.bf16.vlgmr.msra.gmra.mxu3 %v1447_v17 }
 0x615   : > { %2664 = vmatpush.bf16.msrb.mxu3 %v3672_v6  ;;  %2630 = vmatmul.bf16.vlgmr.msrb.gmra.mxu2 %v1448_v20  ;;  %v1373_v29 = vpop.f32.mrf.mxu3  ;;  %v3673_v6 = vld [vmem:[%s4689_s10 + $0x380] sm:$0xff] }
 0x616   : > { %2678 = vmatpush.bf16.msra.mxu2 %v3680_v8  ;;  %v1387_v31 = vpop.f32.mrf.mxu2  ;;  %v1374_v0 = vadd.f32 %v1373_v29, %v1000_v2 }
 0x617   : > { %2652 = vmatpush.bf16.msrb.mxu1 %v3662_v52  ;;  %v1361_v35 = vpop.f32.mrf.mxu1  ;;  %v1388_v18 = vadd.f32 %v1387_v31, %v1001_v54 }
 0x618   : > { %2694 = vmatpush.bf16.msra.mxu0 %v3686_v56  ;;  %v1403_v38 = vpop.f32.mrf.mxu0  ;;  %v1362_v42 = vadd.f32 %v1361_v35, %v999_v37  ;;  %v1419_v8 = vmax.f32 %v1374_v0, 0.0 }
 0x619   : > { %2665 = vmatpush.bf16.msrb.mxu3 %v3671_v15  ;;  %v1404_v44 = vadd.f32 %v1403_v38, %v1002_v40  ;;  %v1420_v9 = vmax.f32 %v1388_v18, 0.0 }
 0x61a   : > { %2679 = vmatpush.bf16.msra.mxu2 %v3679_v21  ;;  %v1434_v51 = vmax.f32 %v1362_v42, 0.0 }
 0x61b   : > { %2653 = vmatpush.bf16.msrb.mxu1 %v3661_v19  ;;  %v1437_v55 = vmax.f32 %v1404_v44, 0.0  ;;  %v3732_v19 = vld [vmem:[%s4690_s11] ss:$0 sm:$0xff] }
 0x61c   : > { %2695 = vmatpush.bf16.msra.mxu0 %v3685_v24  ;;  %v1450_v1 = vpack.c.bf16 %v1434_v51, %v1418_v58 }
 0x61d   : > { %2666 = vmatpush.bf16.msrb.mxu3 %v3670_v25  ;;  %v1375_v49 = vpop.f32.mrf.mxu3  ;;  %v1453_v4 = vpack.c.bf16 %v1437_v55, %v1421_v61 }
 0x61e   : > { %2680 = vmatpush.bf16.msra.mxu2 %v3678_v26  ;;  %v1389_v3 = vpop.f32.mrf.mxu2  ;;  %v1376_v59 = vadd.f32 %v1375_v49, %v1000_v2 }
 0x61f   : > { %2654 = vmatpush.bf16.msrb.mxu1 %v3660_v27  ;;  %v1390_v62 = vadd.f32 %v1389_v3, %v1001_v54 }
 0x620   : > { %2696 = vmatpush.bf16.msra.mxu0 %v3684_v28  ;;  %v1435_v63 = vmax.f32 %v1376_v59, 0.0 }
 0x621   : > { %2667 = vmatpush.bf16.msrb.mxu3 %v3669_v30  ;;  %v1436_v7 = vmax.f32 %v1390_v62, 0.0 }
 0x622   : > { %2681 = vmatpush.bf16.msra.mxu2 %v3677_v32  ;;  %v1451_v11 = vpack.c.bf16 %v1435_v63, %v1419_v8 }
 0x623   : > { %2655 = vmatpush.bf16.msrb.mxu1 %v3659_v33  ;;  %v1452_v52 = vpack.c.bf16 %v1436_v7, %v1420_v9 }
 0x624   : > { %2697 = vmatpush.bf16.msra.mxu0 %v3683_v34 }
 0x625   : > { %2668 = vmatpush.bf16.msrb.mxu3 %v3668_v36 }
 0x626   : > { %2682 = vmatpush.bf16.msra.mxu2 %v3676_v39 }
 0x627   : > { %2656 = vmatpush.bf16.msrb.mxu1 %v3658_v41 }
 0x628   : > { %2698 = vmatpush.bf16.msra.mxu0 %v3682_v43 }
 0x629   : > { %2669 = vmatpush.bf16.msrb.mxu3 %v3667_v45 }
 0x62a   : > { %2683 = vmatpush.bf16.msra.mxu2 %v3675_v47 }
 0x62b   : > { %2657 = vmatpush.bf16.msrb.mxu1 %v3657_v10 }
 0x62c   : > { %2699 = vmatpush.bf16.msra.mxu0 %v3681_v53 }
 0x62d   : > { %2670 = vmatpush.bf16.msrb.mxu3 %v3666_v57 }
 0x62e   : > { %2684 = vmatpush.bf16.msra.mxu2 %v3674_v60  ;;  %2658 = vmatmul.bf16.vlgmr.msrb.gmra.mxu1 %v1450_v1 }
 0x62f   : > { %2700 = vmatmul.bf16.vlgmr.msra.gmra.mxu0 %v1453_v4 }
 0x631   : > { %2671 = vmatpush.bf16.msrb.mxu3 %v3665_v5 }
 0x632   : > { %2685 = vmatpush.bf16.msra.mxu2 %v3673_v6 }
 0x634   : > { %2672 = vmatmul.bf16.vlgmr.msrb.gmra.mxu3 %v1451_v11 }
 0x635   : > { %2686 = vmatmul.bf16.vlgmr.msra.gmra.mxu2 %v1452_v52 }
 0x66b   : > { %v2491_v12 = vpop.f32.mrf.mxu1 }
 0x66c   : > { %v2533_v17 = vpop.f32.mrf.mxu0  ;;  %v2492_v24 = vadd.f32 %v3732_v19, %v2491_v12 }
 0x673   : > { %v2493_v15 = vpop.f32.mrf.mxu1 }
 0x674   : > { %v2535_v22 = vpop.f32.mrf.mxu0  ;;  %v2494_v31 = vadd.f32 %v3732_v19, %v2493_v15 }
 0x677   : > { %v2505_v13 = vpop.f32.mrf.mxu3 }
 0x678   : > { %v2519_v56 = vpop.f32.mrf.mxu2  ;;  %v2506_v25 = vadd.f32 %v2505_v13, %v2492_v24 }
 0x67a   : > { %v2520_v29 = vadd.f32 %v2519_v56, %v2506_v25 }
 0x67b   : > { %v2547_v23 = vpop.f32.mrf.mxu1 }
 0x67c   : > { %v2589_v28 = vpop.f32.mrf.mxu0  ;;  %v2534_v32 = vadd.f32 %v2533_v17, %v2520_v29 }
 0x67e   : > { %v2548_v35 = vadd.f32 %v2547_v23, %v2534_v32 }
 0x67f   : > { %v2507_v20 = vpop.f32.mrf.mxu3 }
 0x680   : > { %v2521_v21 = vpop.f32.mrf.mxu2  ;;  %v2508_v33 = vadd.f32 %v2507_v20, %v2494_v31 }
 0x682   : > { %v2522_v36 = vadd.f32 %v2521_v21, %v2508_v33 }
 0x683   : > { %v2549_v30 = vpop.f32.mrf.mxu1 }
 0x684   : > { %v2591_v38 = vpop.f32.mrf.mxu0  ;;  %v2536_v41 = vadd.f32 %v2535_v22, %v2522_v36 }
 0x686   : > { %v2550_v43 = vadd.f32 %v2549_v30, %v2536_v41 }
 0x687   : > { %v2561_v26 = vpop.f32.mrf.mxu3 }
 0x688   : > { %v2575_v27 = vpop.f32.mrf.mxu2  ;;  %v2562_v39 = vadd.f32 %v2561_v26, %v2548_v35 }
 0x68a   : > { %v2576_v42 = vadd.f32 %v2575_v27, %v2562_v39 }
 0x68b   : > { %v2603_v40 = vpop.f32.mrf.mxu1 }
 0x68c   : > { %v2590_v45 = vadd.f32 %v2589_v28, %v2576_v42  ;;  %v2645_v48 = vpop.f32.mrf.mxu0 }
 0x68e   : > { %v2604_v10 = vadd.f32 %v2603_v40, %v2590_v45 }
 0x68f   : > { %v2563_v34 = vpop.f32.mrf.mxu3 }
 0x690   : > { %v2577_v37 = vpop.f32.mrf.mxu2  ;;  %v2564_v46 = vadd.f32 %v2563_v34, %v2550_v43 }
 0x692   : > { %v2578_v2 = vadd.f32 %v2577_v37, %v2564_v46  ;;  %v3734_v46 = vld [vmem:[%s4692_s13] ss:$0 sm:$0xff] }
 0x693   : > { %v2605_v49 = vpop.f32.mrf.mxu1 }
 0x694   : > { %v2592_v3 = vadd.f32 %v2591_v38, %v2578_v2  ;;  %v2647_v57 = vpop.f32.mrf.mxu0 }
 0x696   : > { %v2606_v59 = vadd.f32 %v2605_v49, %v2592_v3 }
 0x697   : > { %v2617_v44 = vpop.f32.mrf.mxu3 }
 0x698   : > { %v2631_v47 = vpop.f32.mrf.mxu2  ;;  %v2618_v51 = vadd.f32 %v2617_v44, %v2604_v10  ;;  %v3733_v44 = vld [vmem:[%s4691_s12] ss:$0 sm:$0xff] }
 0x69a   : > { %v2632_v54 = vadd.f32 %v2631_v47, %v2618_v51 }
 0x69c   : > { %v2646_v61 = vadd.f32 %v2645_v48, %v2632_v54 }
 0x69f   : > { %v2619_v53 = vpop.f32.mrf.mxu3 }
 0x6a0   : > { %v2633_v55 = vpop.f32.mrf.mxu2  ;;  %v2620_v60 = vadd.f32 %v2619_v53, %v2606_v59 }
 0x6a2   : > { %v2634_v1 = vadd.f32 %v2633_v55, %v2620_v60 }
 0x6a4   : > { %v2648_v7 = vadd.f32 %v2647_v57, %v2634_v1 }
 0x6ab   : > { %v2659_v58 = vpop.f32.mrf.mxu1 }
 0x6ac   : > { %v2660_v62 = vadd.f32 %v2659_v58, %v2646_v61  ;;  %v2701_v5 = vpop.f32.mrf.mxu0 }
 0x6b3   : > { %v2661_v6 = vpop.f32.mrf.mxu1 }
 0x6b4   : > { %v2662_v9 = vadd.f32 %v2661_v6, %v2648_v7  ;;  %v2703_v15 = vpop.f32.mrf.mxu0 }
 0x6b7   : > { %v2673_v0 = vpop.f32.mrf.mxu3 }
 0x6b8   : > { %v2674_v18 = vadd.f32 %v2673_v0, %v2660_v62  ;;  %v2687_v4 = vpop.f32.mrf.mxu2 }
 0x6ba   : > { %v2688_v63 = vadd.f32 %v2687_v4, %v2674_v18 }
 0x6bc   : > { %v2702_v8 = vadd.f32 %v2701_v5, %v2688_v63 }
 0x6be   : > { %v2706_v11 = vadd.f32 %v2702_v8, %v4119_v14 }
 0x6bf   : > { %v2675_v52 = vpop.f32.mrf.mxu3 }
 0x6c0   : > { %v2676_v12 = vadd.f32 %v2675_v52, %v2662_v9  ;;  %v2710_v13 = vsel %vm509_vm0, %v2706_v11, 0.0  ;;  %v2689_v56 = vpop.f32.mrf.mxu2 }
 0x6c1   : > { %2711 = vadd.xlane.f32.xlu1 %v2710_v13 }
 0x6c2   : > { %v2690_v17 = vadd.f32 %v2689_v56, %v2676_v12 }
 0x6c4   : > { %v2704_v20 = vadd.f32 %v2703_v15, %v2690_v17 }
 0x6c6   : > { %v2707_v21 = vadd.f32 %v2704_v20, %v4121_v16 }
 0x6c8   : > { %v2713_v22 = vsel %vm509_vm0, %v2707_v21, 0.0 }
 0x6c9   : > { %2714 = vadd.xlane.f32.xlu1 %v2713_v22 }
 0x734   : > { %v2712_v19 = vpop.xlane.xlu1 %2711 }
 0x735   : > { %v2716_v23 = vmul.f32 %v2712_v19, %v3984_v50 }
 0x737   : > { %v2718_v24 = vsub.f32 %v2706_v11, %v2716_v23 }
 0x739   : > { %v2720_v25 = vmul.f32 %v2718_v24, %v2718_v24 }
 0x73b   : > { %v2722_v14 = vsel %vm509_vm0, %v2720_v25, 0.0 }
 0x73c   : > { %2723 = vadd.xlane.f32.xlu1 %v2722_v14  ;;  %v2715_v26 = vpop.xlane.xlu1 %2714 }
 0x73d   : > { %v2717_v27 = vmul.f32 %v2715_v26, %v3984_v50 }
 0x73f   : > { %v2719_v28 = vsub.f32 %v2707_v21, %v2717_v27 }
 0x741   : > { %v2721_v29 = vmul.f32 %v2719_v28, %v2719_v28 }
 0x743   : > { %v2725_v30 = vsel %vm509_vm0, %v2721_v29, 0.0 }
 0x744   : > { %2726 = vadd.xlane.f32.xlu2 %v2725_v30 }
 0x7af   : > { %v2724_v16 = vpop.xlane.xlu1 %2723 }
 0x7b0   : > { %v2728_v31 = vmul.f32 %v2724_v16, %v3984_v50 }
 0x7b2   : > { %v2730_v32 = vadd.f32 1e-05, %v2728_v31 }
 0x7b4   : > { %3773 = vrsqrt.f32 %v2730_v32  ;;  %vm2738_vm13 = vweird.f32 %v2730_v32 }
 0x7b7   : > { %v2727_v33 = vpop.xlane.xlu2 %2726 }
 0x7b8   : > { %v2729_v34 = vmul.f32 %v2727_v33, %v3984_v50 }
 0x7ba   : > { %v3774_v35 = vpop.eup %3773  ;;  %v2731_v36 = vadd.f32 1e-05, %v2729_v34 }
 0x7bb   : > { %v2733_v37 = vmul.f32 %v3774_v35, %v2730_v32  ;;  %vm2739_vm12 = vweird.f32 %v3774_v35 }
 0x7bc   : > { %3775 = vrsqrt.f32 %v2731_v36  ;;  %vm2740_vm14 = vmor %vm2738_vm13, %vm2739_vm12  ;;  %vm2748_vm1 = vweird.f32 %v2731_v36 }
 0x7bd   : > { %v2734_v38 = vmul.f32 %v3774_v35, %v2733_v37 }
 0x7bf   : > { %v2735_v39 = vmul.f32 0.5, %v2734_v38 }
 0x7c1   : > { %v2736_v40 = vsub.f32 1.5, %v2735_v39 }
 0x7c2   : > { %v3776_v41 = vpop.eup %3775 }
 0x7c3   : > { %v2737_v42 = vmul.f32 %v3774_v35, %v2736_v40  ;;  %v2743_v43 = vmul.f32 %v3776_v41, %v2731_v36  ;;  %vm2749_vm15 = vweird.f32 %v3776_v41 }
 0x7c4   : > { %vm2750_vm2 = vmor %vm2748_vm1, %vm2749_vm15 }
 0x7c5   : > { %v2741_v45 = vsel %vm2740_vm14, %v3774_v35, %v2737_v42  ;;  %v2744_v50 = vmul.f32 %v3776_v41, %v2743_v43 }
 0x7c6   : > { %v2752_v47 = vmul.f32 %v2741_v45, %v2718_v24 }
 0x7c7   : > { %v2745_v48 = vmul.f32 0.5, %v2744_v50 }
 0x7c8   : > { %v2757_v49 = vmul.f32 %v3733_v44, %v2752_v47 }
 0x7c9   : > { %v2746_v10 = vsub.f32 1.5, %v2745_v48 }
 0x7ca   : > { %v2762_v2 = vadd.f32 %v3734_v46, %v2757_v49 }
 0x7cb   : > { %v2747_v51 = vmul.f32 %v3776_v41, %v2746_v10 }
 0x7cc   : > { %2764 = vst.msk [vmem:[%s481_s18] sm:$0xff] %vm509_vm0, %v2762_v2 }
 0x7cd   : > { %v2751_v3 = vsel %vm2750_vm2, %v3776_v41, %v2747_v51 }
 0x7ce   : > { %v2753_v53 = vmul.f32 %v2751_v3, %v2719_v28 }
 0x7d0   : > { %v2758_v54 = vmul.f32 %v3733_v44, %v2753_v53 }
 0x7d2   : > { %v2763_v55 = vadd.f32 %v3734_v46, %v2758_v54 }
 0x7d4   : > { %2765 = vst.msk [vmem:[%s481_s18 + $0x8] sm:$0xff] %vm509_vm0, %v2763_v55 }
 0x7d5 PF: > { %s24_s29 = sadd.s32 1, %s3783_s29  }
 0x7d6   : > { %p21_p4 = scmp.ge.s32.totalorder %s24_s29, 4  }
 0x7d8   :  { %23 = sbr.rel (!%p21_p4) target bundleno = 1 (0x1), region = 109 }

</bundles_post_ra>
